<compile_context>
chip_gen: v6e
topology: v6e:2x2x1
jax: 0.10.0
libtpu: 0.0.40
codegen_flags: <defaults>
</compile_context>

<pallas_src>
import functools

import jax
import jax.numpy as jnp
from jax.experimental import pallas as pl
from jax.experimental.pallas import tpu as pltpu

NUM_CLASSES = 10
BN_EPS = 1e-5
VMEM_LIMIT_BYTES = 48 * 1024 * 1024


@functools.lru_cache(maxsize=None)
def _pick_tm():
    """M-tile size: smaller on 64 MiB-VMEM parts (v7x), larger on 128 MiB parts."""
    try:
        vmem = pltpu.get_tpu_info().vmem_capacity_bytes
        return 1024 if vmem <= (64 << 20) else 4096
    except Exception:
        return 1024


# ------------------------------------------------------------------ kernels --

def _matmul_bn_kernel(x_ref, w_ref, s_ref, o_ref, *, relu):
    # x: (TM, K) bf16, w: (K, Cout) bf16 (BN/bias folded), s: (1, Cout) f32
    y = jnp.dot(x_ref[...], w_ref[...], preferred_element_type=jnp.float32)
    y = y + s_ref[...]
    if relu:
        y = jnp.maximum(y, 0.0)
    o_ref[...] = y.astype(o_ref.dtype)


def _matmul_bn_res_kernel(x_ref, w_ref, s_ref, r_ref, o_ref, *, relu):
    # Same as above but with the residual identity fused into the epilogue.
    y = jnp.dot(x_ref[...], w_ref[...], preferred_element_type=jnp.float32)
    y = y + s_ref[...] + r_ref[...].astype(jnp.float32)
    if relu:
        y = jnp.maximum(y, 0.0)
    o_ref[...] = y.astype(o_ref.dtype)


def matmul_fused(x, w, shift, residual, relu):
    """(M,K)bf16 @ (K,Cout)bf16 + shift(f32) [+ residual] [+ReLU] -> (M,Cout)bf16."""
    M, K = x.shape
    cout = w.shape[1]
    tm_max = _pick_tm()
    tm = M if M <= tm_max else tm_max          # tiled tm is a multiple of 8
    grid = (pl.cdiv(M, tm),)

    bytes_accessed = (M * K + K * cout) * 2 + cout * 4 + M * cout * 2
    if residual is not None:
        bytes_accessed += M * cout * 2
    cost = pl.CostEstimate(flops=2 * M * K * cout, transcendentals=0,
                           bytes_accessed=bytes_accessed)

    x_spec = pl.BlockSpec((tm, K), lambda i: (i, 0))
    w_spec = pl.BlockSpec((K, cout), lambda i: (0, 0))       # replicated weights
    s_spec = pl.BlockSpec((1, cout), lambda i: (0, 0))
    o_spec = pl.BlockSpec((tm, cout), lambda i: (i, 0))
    cparams = pltpu.CompilerParams(dimension_semantics=("parallel",),
                                   vmem_limit_bytes=VMEM_LIMIT_BYTES)
    out_shape = jax.ShapeDtypeStruct((M, cout), jnp.bfloat16)

    if residual is None:
        kernel = functools.partial(_matmul_bn_kernel, relu=relu)
        return pl.pallas_call(
            kernel, out_shape=out_shape, grid=grid,
            in_specs=[x_spec, w_spec, s_spec], out_specs=o_spec,
            compiler_params=cparams, cost_estimate=cost,
        )(x, w, shift)

    kernel = functools.partial(_matmul_bn_res_kernel, relu=relu)
    r_spec = pl.BlockSpec((tm, cout), lambda i: (i, 0))
    return pl.pallas_call(
        kernel, out_shape=out_shape, grid=grid,
        in_specs=[x_spec, w_spec, s_spec, r_spec], out_specs=o_spec,
        compiler_params=cparams, cost_estimate=cost,
    )(x, w, shift, residual)


def _maxpool_kernel(x_ref, o_ref):
    # x: (TR, 2, OW, 2*C); the 2x2 pooling window lives in dims 1 and the lane halves.
    c = o_ref.shape[-1]
    v = x_ref[...]
    m = jnp.maximum(v[:, 0], v[:, 1])              # max over the two pooled rows
    o_ref[...] = jnp.maximum(m[..., :c], m[..., c:])   # max over the two pooled cols


def maxpool_2x2_s2_p1(x):
    """nn.MaxPool2d(kernel_size=2, stride=2, padding=1) on NHWC (bf16)."""
    N, H, W, C = x.shape
    OH = H // 2 + 1
    OW = W // 2 + 1
    pad_b = 2 * OH - H - 1
    pad_r = 2 * OW - W - 1
    xp = jnp.pad(x, ((0, 0), (1, pad_b), (1, pad_r), (0, 0)),
                 constant_values=-jnp.inf)
    rows = N * OH
    xr = xp.reshape(rows, 2, OW, 2 * C)            # metadata-only reshape in HBM
    tr = rows if rows <= 512 else 512
    grid = (pl.cdiv(rows, tr),)
    out = pl.pallas_call(
        _maxpool_kernel,
        out_shape=jax.ShapeDtypeStruct((rows, OW, C), x.dtype),
        grid=grid,
        in_specs=[pl.BlockSpec((tr, 2, OW, 2 * C), lambda i: (i, 0, 0, 0))],
        out_specs=pl.BlockSpec((tr, OW, C), lambda i: (i, 0, 0)),
        compiler_params=pltpu.CompilerParams(dimension_semantics=("parallel",),
                                             vmem_limit_bytes=VMEM_LIMIT_BYTES),
    )(xr)
    return out.reshape(N, OH, OW, C)


def _head_kernel(x_ref, w_ref, b_ref, o_ref):
    # x: (N, H*W, C) bf16, w: (C, num_classes) f32, b: (1, num_classes) f32
    pooled = jnp.mean(x_ref[...].astype(jnp.float32), axis=1)   # adaptive avg pool (1,1)
    logits = jnp.dot(pooled, w_ref[...],
                     preferred_element_type=jnp.float32) + b_ref[...]
    m = jnp.max(logits, axis=-1, keepdims=True)
    s = logits - m
    lse = jnp.log(jnp.sum(jnp.exp(s), axis=-1, keepdims=True))
    o_ref[...] = s - lse                                        # LogSoftmax(dim=-1)


def avgpool_linear_logsoftmax(x, w, b):
    N, H, W, C = x.shape
    num_classes = w.shape[1]
    xr = x.reshape(N, H * W, C)
    vmem = pl.BlockSpec(memory_space=pltpu.MemorySpace.VMEM)
    return pl.pallas_call(
        _head_kernel,
        out_shape=jax.ShapeDtypeStruct((N, num_classes), jnp.float32),
        in_specs=[vmem, vmem, vmem],
        out_specs=pl.BlockSpec(memory_space=pltpu.MemorySpace.VMEM),
    )(xr, w, b.reshape(1, num_classes))


# --------------------------------------------------------------- conv + glue --

def conv2d_bn(x, conv_p, bn_p, stride, padding, relu, residual=None):
    """Conv2d (PyTorch weight layout (Cout,Cin,KH,KW)) + BatchNorm(eval) folded
    into the weights, optional fused residual add and ReLU."""
    w, b = conv_p
    gamma, beta, rmean, rvar = bn_p
    N, H, W, Cin = x.shape
    Cout, _, KH, KW = w.shape
    OH = (H + 2 * padding - KH) // stride + 1
    OW = (W + 2 * padding - KW) // stride + 1
    xp = jnp.pad(x, ((0, 0), (padding, padding), (padding, padding), (0, 0)))
    patches = []
    for ki in range(KH):
        for kj in range(KW):
            patches.append(
                xp[:, ki:ki + stride * (OH - 1) + 1:stride,
                      kj:kj + stride * (OW - 1) + 1:stride, :])
    pm = jnp.concatenate(patches, axis=-1).reshape(N * OH * OW, KH * KW * Cin)

    # Fold conv bias + BN (eval / running-stats) into the weight matrix + a shift.
    inv_std = 1.0 / jnp.sqrt(rvar.astype(jnp.float32) + BN_EPS)
    scale = gamma.astype(jnp.float32) * inv_std
    shift = (b.astype(jnp.float32) - rmean.astype(jnp.float32)) * scale \
        + beta.astype(jnp.float32)
    wm = jnp.transpose(w, (2, 3, 1, 0)).reshape(KH * KW * Cin, Cout)
    wm = (wm.astype(jnp.float32) * scale[None, :]).astype(jnp.bfloat16)

    res2d = None if residual is None else residual.reshape(N * OH * OW, Cout)
    y = matmul_fused(pm.astype(jnp.bfloat16), wm, shift.reshape(1, Cout),
                     res2d, relu)
    return y.reshape(N, OH, OW, Cout)


def simple_block(x, p, is_plain=False):
    in_c = x.shape[-1]
    out_c = p['conv1'][0].shape[0]
    stride = 1 if in_c == out_c else 2
    identity = x
    y = conv2d_bn(x, p['conv1'], p['bn1'], stride=stride, padding=1, relu=True)
    if is_plain:
        return conv2d_bn(y, p['conv2'], p['bn2'], stride=1, padding=1, relu=False)
    if in_c != out_c:
        # option-A shortcut: AvgPool2d(k=1, stride=2) == strided subsample,
        # then zero-pad channels (double them).
        identity = identity[:, ::2, ::2, :]
        identity = jnp.concatenate([identity, jnp.zeros_like(identity)], axis=-1)
    # conv2 + BN + residual add + ReLU fused in one kernel epilogue.
    return conv2d_bn(y, p['conv2'], p['bn2'], stride=1, padding=1, relu=True,
                     residual=identity)


# ------------------------------------------------------------------- params --

def init_conv(key, cin, cout, k):
    kw, kb = jax.random.split(key)
    fan_in = cin * k * k
    w = jax.random.normal(kw, (cout, cin, k, k), jnp.float32) * (2.0 / fan_in) ** 0.5
    b = jax.random.normal(kb, (cout,), jnp.float32) * 0.01
    return w, b


def init_bn(c):
    # gamma, beta, running_mean, running_var (PyTorch defaults)
    return (jnp.ones((c,), jnp.float32), jnp.zeros((c,), jnp.float32),
            jnp.zeros((c,), jnp.float32), jnp.ones((c,), jnp.float32))


def init_simple_block(key, cin, cout):
    k1, k2 = jax.random.split(key)
    return {'conv1': init_conv(k1, cin, cout, 3), 'bn1': init_bn(cout),
            'conv2': init_conv(k2, cout, cout, 3), 'bn2': init_bn(cout)}


def init_resnet(key, num_blocks=(1, 1, 1, 0), num_classes=NUM_CLASSES):
    # SimpleBlock configuration of ResNet.__init__
    channels = [(16, 16), (16, 32), (32, 64)]
    keys = jax.random.split(key, 16)
    params = {'conv1': init_conv(keys[0], 3, 16, 3), 'norm': init_bn(16)}
    ki = 1
    layers = []
    for li, (cin, cout) in enumerate(channels):
        nb = num_blocks[li]
        if nb == 0:
            layers.append(None)
            continue
        blocks = [init_simple_block(keys[ki], cin, cout)]
        ki += 1
        for _ in range(nb):
            blocks.append(init_simple_block(keys[ki], cout, cout))
            ki += 1
        layers.append(blocks)
    params['layers'] = layers
    # nn.Linear(64, num_classes) with kaiming_normal_ weight, zero bias
    params['fc_w'] = jax.random.normal(keys[ki], (num_classes, channels[-1][-1]),
                                       jnp.float32) * (2.0 / channels[-1][-1]) ** 0.5
    params['fc_b'] = jnp.zeros((num_classes,), jnp.float32)
    return params


# ------------------------------------------------------------------ forward --

def resnet_forward(params, x_nchw, is_plain=False):
    # PyTorch-style NCHW input -> NHWC (bf16) internally
    x = jnp.transpose(x_nchw, (0, 2, 3, 1)).astype(jnp.bfloat16)
    # conv1 (3x3, s=1, p=1) + BN + ReLU
    x = conv2d_bn(x, params['conv1'], params['norm'], stride=1, padding=1, relu=True)
    # maxpool 2x2, s=2, p=1
    x = maxpool_2x2_s2_p1(x)
    # conv2_x / conv3_x / conv4_x (conv5_x is None for SimpleBlock config)
    for blocks in params['layers']:
        if blocks is None:
            continue
        for bp in blocks:
            x = simple_block(x, bp, is_plain=is_plain)
    # avgpool -> flatten -> linear -> log_softmax (fused head kernel, f32)
    return avgpool_linear_logsoftmax(x, params['fc_w'].T.astype(jnp.float32),
                                     params['fc_b'])


if __name__ == "__main__":
    key = jax.random.PRNGKey(0)
    kx, kp = jax.random.split(key)
    x = jax.random.normal(kx, (2, 3, 16, 16), jnp.float32)   # small NCHW input
    params = init_resnet(kp, num_blocks=(1, 1, 1, 0), num_classes=NUM_CLASSES)

    fwd = jax.jit(resnet_forward)
    out = fwd(params, x)
    jax.block_until_ready(out)

    assert out.shape == (2, NUM_CLASSES), out.shape
    # rows of log-softmax output must exponentiate-sum to 1
    assert bool(jnp.allclose(jnp.exp(out).sum(-1), 1.0, atol=1e-4))
    print("KERNEL_OK")
</pallas_src>

<mosaic_0001>
module attributes {stable_mosaic.version = 11 : i64} {
  func.func @_matmul_bn_kernel(%arg0: i32, %arg1: memref<512x27xbf16, #tpu.memory_space<vmem>>, %arg2: memref<27x16xbf16, #tpu.memory_space<vmem>>, %arg3: memref<1x16xf32, #tpu.memory_space<vmem>>, %arg4: memref<512x16xbf16, #tpu.memory_space<vmem>>) attributes {dimension_semantics = [#tpu.dimension_semantics<parallel>], iteration_bounds = array<i64: 1>, scalar_prefetch = 0 : i64, scratch_operands = 0 : i64, tpu.core_type = #tpu.core_type<tc>, window_params = [{transform_indices = @transform_0, window_bounds = array<i64: 512, 27>}, {pipeline_mode = #tpu.pipeline_mode<synchronous>, transform_indices = @transform_1, window_bounds = array<i64: 27, 16>}, {pipeline_mode = #tpu.pipeline_mode<synchronous>, transform_indices = @transform_2, window_bounds = array<i64: 1, 16>}, {transform_indices = @transform_3, window_bounds = array<i64: 512, 16>}]} {
    %c0 = arith.constant 0 : index
    %c0_0 = arith.constant 0 : index
    %0 = vector.load %arg1[%c0, %c0_0] : memref<512x27xbf16, #tpu.memory_space<vmem>>, vector<512x27xbf16>
    %c0_1 = arith.constant 0 : index
    %c0_2 = arith.constant 0 : index
    %1 = vector.load %arg2[%c0_1, %c0_2] : memref<27x16xbf16, #tpu.memory_space<vmem>>, vector<27x16xbf16>
    %cst = arith.constant dense<0.000000e+00> : vector<512x16xf32>
    %2 = tpu.matmul %0, %1, %cst {dimension_numbers = #tpu.dot_dimension_numbers<[1], [0], [0], [1], [0, 0, 1, 1], [], []>} : vector<512x27xbf16>, vector<27x16xbf16>, vector<512x16xf32> -> vector<512x16xf32>
    %c0_3 = arith.constant 0 : index
    %c0_4 = arith.constant 0 : index
    %3 = vector.load %arg3[%c0_3, %c0_4] : memref<1x16xf32, #tpu.memory_space<vmem>>, vector<1x16xf32>
    %4 = vector.broadcast %3 : vector<1x16xf32> to vector<512x16xf32>
    %5 = arith.addf %2, %4 : vector<512x16xf32>
    %cst_5 = arith.constant 0.000000e+00 : f32
    %6 = vector.broadcast %cst_5 : f32 to vector<512x16xf32>
    %7 = arith.maximumf %5, %6 : vector<512x16xf32>
    %8 = arith.truncf %7 : vector<512x16xf32> to vector<512x16xbf16>
    %c0_6 = arith.constant 0 : index
    %c0_7 = arith.constant 0 : index
    %9 = vector.load %arg4[%c0_6, %c0_7] : memref<512x16xbf16, #tpu.memory_space<vmem>>, vector<512x16xbf16>
    tpu.vector_store %arg4[%c0_6, %c0_7], %8 {strides = array<i32>} : memref<512x16xbf16, #tpu.memory_space<vmem>>, vector<512x16xbf16>,
    return
  }
  func.func @transform_0(%arg0: i32) -> (i32, i32) {
    %c0_i32 = arith.constant 0 : i32
    %c0_i32_0 = arith.constant 0 : i32
    return %arg0, %c0_i32 : i32, i32
  }
  func.func @transform_1(%arg0: i32) -> (i32, i32) {
    %c0_i32 = arith.constant 0 : i32
    %c0_i32_0 = arith.constant 0 : i32
    %c0_i32_1 = arith.constant 0 : i32
    return %c0_i32, %c0_i32_0 : i32, i32
  }
  func.func @transform_2(%arg0: i32) -> (i32, i32) {
    %c0_i32 = arith.constant 0 : i32
    %c0_i32_0 = arith.constant 0 : i32
    %c0_i32_1 = arith.constant 0 : i32
    return %c0_i32, %c0_i32_0 : i32, i32
  }
  func.func @transform_3(%arg0: i32) -> (i32, i32) {
    %c0_i32 = arith.constant 0 : i32
    %c0_i32_0 = arith.constant 0 : i32
    return %arg0, %c0_i32 : i32, i32
  }
}

module attributes {stable_mosaic.version = 11 : i64} {
  func.func @_maxpool_kernel(%arg0: i32, %arg1: memref<18x2x9x32xbf16, #tpu.memory_space<vmem>>, %arg2: memref<18x9x16xbf16, #tpu.memory_space<vmem>>) attributes {dimension_semantics = [#tpu.dimension_semantics<parallel>], iteration_bounds = array<i64: 1>, scalar_prefetch = 0 : i64, scratch_operands = 0 : i64, tpu.core_type = #tpu.core_type<tc>, window_params = [{transform_indices = @transform_0, window_bounds = array<i64: 18, 2, 9, 32>}, {transform_indices = @transform_1, window_bounds = array<i64: 18, 9, 16>}]} {
    %c0 = arith.constant 0 : index
    %c0_0 = arith.constant 0 : index
    %c0_1 = arith.constant 0 : index
    %c0_2 = arith.constant 0 : index
    %0 = vector.load %arg1[%c0, %c0_0, %c0_1, %c0_2] : memref<18x2x9x32xbf16, #tpu.memory_space<vmem>>, vector<18x2x9x32xbf16>
    %1 = vector.extract_strided_slice %0 {offsets = [0, 0, 0, 0], sizes = [18, 1, 9, 32], strides = [1, 1, 1, 1]} : vector<18x2x9x32xbf16> to vector<18x1x9x32xbf16>
    %2 = vector.shape_cast %1 : vector<18x1x9x32xbf16> to vector<18x9x32xbf16>
    %3 = vector.extract_strided_slice %0 {offsets = [0, 1, 0, 0], sizes = [18, 1, 9, 32], strides = [1, 1, 1, 1]} : vector<18x2x9x32xbf16> to vector<18x1x9x32xbf16>
    %4 = vector.shape_cast %3 : vector<18x1x9x32xbf16> to vector<18x9x32xbf16>
    %5 = arith.maximumf %2, %4 : vector<18x9x32xbf16>
    %6 = vector.extract_strided_slice %5 {offsets = [0, 0, 0], sizes = [18, 9, 16], strides = [1, 1, 1]} : vector<18x9x32xbf16> to vector<18x9x16xbf16>
    %7 = vector.extract_strided_slice %5 {offsets = [0, 0, 16], sizes = [18, 9, 16], strides = [1, 1, 1]} : vector<18x9x32xbf16> to vector<18x9x16xbf16>
    %8 = arith.maximumf %6, %7 : vector<18x9x16xbf16>
    %c0_3 = arith.constant 0 : index
    %c0_4 = arith.constant 0 : index
    %c0_5 = arith.constant 0 : index
    %9 = vector.load %arg2[%c0_3, %c0_4, %c0_5] : memref<18x9x16xbf16, #tpu.memory_space<vmem>>, vector<18x9x16xbf16>
    tpu.vector_store %arg2[%c0_3, %c0_4, %c0_5], %8 {strides = array<i32>} : memref<18x9x16xbf16, #tpu.memory_space<vmem>>, vector<18x9x16xbf16>,
    return
  }
  func.func @transform_0(%arg0: i32) -> (i32, i32, i32, i32) {
    %c0_i32 = arith.constant 0 : i32
    %c0_i32_0 = arith.constant 0 : i32
    %c0_i32_1 = arith.constant 0 : i32
    %c0_i32_2 = arith.constant 0 : i32
    return %arg0, %c0_i32, %c0_i32_0, %c0_i32_1 : i32, i32, i32, i32
  }
  func.func @transform_1(%arg0: i32) -> (i32, i32, i32) {
    %c0_i32 = arith.constant 0 : i32
    %c0_i32_0 = arith.constant 0 : i32
    %c0_i32_1 = arith.constant 0 : i32
    return %arg0, %c0_i32, %c0_i32_0 : i32, i32, i32
  }
}

module attributes {stable_mosaic.version = 11 : i64} {
  func.func @_matmul_bn_kernel(%arg0: i32, %arg1: memref<162x144xbf16, #tpu.memory_space<vmem>>, %arg2: memref<144x16xbf16, #tpu.memory_space<vmem>>, %arg3: memref<1x16xf32, #tpu.memory_space<vmem>>, %arg4: memref<162x16xbf16, #tpu.memory_space<vmem>>) attributes {dimension_semantics = [#tpu.dimension_semantics<parallel>], iteration_bounds = array<i64: 1>, scalar_prefetch = 0 : i64, scratch_operands = 0 : i64, tpu.core_type = #tpu.core_type<tc>, window_params = [{transform_indices = @transform_0, window_bounds = array<i64: 162, 144>}, {pipeline_mode = #tpu.pipeline_mode<synchronous>, transform_indices = @transform_1, window_bounds = array<i64: 144, 16>}, {pipeline_mode = #tpu.pipeline_mode<synchronous>, transform_indices = @transform_2, window_bounds = array<i64: 1, 16>}, {transform_indices = @transform_3, window_bounds = array<i64: 162, 16>}]} {
    %c0 = arith.constant 0 : index
    %c0_0 = arith.constant 0 : index
    %0 = vector.load %arg1[%c0, %c0_0] : memref<162x144xbf16, #tpu.memory_space<vmem>>, vector<162x144xbf16>
    %c0_1 = arith.constant 0 : index
    %c0_2 = arith.constant 0 : index
    %1 = vector.load %arg2[%c0_1, %c0_2] : memref<144x16xbf16, #tpu.memory_space<vmem>>, vector<144x16xbf16>
    %cst = arith.constant dense<0.000000e+00> : vector<162x16xf32>
    %2 = tpu.matmul %0, %1, %cst {dimension_numbers = #tpu.dot_dimension_numbers<[1], [0], [0], [1], [0, 0, 1, 1], [], []>} : vector<162x144xbf16>, vector<144x16xbf16>, vector<162x16xf32> -> vector<162x16xf32>
    %c0_3 = arith.constant 0 : index
    %c0_4 = arith.constant 0 : index
    %3 = vector.load %arg3[%c0_3, %c0_4] : memref<1x16xf32, #tpu.memory_space<vmem>>, vector<1x16xf32>
    %4 = vector.broadcast %3 : vector<1x16xf32> to vector<162x16xf32>
    %5 = arith.addf %2, %4 : vector<162x16xf32>
    %cst_5 = arith.constant 0.000000e+00 : f32
    %6 = vector.broadcast %cst_5 : f32 to vector<162x16xf32>
    %7 = arith.maximumf %5, %6 : vector<162x16xf32>
    %8 = arith.truncf %7 : vector<162x16xf32> to vector<162x16xbf16>
    %c0_6 = arith.constant 0 : index
    %c0_7 = arith.constant 0 : index
    %9 = vector.load %arg4[%c0_6, %c0_7] : memref<162x16xbf16, #tpu.memory_space<vmem>>, vector<162x16xbf16>
    tpu.vector_store %arg4[%c0_6, %c0_7], %8 {strides = array<i32>} : memref<162x16xbf16, #tpu.memory_space<vmem>>, vector<162x16xbf16>,
    return
  }
  func.func @transform_0(%arg0: i32) -> (i32, i32) {
    %c0_i32 = arith.constant 0 : i32
    %c0_i32_0 = arith.constant 0 : i32
    return %arg0, %c0_i32 : i32, i32
  }
  func.func @transform_1(%arg0: i32) -> (i32, i32) {
    %c0_i32 = arith.constant 0 : i32
    %c0_i32_0 = arith.constant 0 : i32
    %c0_i32_1 = arith.constant 0 : i32
    return %c0_i32, %c0_i32_0 : i32, i32
  }
  func.func @transform_2(%arg0: i32) -> (i32, i32) {
    %c0_i32 = arith.constant 0 : i32
    %c0_i32_0 = arith.constant 0 : i32
    %c0_i32_1 = arith.constant 0 : i32
    return %c0_i32, %c0_i32_0 : i32, i32
  }
  func.func @transform_3(%arg0: i32) -> (i32, i32) {
    %c0_i32 = arith.constant 0 : i32
    %c0_i32_0 = arith.constant 0 : i32
    return %arg0, %c0_i32 : i32, i32
  }
}

module attributes {stable_mosaic.version = 11 : i64} {
  func.func @_matmul_bn_res_kernel(%arg0: i32, %arg1: memref<162x144xbf16, #tpu.memory_space<vmem>>, %arg2: memref<144x16xbf16, #tpu.memory_space<vmem>>, %arg3: memref<1x16xf32, #tpu.memory_space<vmem>>, %arg4: memref<162x16xbf16, #tpu.memory_space<vmem>>, %arg5: memref<162x16xbf16, #tpu.memory_space<vmem>>) attributes {dimension_semantics = [#tpu.dimension_semantics<parallel>], iteration_bounds = array<i64: 1>, scalar_prefetch = 0 : i64, scratch_operands = 0 : i64, tpu.core_type = #tpu.core_type<tc>, window_params = [{transform_indices = @transform_0, window_bounds = array<i64: 162, 144>}, {pipeline_mode = #tpu.pipeline_mode<synchronous>, transform_indices = @transform_1, window_bounds = array<i64: 144, 16>}, {pipeline_mode = #tpu.pipeline_mode<synchronous>, transform_indices = @transform_2, window_bounds = array<i64: 1, 16>}, {transform_indices = @transform_3, window_bounds = array<i64: 162, 16>}, {transform_indices = @transform_4, window_bounds = array<i64: 162, 16>}]} {
    %c0 = arith.constant 0 : index
    %c0_0 = arith.constant 0 : index
    %0 = vector.load %arg1[%c0, %c0_0] : memref<162x144xbf16, #tpu.memory_space<vmem>>, vector<162x144xbf16>
    %c0_1 = arith.constant 0 : index
    %c0_2 = arith.constant 0 : index
    %1 = vector.load %arg2[%c0_1, %c0_2] : memref<144x16xbf16, #tpu.memory_space<vmem>>, vector<144x16xbf16>
    %cst = arith.constant dense<0.000000e+00> : vector<162x16xf32>
    %2 = tpu.matmul %0, %1, %cst {dimension_numbers = #tpu.dot_dimension_numbers<[1], [0], [0], [1], [0, 0, 1, 1], [], []>} : vector<162x144xbf16>, vector<144x16xbf16>, vector<162x16xf32> -> vector<162x16xf32>
    %c0_3 = arith.constant 0 : index
    %c0_4 = arith.constant 0 : index
    %3 = vector.load %arg3[%c0_3, %c0_4] : memref<1x16xf32, #tpu.memory_space<vmem>>, vector<1x16xf32>
    %4 = vector.broadcast %3 : vector<1x16xf32> to vector<162x16xf32>
    %5 = arith.addf %2, %4 : vector<162x16xf32>
    %c0_5 = arith.constant 0 : index
    %c0_6 = arith.constant 0 : index
    %6 = vector.load %arg4[%c0_5, %c0_6] : memref<162x16xbf16, #tpu.memory_space<vmem>>, vector<162x16xbf16>
    %7 = arith.extf %6 : vector<162x16xbf16> to vector<162x16xf32>
    %8 = arith.addf %5, %7 : vector<162x16xf32>
    %cst_7 = arith.constant 0.000000e+00 : f32
    %9 = vector.broadcast %cst_7 : f32 to vector<162x16xf32>
    %10 = arith.maximumf %8, %9 : vector<162x16xf32>
    %11 = arith.truncf %10 : vector<162x16xf32> to vector<162x16xbf16>
    %c0_8 = arith.constant 0 : index
    %c0_9 = arith.constant 0 : index
    %12 = vector.load %arg5[%c0_8, %c0_9] : memref<162x16xbf16, #tpu.memory_space<vmem>>, vector<162x16xbf16>
    tpu.vector_store %arg5[%c0_8, %c0_9], %11 {strides = array<i32>} : memref<162x16xbf16, #tpu.memory_space<vmem>>, vector<162x16xbf16>,
    return
  }
  func.func @transform_0(%arg0: i32) -> (i32, i32) {
    %c0_i32 = arith.constant 0 : i32
    %c0_i32_0 = arith.constant 0 : i32
    return %arg0, %c0_i32 : i32, i32
  }
  func.func @transform_1(%arg0: i32) -> (i32, i32) {
    %c0_i32 = arith.constant 0 : i32
    %c0_i32_0 = arith.constant 0 : i32
    %c0_i32_1 = arith.constant 0 : i32
    return %c0_i32, %c0_i32_0 : i32, i32
  }
  func.func @transform_2(%arg0: i32) -> (i32, i32) {
    %c0_i32 = arith.constant 0 : i32
    %c0_i32_0 = arith.constant 0 : i32
    %c0_i32_1 = arith.constant 0 : i32
    return %c0_i32, %c0_i32_0 : i32, i32
  }
  func.func @transform_3(%arg0: i32) -> (i32, i32) {
    %c0_i32 = arith.constant 0 : i32
    %c0_i32_0 = arith.constant 0 : i32
    return %arg0, %c0_i32 : i32, i32
  }
  func.func @transform_4(%arg0: i32) -> (i32, i32) {
    %c0_i32 = arith.constant 0 : i32
    %c0_i32_0 = arith.constant 0 : i32
    return %arg0, %c0_i32 : i32, i32
  }
}

module attributes {stable_mosaic.version = 11 : i64} {
  func.func @_matmul_bn_kernel(%arg0: i32, %arg1: memref<50x144xbf16, #tpu.memory_space<vmem>>, %arg2: memref<144x32xbf16, #tpu.memory_space<vmem>>, %arg3: memref<1x32xf32, #tpu.memory_space<vmem>>, %arg4: memref<50x32xbf16, #tpu.memory_space<vmem>>) attributes {dimension_semantics = [#tpu.dimension_semantics<parallel>], iteration_bounds = array<i64: 1>, scalar_prefetch = 0 : i64, scratch_operands = 0 : i64, tpu.core_type = #tpu.core_type<tc>, window_params = [{transform_indices = @transform_0, window_bounds = array<i64: 50, 144>}, {pipeline_mode = #tpu.pipeline_mode<synchronous>, transform_indices = @transform_1, window_bounds = array<i64: 144, 32>}, {pipeline_mode = #tpu.pipeline_mode<synchronous>, transform_indices = @transform_2, window_bounds = array<i64: 1, 32>}, {transform_indices = @transform_3, window_bounds = array<i64: 50, 32>}]} {
    %c0 = arith.constant 0 : index
    %c0_0 = arith.constant 0 : index
    %0 = vector.load %arg1[%c0, %c0_0] : memref<50x144xbf16, #tpu.memory_space<vmem>>, vector<50x144xbf16>
    %c0_1 = arith.constant 0 : index
    %c0_2 = arith.constant 0 : index
    %1 = vector.load %arg2[%c0_1, %c0_2] : memref<144x32xbf16, #tpu.memory_space<vmem>>, vector<144x32xbf16>
    %cst = arith.constant dense<0.000000e+00> : vector<50x32xf32>
    %2 = tpu.matmul %0, %1, %cst {dimension_numbers = #tpu.dot_dimension_numbers<[1], [0], [0], [1], [0, 0, 1, 1], [], []>} : vector<50x144xbf16>, vector<144x32xbf16>, vector<50x32xf32> -> vector<50x32xf32>
    %c0_3 = arith.constant 0 : index
    %c0_4 = arith.constant 0 : index
    %3 = vector.load %arg3[%c0_3, %c0_4] : memref<1x32xf32, #tpu.memory_space<vmem>>, vector<1x32xf32>
    %4 = vector.broadcast %3 : vector<1x32xf32> to vector<50x32xf32>
    %5 = arith.addf %2, %4 : vector<50x32xf32>
    %cst_5 = arith.constant 0.000000e+00 : f32
    %6 = vector.broadcast %cst_5 : f32 to vector<50x32xf32>
    %7 = arith.maximumf %5, %6 : vector<50x32xf32>
    %8 = arith.truncf %7 : vector<50x32xf32> to vector<50x32xbf16>
    %c0_6 = arith.constant 0 : index
    %c0_7 = arith.constant 0 : index
    %9 = vector.load %arg4[%c0_6, %c0_7] : memref<50x32xbf16, #tpu.memory_space<vmem>>, vector<50x32xbf16>
    tpu.vector_store %arg4[%c0_6, %c0_7], %8 {strides = array<i32>} : memref<50x32xbf16, #tpu.memory_space<vmem>>, vector<50x32xbf16>,
    return
  }
  func.func @transform_0(%arg0: i32) -> (i32, i32) {
    %c0_i32 = arith.constant 0 : i32
    %c0_i32_0 = arith.constant 0 : i32
    return %arg0, %c0_i32 : i32, i32
  }
  func.func @transform_1(%arg0: i32) -> (i32, i32) {
    %c0_i32 = arith.constant 0 : i32
    %c0_i32_0 = arith.constant 0 : i32
    %c0_i32_1 = arith.constant 0 : i32
    return %c0_i32, %c0_i32_0 : i32, i32
  }
  func.func @transform_2(%arg0: i32) -> (i32, i32) {
    %c0_i32 = arith.constant 0 : i32
    %c0_i32_0 = arith.constant 0 : i32
    %c0_i32_1 = arith.constant 0 : i32
    return %c0_i32, %c0_i32_0 : i32, i32
  }
  func.func @transform_3(%arg0: i32) -> (i32, i32) {
    %c0_i32 = arith.constant 0 : i32
    %c0_i32_0 = arith.constant 0 : i32
    return %arg0, %c0_i32 : i32, i32
  }
}

module attributes {stable_mosaic.version = 11 : i64} {
  func.func @_matmul_bn_res_kernel(%arg0: i32, %arg1: memref<50x288xbf16, #tpu.memory_space<vmem>>, %arg2: memref<288x32xbf16, #tpu.memory_space<vmem>>, %arg3: memref<1x32xf32, #tpu.memory_space<vmem>>, %arg4: memref<50x32xbf16, #tpu.memory_space<vmem>>, %arg5: memref<50x32xbf16, #tpu.memory_space<vmem>>) attributes {dimension_semantics = [#tpu.dimension_semantics<parallel>], iteration_bounds = array<i64: 1>, scalar_prefetch = 0 : i64, scratch_operands = 0 : i64, tpu.core_type = #tpu.core_type<tc>, window_params = [{transform_indices = @transform_0, window_bounds = array<i64: 50, 288>}, {pipeline_mode = #tpu.pipeline_mode<synchronous>, transform_indices = @transform_1, window_bounds = array<i64: 288, 32>}, {pipeline_mode = #tpu.pipeline_mode<synchronous>, transform_indices = @transform_2, window_bounds = array<i64: 1, 32>}, {transform_indices = @transform_3, window_bounds = array<i64: 50, 32>}, {transform_indices = @transform_4, window_bounds = array<i64: 50, 32>}]} {
    %c0 = arith.constant 0 : index
    %c0_0 = arith.constant 0 : index
    %0 = vector.load %arg1[%c0, %c0_0] : memref<50x288xbf16, #tpu.memory_space<vmem>>, vector<50x288xbf16>
    %c0_1 = arith.constant 0 : index
    %c0_2 = arith.constant 0 : index
    %1 = vector.load %arg2[%c0_1, %c0_2] : memref<288x32xbf16, #tpu.memory_space<vmem>>, vector<288x32xbf16>
    %cst = arith.constant dense<0.000000e+00> : vector<50x32xf32>
    %2 = tpu.matmul %0, %1, %cst {dimension_numbers = #tpu.dot_dimension_numbers<[1], [0], [0], [1], [0, 0, 1, 1], [], []>} : vector<50x288xbf16>, vector<288x32xbf16>, vector<50x32xf32> -> vector<50x32xf32>
    %c0_3 = arith.constant 0 : index
    %c0_4 = arith.constant 0 : index
    %3 = vector.load %arg3[%c0_3, %c0_4] : memref<1x32xf32, #tpu.memory_space<vmem>>, vector<1x32xf32>
    %4 = vector.broadcast %3 : vector<1x32xf32> to vector<50x32xf32>
    %5 = arith.addf %2, %4 : vector<50x32xf32>
    %c0_5 = arith.constant 0 : index
    %c0_6 = arith.constant 0 : index
    %6 = vector.load %arg4[%c0_5, %c0_6] : memref<50x32xbf16, #tpu.memory_space<vmem>>, vector<50x32xbf16>
    %7 = arith.extf %6 : vector<50x32xbf16> to vector<50x32xf32>
    %8 = arith.addf %5, %7 : vector<50x32xf32>
    %cst_7 = arith.constant 0.000000e+00 : f32
    %9 = vector.broadcast %cst_7 : f32 to vector<50x32xf32>
    %10 = arith.maximumf %8, %9 : vector<50x32xf32>
    %11 = arith.truncf %10 : vector<50x32xf32> to vector<50x32xbf16>
    %c0_8 = arith.constant 0 : index
    %c0_9 = arith.constant 0 : index
    %12 = vector.load %arg5[%c0_8, %c0_9] : memref<50x32xbf16, #tpu.memory_space<vmem>>, vector<50x32xbf16>
    tpu.vector_store %arg5[%c0_8, %c0_9], %11 {strides = array<i32>} : memref<50x32xbf16, #tpu.memory_space<vmem>>, vector<50x32xbf16>,
    return
  }
  func.func @transform_0(%arg0: i32) -> (i32, i32) {
    %c0_i32 = arith.constant 0 : i32
    %c0_i32_0 = arith.constant 0 : i32
    return %arg0, %c0_i32 : i32, i32
  }
  func.func @transform_1(%arg0: i32) -> (i32, i32) {
    %c0_i32 = arith.constant 0 : i32
    %c0_i32_0 = arith.constant 0 : i32
    %c0_i32_1 = arith.constant 0 : i32
    return %c0_i32, %c0_i32_0 : i32, i32
  }
  func.func @transform_2(%arg0: i32) -> (i32, i32) {
    %c0_i32 = arith.constant 0 : i32
    %c0_i32_0 = arith.constant 0 : i32
    %c0_i32_1 = arith.constant 0 : i32
    return %c0_i32, %c0_i32_0 : i32, i32
  }
  func.func @transform_3(%arg0: i32) -> (i32, i32) {
    %c0_i32 = arith.constant 0 : i32
    %c0_i32_0 = arith.constant 0 : i32
    return %arg0, %c0_i32 : i32, i32
  }
  func.func @transform_4(%arg0: i32) -> (i32, i32) {
    %c0_i32 = arith.constant 0 : i32
    %c0_i32_0 = arith.constant 0 : i32
    return %arg0, %c0_i32 : i32, i32
  }
}

module attributes {stable_mosaic.version = 11 : i64} {
  func.func @_matmul_bn_kernel(%arg0: i32, %arg1: memref<50x288xbf16, #tpu.memory_space<vmem>>, %arg2: memref<288x32xbf16, #tpu.memory_space<vmem>>, %arg3: memref<1x32xf32, #tpu.memory_space<vmem>>, %arg4: memref<50x32xbf16, #tpu.memory_space<vmem>>) attributes {dimension_semantics = [#tpu.dimension_semantics<parallel>], iteration_bounds = array<i64: 1>, scalar_prefetch = 0 : i64, scratch_operands = 0 : i64, tpu.core_type = #tpu.core_type<tc>, window_params = [{transform_indices = @transform_0, window_bounds = array<i64: 50, 288>}, {pipeline_mode = #tpu.pipeline_mode<synchronous>, transform_indices = @transform_1, window_bounds = array<i64: 288, 32>}, {pipeline_mode = #tpu.pipeline_mode<synchronous>, transform_indices = @transform_2, window_bounds = array<i64: 1, 32>}, {transform_indices = @transform_3, window_bounds = array<i64: 50, 32>}]} {
    %c0 = arith.constant 0 : index
    %c0_0 = arith.constant 0 : index
    %0 = vector.load %arg1[%c0, %c0_0] : memref<50x288xbf16, #tpu.memory_space<vmem>>, vector<50x288xbf16>
    %c0_1 = arith.constant 0 : index
    %c0_2 = arith.constant 0 : index
    %1 = vector.load %arg2[%c0_1, %c0_2] : memref<288x32xbf16, #tpu.memory_space<vmem>>, vector<288x32xbf16>
    %cst = arith.constant dense<0.000000e+00> : vector<50x32xf32>
    %2 = tpu.matmul %0, %1, %cst {dimension_numbers = #tpu.dot_dimension_numbers<[1], [0], [0], [1], [0, 0, 1, 1], [], []>} : vector<50x288xbf16>, vector<288x32xbf16>, vector<50x32xf32> -> vector<50x32xf32>
    %c0_3 = arith.constant 0 : index
    %c0_4 = arith.constant 0 : index
    %3 = vector.load %arg3[%c0_3, %c0_4] : memref<1x32xf32, #tpu.memory_space<vmem>>, vector<1x32xf32>
    %4 = vector.broadcast %3 : vector<1x32xf32> to vector<50x32xf32>
    %5 = arith.addf %2, %4 : vector<50x32xf32>
    %cst_5 = arith.constant 0.000000e+00 : f32
    %6 = vector.broadcast %cst_5 : f32 to vector<50x32xf32>
    %7 = arith.maximumf %5, %6 : vector<50x32xf32>
    %8 = arith.truncf %7 : vector<50x32xf32> to vector<50x32xbf16>
    %c0_6 = arith.constant 0 : index
    %c0_7 = arith.constant 0 : index
    %9 = vector.load %arg4[%c0_6, %c0_7] : memref<50x32xbf16, #tpu.memory_space<vmem>>, vector<50x32xbf16>
    tpu.vector_store %arg4[%c0_6, %c0_7], %8 {strides = array<i32>} : memref<50x32xbf16, #tpu.memory_space<vmem>>, vector<50x32xbf16>,
    return
  }
  func.func @transform_0(%arg0: i32) -> (i32, i32) {
    %c0_i32 = arith.constant 0 : i32
    %c0_i32_0 = arith.constant 0 : i32
    return %arg0, %c0_i32 : i32, i32
  }
  func.func @transform_1(%arg0: i32) -> (i32, i32) {
    %c0_i32 = arith.constant 0 : i32
    %c0_i32_0 = arith.constant 0 : i32
    %c0_i32_1 = arith.constant 0 : i32
    return %c0_i32, %c0_i32_0 : i32, i32
  }
  func.func @transform_2(%arg0: i32) -> (i32, i32) {
    %c0_i32 = arith.constant 0 : i32
    %c0_i32_0 = arith.constant 0 : i32
    %c0_i32_1 = arith.constant 0 : i32
    return %c0_i32, %c0_i32_0 : i32, i32
  }
  func.func @transform_3(%arg0: i32) -> (i32, i32) {
    %c0_i32 = arith.constant 0 : i32
    %c0_i32_0 = arith.constant 0 : i32
    return %arg0, %c0_i32 : i32, i32
  }
}

module attributes {stable_mosaic.version = 11 : i64} {
  func.func @_matmul_bn_kernel(%arg0: i32, %arg1: memref<18x288xbf16, #tpu.memory_space<vmem>>, %arg2: memref<288x64xbf16, #tpu.memory_space<vmem>>, %arg3: memref<1x64xf32, #tpu.memory_space<vmem>>, %arg4: memref<18x64xbf16, #tpu.memory_space<vmem>>) attributes {dimension_semantics = [#tpu.dimension_semantics<parallel>], iteration_bounds = array<i64: 1>, scalar_prefetch = 0 : i64, scratch_operands = 0 : i64, tpu.core_type = #tpu.core_type<tc>, window_params = [{transform_indices = @transform_0, window_bounds = array<i64: 18, 288>}, {pipeline_mode = #tpu.pipeline_mode<synchronous>, transform_indices = @transform_1, window_bounds = array<i64: 288, 64>}, {pipeline_mode = #tpu.pipeline_mode<synchronous>, transform_indices = @transform_2, window_bounds = array<i64: 1, 64>}, {transform_indices = @transform_3, window_bounds = array<i64: 18, 64>}]} {
    %c0 = arith.constant 0 : index
    %c0_0 = arith.constant 0 : index
    %0 = vector.load %arg1[%c0, %c0_0] : memref<18x288xbf16, #tpu.memory_space<vmem>>, vector<18x288xbf16>
    %c0_1 = arith.constant 0 : index
    %c0_2 = arith.constant 0 : index
    %1 = vector.load %arg2[%c0_1, %c0_2] : memref<288x64xbf16, #tpu.memory_space<vmem>>, vector<288x64xbf16>
    %cst = arith.constant dense<0.000000e+00> : vector<18x64xf32>
    %2 = tpu.matmul %0, %1, %cst {dimension_numbers = #tpu.dot_dimension_numbers<[1], [0], [0], [1], [0, 0, 1, 1], [], []>} : vector<18x288xbf16>, vector<288x64xbf16>, vector<18x64xf32> -> vector<18x64xf32>
    %c0_3 = arith.constant 0 : index
    %c0_4 = arith.constant 0 : index
    %3 = vector.load %arg3[%c0_3, %c0_4] : memref<1x64xf32, #tpu.memory_space<vmem>>, vector<1x64xf32>
    %4 = vector.broadcast %3 : vector<1x64xf32> to vector<18x64xf32>
    %5 = arith.addf %2, %4 : vector<18x64xf32>
    %cst_5 = arith.constant 0.000000e+00 : f32
    %6 = vector.broadcast %cst_5 : f32 to vector<18x64xf32>
    %7 = arith.maximumf %5, %6 : vector<18x64xf32>
    %8 = arith.truncf %7 : vector<18x64xf32> to vector<18x64xbf16>
    %c0_6 = arith.constant 0 : index
    %c0_7 = arith.constant 0 : index
    %9 = vector.load %arg4[%c0_6, %c0_7] : memref<18x64xbf16, #tpu.memory_space<vmem>>, vector<18x64xbf16>
    tpu.vector_store %arg4[%c0_6, %c0_7], %8 {strides = array<i32>} : memref<18x64xbf16, #tpu.memory_space<vmem>>, vector<18x64xbf16>,
    return
  }
  func.func @transform_0(%arg0: i32) -> (i32, i32) {
    %c0_i32 = arith.constant 0 : i32
    %c0_i32_0 = arith.constant 0 : i32
    return %arg0, %c0_i32 : i32, i32
  }
  func.func @transform_1(%arg0: i32) -> (i32, i32) {
    %c0_i32 = arith.constant 0 : i32
    %c0_i32_0 = arith.constant 0 : i32
    %c0_i32_1 = arith.constant 0 : i32
    return %c0_i32, %c0_i32_0 : i32, i32
  }
  func.func @transform_2(%arg0: i32) -> (i32, i32) {
    %c0_i32 = arith.constant 0 : i32
    %c0_i32_0 = arith.constant 0 : i32
    %c0_i32_1 = arith.constant 0 : i32
    return %c0_i32, %c0_i32_0 : i32, i32
  }
  func.func @transform_3(%arg0: i32) -> (i32, i32) {
    %c0_i32 = arith.constant 0 : i32
    %c0_i32_0 = arith.constant 0 : i32
    return %arg0, %c0_i32 : i32, i32
  }
}

module attributes {stable_mosaic.version = 11 : i64} {
  func.func @_matmul_bn_res_kernel(%arg0: i32, %arg1: memref<18x576xbf16, #tpu.memory_space<vmem>>, %arg2: memref<576x64xbf16, #tpu.memory_space<vmem>>, %arg3: memref<1x64xf32, #tpu.memory_space<vmem>>, %arg4: memref<18x64xbf16, #tpu.memory_space<vmem>>, %arg5: memref<18x64xbf16, #tpu.memory_space<vmem>>) attributes {dimension_semantics = [#tpu.dimension_semantics<parallel>], iteration_bounds = array<i64: 1>, scalar_prefetch = 0 : i64, scratch_operands = 0 : i64, tpu.core_type = #tpu.core_type<tc>, window_params = [{transform_indices = @transform_0, window_bounds = array<i64: 18, 576>}, {pipeline_mode = #tpu.pipeline_mode<synchronous>, transform_indices = @transform_1, window_bounds = array<i64: 576, 64>}, {pipeline_mode = #tpu.pipeline_mode<synchronous>, transform_indices = @transform_2, window_bounds = array<i64: 1, 64>}, {transform_indices = @transform_3, window_bounds = array<i64: 18, 64>}, {transform_indices = @transform_4, window_bounds = array<i64: 18, 64>}]} {
    %c0 = arith.constant 0 : index
    %c0_0 = arith.constant 0 : index
    %0 = vector.load %arg1[%c0, %c0_0] : memref<18x576xbf16, #tpu.memory_space<vmem>>, vector<18x576xbf16>
    %c0_1 = arith.constant 0 : index
    %c0_2 = arith.constant 0 : index
    %1 = vector.load %arg2[%c0_1, %c0_2] : memref<576x64xbf16, #tpu.memory_space<vmem>>, vector<576x64xbf16>
    %cst = arith.constant dense<0.000000e+00> : vector<18x64xf32>
    %2 = tpu.matmul %0, %1, %cst {dimension_numbers = #tpu.dot_dimension_numbers<[1], [0], [0], [1], [0, 0, 1, 1], [], []>} : vector<18x576xbf16>, vector<576x64xbf16>, vector<18x64xf32> -> vector<18x64xf32>
    %c0_3 = arith.constant 0 : index
    %c0_4 = arith.constant 0 : index
    %3 = vector.load %arg3[%c0_3, %c0_4] : memref<1x64xf32, #tpu.memory_space<vmem>>, vector<1x64xf32>
    %4 = vector.broadcast %3 : vector<1x64xf32> to vector<18x64xf32>
    %5 = arith.addf %2, %4 : vector<18x64xf32>
    %c0_5 = arith.constant 0 : index
    %c0_6 = arith.constant 0 : index
    %6 = vector.load %arg4[%c0_5, %c0_6] : memref<18x64xbf16, #tpu.memory_space<vmem>>, vector<18x64xbf16>
    %7 = arith.extf %6 : vector<18x64xbf16> to vector<18x64xf32>
    %8 = arith.addf %5, %7 : vector<18x64xf32>
    %cst_7 = arith.constant 0.000000e+00 : f32
    %9 = vector.broadcast %cst_7 : f32 to vector<18x64xf32>
    %10 = arith.maximumf %8, %9 : vector<18x64xf32>
    %11 = arith.truncf %10 : vector<18x64xf32> to vector<18x64xbf16>
    %c0_8 = arith.constant 0 : index
    %c0_9 = arith.constant 0 : index
    %12 = vector.load %arg5[%c0_8, %c0_9] : memref<18x64xbf16, #tpu.memory_space<vmem>>, vector<18x64xbf16>
    tpu.vector_store %arg5[%c0_8, %c0_9], %11 {strides = array<i32>} : memref<18x64xbf16, #tpu.memory_space<vmem>>, vector<18x64xbf16>,
    return
  }
  func.func @transform_0(%arg0: i32) -> (i32, i32) {
    %c0_i32 = arith.constant 0 : i32
    %c0_i32_0 = arith.constant 0 : i32
    return %arg0, %c0_i32 : i32, i32
  }
  func.func @transform_1(%arg0: i32) -> (i32, i32) {
    %c0_i32 = arith.constant 0 : i32
    %c0_i32_0 = arith.constant 0 : i32
    %c0_i32_1 = arith.constant 0 : i32
    return %c0_i32, %c0_i32_0 : i32, i32
  }
  func.func @transform_2(%arg0: i32) -> (i32, i32) {
    %c0_i32 = arith.constant 0 : i32
    %c0_i32_0 = arith.constant 0 : i32
    %c0_i32_1 = arith.constant 0 : i32
    return %c0_i32, %c0_i32_0 : i32, i32
  }
  func.func @transform_3(%arg0: i32) -> (i32, i32) {
    %c0_i32 = arith.constant 0 : i32
    %c0_i32_0 = arith.constant 0 : i32
    return %arg0, %c0_i32 : i32, i32
  }
  func.func @transform_4(%arg0: i32) -> (i32, i32) {
    %c0_i32 = arith.constant 0 : i32
    %c0_i32_0 = arith.constant 0 : i32
    return %arg0, %c0_i32 : i32, i32
  }
}

module attributes {stable_mosaic.version = 11 : i64} {
  func.func @_matmul_bn_kernel(%arg0: i32, %arg1: memref<18x576xbf16, #tpu.memory_space<vmem>>, %arg2: memref<576x64xbf16, #tpu.memory_space<vmem>>, %arg3: memref<1x64xf32, #tpu.memory_space<vmem>>, %arg4: memref<18x64xbf16, #tpu.memory_space<vmem>>) attributes {dimension_semantics = [#tpu.dimension_semantics<parallel>], iteration_bounds = array<i64: 1>, scalar_prefetch = 0 : i64, scratch_operands = 0 : i64, tpu.core_type = #tpu.core_type<tc>, window_params = [{transform_indices = @transform_0, window_bounds = array<i64: 18, 576>}, {pipeline_mode = #tpu.pipeline_mode<synchronous>, transform_indices = @transform_1, window_bounds = array<i64: 576, 64>}, {pipeline_mode = #tpu.pipeline_mode<synchronous>, transform_indices = @transform_2, window_bounds = array<i64: 1, 64>}, {transform_indices = @transform_3, window_bounds = array<i64: 18, 64>}]} {
    %c0 = arith.constant 0 : index
    %c0_0 = arith.constant 0 : index
    %0 = vector.load %arg1[%c0, %c0_0] : memref<18x576xbf16, #tpu.memory_space<vmem>>, vector<18x576xbf16>
    %c0_1 = arith.constant 0 : index
    %c0_2 = arith.constant 0 : index
    %1 = vector.load %arg2[%c0_1, %c0_2] : memref<576x64xbf16, #tpu.memory_space<vmem>>, vector<576x64xbf16>
    %cst = arith.constant dense<0.000000e+00> : vector<18x64xf32>
    %2 = tpu.matmul %0, %1, %cst {dimension_numbers = #tpu.dot_dimension_numbers<[1], [0], [0], [1], [0, 0, 1, 1], [], []>} : vector<18x576xbf16>, vector<576x64xbf16>, vector<18x64xf32> -> vector<18x64xf32>
    %c0_3 = arith.constant 0 : index
    %c0_4 = arith.constant 0 : index
    %3 = vector.load %arg3[%c0_3, %c0_4] : memref<1x64xf32, #tpu.memory_space<vmem>>, vector<1x64xf32>
    %4 = vector.broadcast %3 : vector<1x64xf32> to vector<18x64xf32>
    %5 = arith.addf %2, %4 : vector<18x64xf32>
    %cst_5 = arith.constant 0.000000e+00 : f32
    %6 = vector.broadcast %cst_5 : f32 to vector<18x64xf32>
    %7 = arith.maximumf %5, %6 : vector<18x64xf32>
    %8 = arith.truncf %7 : vector<18x64xf32> to vector<18x64xbf16>
    %c0_6 = arith.constant 0 : index
    %c0_7 = arith.constant 0 : index
    %9 = vector.load %arg4[%c0_6, %c0_7] : memref<18x64xbf16, #tpu.memory_space<vmem>>, vector<18x64xbf16>
    tpu.vector_store %arg4[%c0_6, %c0_7], %8 {strides = array<i32>} : memref<18x64xbf16, #tpu.memory_space<vmem>>, vector<18x64xbf16>,
    return
  }
  func.func @transform_0(%arg0: i32) -> (i32, i32) {
    %c0_i32 = arith.constant 0 : i32
    %c0_i32_0 = arith.constant 0 : i32
    return %arg0, %c0_i32 : i32, i32
  }
  func.func @transform_1(%arg0: i32) -> (i32, i32) {
    %c0_i32 = arith.constant 0 : i32
    %c0_i32_0 = arith.constant 0 : i32
    %c0_i32_1 = arith.constant 0 : i32
    return %c0_i32, %c0_i32_0 : i32, i32
  }
  func.func @transform_2(%arg0: i32) -> (i32, i32) {
    %c0_i32 = arith.constant 0 : i32
    %c0_i32_0 = arith.constant 0 : i32
    %c0_i32_1 = arith.constant 0 : i32
    return %c0_i32, %c0_i32_0 : i32, i32
  }
  func.func @transform_3(%arg0: i32) -> (i32, i32) {
    %c0_i32 = arith.constant 0 : i32
    %c0_i32_0 = arith.constant 0 : i32
    return %arg0, %c0_i32 : i32, i32
  }
}

module attributes {stable_mosaic.version = 11 : i64} {
  func.func @_head_kernel(%arg0: memref<2x9x64xbf16, #tpu.memory_space<vmem>>, %arg1: memref<64x10xf32, #tpu.memory_space<vmem>>, %arg2: memref<1x10xf32, #tpu.memory_space<vmem>>, %arg3: memref<2x10xf32, #tpu.memory_space<vmem>>) attributes {dimension_semantics = [], scalar_prefetch = 0 : i64, scratch_operands = 0 : i64, tpu.core_type = #tpu.core_type<tc>} {
    %c0 = arith.constant 0 : index
    %c0_0 = arith.constant 0 : index
    %c0_1 = arith.constant 0 : index
    %0 = vector.load %arg0[%c0, %c0_0, %c0_1] : memref<2x9x64xbf16, #tpu.memory_space<vmem>>, vector<2x9x64xbf16>
    %1 = arith.extf %0 : vector<2x9x64xbf16> to vector<2x9x64xf32>
    %cst = arith.constant dense<0.000000e+00> : vector<2x64xf32>
    %2 = vector.multi_reduction <add>, %1, %cst [1] : vector<2x9x64xf32> to vector<2x64xf32>
    %cst_2 = arith.constant 9.000000e+00 : f32
    %3 = vector.broadcast %cst_2 : f32 to vector<2x64xf32>
    %4 = arith.divf %2, %3 : vector<2x64xf32>
    %c0_3 = arith.constant 0 : index
    %c0_4 = arith.constant 0 : index
    %5 = vector.load %arg1[%c0_3, %c0_4] : memref<64x10xf32, #tpu.memory_space<vmem>>, vector<64x10xf32>
    %cst_5 = arith.constant dense<0.000000e+00> : vector<2x10xf32>
    %6 = tpu.matmul %4, %5, %cst_5 {dimension_numbers = #tpu.dot_dimension_numbers<[1], [0], [0], [1], [0, 0, 1, 1], [], []>} : vector<2x64xf32>, vector<64x10xf32>, vector<2x10xf32> -> vector<2x10xf32>
    %c0_6 = arith.constant 0 : index
    %c0_7 = arith.constant 0 : index
    %7 = vector.load %arg2[%c0_6, %c0_7] : memref<1x10xf32, #tpu.memory_space<vmem>>, vector<1x10xf32>
    %8 = vector.broadcast %7 : vector<1x10xf32> to vector<2x10xf32>
    %9 = arith.addf %6, %8 : vector<2x10xf32>
    %cst_8 = arith.constant dense<0xFF800000> : vector<2xf32>
    %10 = vector.multi_reduction <maximumf>, %9, %cst_8 [1] : vector<2x10xf32> to vector<2xf32>
    %11 = vector.shape_cast %10 : vector<2xf32> to vector<2x1xf32>
    %12 = vector.broadcast %11 : vector<2x1xf32> to vector<2x10xf32>
    %13 = arith.subf %9, %12 : vector<2x10xf32>
    %14 = math.exp %13 : vector<2x10xf32>
    %cst_9 = arith.constant dense<0.000000e+00> : vector<2xf32>
    %15 = vector.multi_reduction <add>, %14, %cst_9 [1] : vector<2x10xf32> to vector<2xf32>
    %16 = vector.shape_cast %15 : vector<2xf32> to vector<2x1xf32>
    %17 = math.log %16 : vector<2x1xf32>
    %18 = vector.broadcast %17 : vector<2x1xf32> to vector<2x10xf32>
    %19 = arith.subf %13, %18 : vector<2x10xf32>
    %c0_10 = arith.constant 0 : index
    %c0_11 = arith.constant 0 : index
    %20 = vector.load %arg3[%c0_10, %c0_11] : memref<2x10xf32, #tpu.memory_space<vmem>>, vector<2x10xf32>
    tpu.vector_store %arg3[%c0_10, %c0_11], %19 {strides = array<i32>} : memref<2x10xf32, #tpu.memory_space<vmem>>, vector<2x10xf32>,
    return
  }
}

</mosaic_0001>

<bundles_post_ra>
// kernel: resnet_forward.16
= control target key start
LH: loop header
LB: loop body
LE: loop exit
PB: predicated region body
PF: predicated region fallthrough
CT: control target
= control target key end

     0   :  { %s377_s22 = smov 112   ;;  %vm296_vm0 = vcmask 125952   ;;  %vm298_vm1 = vcmask 122880   ;;  %vm299_vm2 = vsmask.f32 256  ;;  %s1004_s0 = inlined_call_operand.vmem [shape: bf16[18,2,9,32], index: 0, kind: input, shape index: {}]   ;;  %s1005_s1 = inlined_call_operand.vmem [shape: bf16[18,9,16], index: 1, kind: output, shape index: {}]  }
   0x1   :  { %v12_v0 = vld [vmem:[%s1004_s0 + $0x10] sm:$0xf]  ;;  %v14_v1 = vld [vmem:[%s1004_s0 + $0x18] sm:$0xf]  ;;  %v8_v2 = vld [vmem:[%s1004_s0] sm:$0xf] }
   0x2   :  { %v397_v3 = vmax.bf16 %v14_v1, %v12_v0  ;;  %v10_v4 = vld [vmem:[%s1004_s0 + $0x8] sm:$0xf]  ;;  %v13_v5 = vld [vmem:[%s1004_s0 + $0x14] sm:$0x1]  ;;  %v15_v6 = vld [vmem:[%s1004_s0 + $0x1c] sm:$0x1] }
   0x3   :  { %v408_v7 = vmax.bf16 %v10_v4, %v8_v2  ;;  %v9_v8 = vld [vmem:[%s1004_s0 + $0x4] sm:$0x1]  ;;  %v11_v9 = vld [vmem:[%s1004_s0 + $0xc] sm:$0x1]  ;;  %v418_v10 = vmax.bf16 %v15_v6, %v13_v5  ;;  %v16_v14 = vld [vmem:[%s1004_s0 + $0x20] sm:$0xf] }
   0x4   :  { %156 = vrot.lane.b32.xlu1 %v397_v3, %s377_s22  ;;  %v422_v11 = vmax.bf16 %v11_v9, %v9_v8  ;;  %v17_v12 = vld [vmem:[%s1004_s0 + $0x24] sm:$0x1]  ;;  %v19_v13 = vld [vmem:[%s1004_s0 + $0x2c] sm:$0x1]  ;;  %v18_v15 = vld [vmem:[%s1004_s0 + $0x28] sm:$0xf] }
   0x5   :  { %152 = vrot.lane.b32.xlu0 %v408_v7, %s377_s22  ;;  %v438_v16 = vmax.bf16 %v19_v13, %v17_v12  ;;  %v442_v17 = vmax.bf16 %v18_v15, %v16_v14  ;;  %v25_v18 = vld [vmem:[%s1004_s0 + $0x44] sm:$0x1]  ;;  %v27_v19 = vld [vmem:[%s1004_s0 + $0x4c] sm:$0x1]  ;;  %v21_v20 = vld [vmem:[%s1004_s0 + $0x34] sm:$0x1] }
   0x6   :  { %v23_v21 = vld [vmem:[%s1004_s0 + $0x3c] sm:$0x1]  ;;  %v458_v22 = vmax.bf16 %v27_v19, %v25_v18  ;;  %v33_v24 = vld [vmem:[%s1004_s0 + $0x64] sm:$0x1]  ;;  %v35_v25 = vld [vmem:[%s1004_s0 + $0x6c] sm:$0x1] }
   0x7   :  { %v462_v23 = vmax.bf16 %v23_v21, %v21_v20  ;;  %v29_v26 = vld [vmem:[%s1004_s0 + $0x54] sm:$0x1]  ;;  %v31_v27 = vld [vmem:[%s1004_s0 + $0x5c] sm:$0x1]  ;;  %v478_v28 = vmax.bf16 %v35_v25, %v33_v24  ;;  %v41_v30 = vld [vmem:[%s1004_s0 + $0x84] sm:$0x1] }
   0x8   :  { %158 = vrot.lane.b32.xlu1 %v418_v10, %s377_s22  ;;  %v482_v29 = vmax.bf16 %v31_v27, %v29_v26  ;;  %v43_v31 = vld [vmem:[%s1004_s0 + $0x8c] sm:$0x1]  ;;  %v37_v32 = vld [vmem:[%s1004_s0 + $0x74] sm:$0x1]  ;;  %v39_v33 = vld [vmem:[%s1004_s0 + $0x7c] sm:$0x1] }
   0x9   :  { %154 = vrot.lane.b32.xlu0 %v422_v11, %s377_s22  ;;  %v498_v34 = vmax.bf16 %v43_v31, %v41_v30  ;;  %v502_v35 = vmax.bf16 %v39_v33, %v37_v32  ;;  %v49_v36 = vld [vmem:[%s1004_s0 + $0xa4] sm:$0x1]  ;;  %v51_v37 = vld [vmem:[%s1004_s0 + $0xac] sm:$0x1]  ;;  %v45_v38 = vld [vmem:[%s1004_s0 + $0x94] sm:$0x1] }
   0xa   :  { %v47_v39 = vld [vmem:[%s1004_s0 + $0x9c] sm:$0x1]  ;;  %v518_v40 = vmax.bf16 %v51_v37, %v49_v36  ;;  %v57_v42 = vld [vmem:[%s1004_s0 + $0xc4] sm:$0x1]  ;;  %v59_v43 = vld [vmem:[%s1004_s0 + $0xcc] sm:$0x1] }
   0xb   :  { %v522_v41 = vmax.bf16 %v47_v39, %v45_v38  ;;  %v53_v44 = vld [vmem:[%s1004_s0 + $0xb4] sm:$0x1]  ;;  %v55_v45 = vld [vmem:[%s1004_s0 + $0xbc] sm:$0x1]  ;;  %v538_v46 = vmax.bf16 %v59_v43, %v57_v42  ;;  %v65_v48 = vld [vmem:[%s1004_s0 + $0xe4] sm:$0x1] }
   0xc   :  { %162 = vrot.lane.b32.xlu1 %v438_v16, %s377_s22  ;;  %v542_v47 = vmax.bf16 %v55_v45, %v53_v44  ;;  %v67_v49 = vld [vmem:[%s1004_s0 + $0xec] sm:$0x1]  ;;  %v61_v50 = vld [vmem:[%s1004_s0 + $0xd4] sm:$0x1]  ;;  %v63_v51 = vld [vmem:[%s1004_s0 + $0xdc] sm:$0x1] }
   0xd   :  { %160 = vrot.lane.b32.xlu0 %v442_v17, %s377_s22  ;;  %v558_v52 = vmax.bf16 %v67_v49, %v65_v48  ;;  %v562_v53 = vmax.bf16 %v63_v51, %v61_v50  ;;  %v73_v54 = vld [vmem:[%s1004_s0 + $0x104] sm:$0x1]  ;;  %v75_v55 = vld [vmem:[%s1004_s0 + $0x10c] sm:$0x1]  ;;  %v69_v56 = vld [vmem:[%s1004_s0 + $0xf4] sm:$0x1] }
   0xe   :  { %v71_v57 = vld [vmem:[%s1004_s0 + $0xfc] sm:$0x1]  ;;  %v578_v58 = vmax.bf16 %v75_v55, %v73_v54  ;;  %v20_v60 = vld [vmem:[%s1004_s0 + $0x30] sm:$0xf]  ;;  %v22_v61 = vld [vmem:[%s1004_s0 + $0x38] sm:$0xf] }
   0xf   :  { %v582_v59 = vmax.bf16 %v71_v57, %v69_v56  ;;  %v77_v62 = vld [vmem:[%s1004_s0 + $0x114] sm:$0x1]  ;;  %v79_v63 = vld [vmem:[%s1004_s0 + $0x11c] sm:$0x1]  ;;  %v598_v0 = vmax.bf16 %v22_v61, %v20_v60  ;;  %v28_v2 = vld [vmem:[%s1004_s0 + $0x50] sm:$0xf] }
  0x10   :  { %170 = vrot.lane.b32.xlu1 %v458_v22, %s377_s22  ;;  %v602_v1 = vmax.bf16 %v79_v63, %v77_v62  ;;  %v30_v4 = vld [vmem:[%s1004_s0 + $0x58] sm:$0xf]  ;;  %v24_v5 = vld [vmem:[%s1004_s0 + $0x40] sm:$0xf]  ;;  %v26_v6 = vld [vmem:[%s1004_s0 + $0x48] sm:$0xf] }
  0x11   :  { %166 = vrot.lane.b32.xlu0 %v462_v23, %s377_s22  ;;  %v618_v8 = vmax.bf16 %v30_v4, %v28_v2  ;;  %v622_v9 = vmax.bf16 %v26_v6, %v24_v5  ;;  %v36_v12 = vld [vmem:[%s1004_s0 + $0x70] sm:$0xf]  ;;  %v38_v13 = vld [vmem:[%s1004_s0 + $0x78] sm:$0xf]  ;;  %v32_v14 = vld [vmem:[%s1004_s0 + $0x60] sm:$0xf] }
  0x12   :  { %v34_v15 = vld [vmem:[%s1004_s0 + $0x68] sm:$0xf]  ;;  %v638_v18 = vmax.bf16 %v38_v13, %v36_v12  ;;  %v44_v20 = vld [vmem:[%s1004_s0 + $0x90] sm:$0xf]  ;;  %v46_v21 = vld [vmem:[%s1004_s0 + $0x98] sm:$0xf] }
  0x13   :  { %v642_v19 = vmax.bf16 %v34_v15, %v32_v14  ;;  %v40_v24 = vld [vmem:[%s1004_s0 + $0x80] sm:$0xf]  ;;  %v42_v25 = vld [vmem:[%s1004_s0 + $0x88] sm:$0xf]  ;;  %v658_v26 = vmax.bf16 %v46_v21, %v44_v20  ;;  %v52_v30 = vld [vmem:[%s1004_s0 + $0xb0] sm:$0xf] }
  0x14   :  { %178 = vrot.lane.b32.xlu1 %v478_v28, %s377_s22  ;;  %v662_v27 = vmax.bf16 %v42_v25, %v40_v24  ;;  %v54_v31 = vld [vmem:[%s1004_s0 + $0xb8] sm:$0xf]  ;;  %v48_v32 = vld [vmem:[%s1004_s0 + $0xa0] sm:$0xf]  ;;  %v50_v33 = vld [vmem:[%s1004_s0 + $0xa8] sm:$0xf] }
  0x15   :  { %174 = vrot.lane.b32.xlu0 %v482_v29, %s377_s22  ;;  %v678_v36 = vmax.bf16 %v54_v31, %v52_v30  ;;  %v682_v37 = vmax.bf16 %v50_v33, %v48_v32  ;;  %v60_v38 = vld [vmem:[%s1004_s0 + $0xd0] sm:$0xf]  ;;  %v62_v39 = vld [vmem:[%s1004_s0 + $0xd8] sm:$0xf]  ;;  %v56_v42 = vld [vmem:[%s1004_s0 + $0xc0] sm:$0xf] }
  0x16   :  { %v58_v43 = vld [vmem:[%s1004_s0 + $0xc8] sm:$0xf]  ;;  %v698_v44 = vmax.bf16 %v62_v39, %v60_v38  ;;  %v68_v48 = vld [vmem:[%s1004_s0 + $0xf0] sm:$0xf]  ;;  %v70_v49 = vld [vmem:[%s1004_s0 + $0xf8] sm:$0xf] }
  0x17   :  { %v702_v45 = vmax.bf16 %v58_v43, %v56_v42  ;;  %v64_v50 = vld [vmem:[%s1004_s0 + $0xe0] sm:$0xf]  ;;  %v66_v51 = vld [vmem:[%s1004_s0 + $0xe8] sm:$0xf]  ;;  %v718_v54 = vmax.bf16 %v70_v49, %v68_v48  ;;  %v76_v56 = vld [vmem:[%s1004_s0 + $0x110] sm:$0xf] }
  0x18   :  { %186 = vrot.lane.b32.xlu1 %v498_v34, %s377_s22  ;;  %v722_v55 = vmax.bf16 %v66_v51, %v64_v50  ;;  %v78_v57 = vld [vmem:[%s1004_s0 + $0x118] sm:$0xf]  ;;  %v72_v60 = vld [vmem:[%s1004_s0 + $0x100] sm:$0xf]  ;;  %v74_v61 = vld [vmem:[%s1004_s0 + $0x108] sm:$0xf] }
  0x19   :  { %182 = vrot.lane.b32.xlu0 %v502_v35, %s377_s22  ;;  %v738_v62 = vmax.bf16 %v78_v57, %v76_v56  ;;  %v742_v63 = vmax.bf16 %v74_v61, %v72_v60  ;;  %vm758_vm3 = vmand %vm298_vm1, %vm299_vm2  ;;  %v301_v14 = vld [vmem:[%s1005_s1 + $0x4] sm:$0x1]  ;;  %v321_v50 = vld [vmem:[%s1005_s1 + $0x2c] sm:$0x1] }
  0x1a   :  { %v317_v33 = vld [vmem:[%s1005_s1 + $0x24] sm:$0x1] }
  0x1c   :  { %194 = vrot.lane.b32.xlu1 %v518_v40, %s377_s22 }
  0x1d   :  { %190 = vrot.lane.b32.xlu0 %v522_v41, %s377_s22 }
  0x20   :  { %202 = vrot.lane.b32.xlu1 %v538_v46, %s377_s22 }
  0x21   :  { %198 = vrot.lane.b32.xlu0 %v542_v47, %s377_s22 }
  0x24   :  { %210 = vrot.lane.b32.xlu1 %v558_v52, %s377_s22 }
  0x25   :  { %206 = vrot.lane.b32.xlu0 %v562_v53, %s377_s22 }
  0x28   :  { %218 = vrot.lane.b32.xlu1 %v578_v58, %s377_s22 }
  0x29   :  { %214 = vrot.lane.b32.xlu0 %v582_v59, %s377_s22 }
  0x2c   :  { %164 = vrot.lane.b32.xlu1 %v598_v0, %s377_s22 }
  0x2d   :  { %222 = vrot.lane.b32.xlu0 %v602_v1, %s377_s22 }
  0x30   :  { %172 = vrot.lane.b32.xlu1 %v618_v8, %s377_s22 }
  0x31   :  { %168 = vrot.lane.b32.xlu0 %v622_v9, %s377_s22 }
  0x34   :  { %180 = vrot.lane.b32.xlu1 %v638_v18, %s377_s22 }
  0x35   :  { %176 = vrot.lane.b32.xlu0 %v642_v19, %s377_s22 }
  0x38   :  { %188 = vrot.lane.b32.xlu1 %v658_v26, %s377_s22 }
  0x39   :  { %184 = vrot.lane.b32.xlu0 %v662_v27, %s377_s22 }
  0x3c   :  { %196 = vrot.lane.b32.xlu1 %v678_v36, %s377_s22 }
  0x3d   :  { %192 = vrot.lane.b32.xlu0 %v682_v37, %s377_s22 }
  0x40   :  { %204 = vrot.lane.b32.xlu1 %v698_v44, %s377_s22 }
  0x41   :  { %200 = vrot.lane.b32.xlu0 %v702_v45, %s377_s22 }
  0x44   :  { %212 = vrot.lane.b32.xlu1 %v718_v54, %s377_s22 }
  0x45   :  { %208 = vrot.lane.b32.xlu0 %v722_v55, %s377_s22 }
  0x48   :  { %220 = vrot.lane.b32.xlu1 %v738_v62, %s377_s22 }
  0x49   :  { %216 = vrot.lane.b32.xlu0 %v742_v63, %s377_s22 }
  0x76   :  { %v157_v2 = vpop.permute.xlu1 %156 }
  0x77   :  { %v262_v4 = vmax.bf16 %v157_v2, %v397_v3  ;;  %v153_v5 = vpop.permute.xlu0 %152  ;;  %v305_v3 = vld [vmem:[%s1005_s1 + $0xc] sm:$0x1]  ;;  %v329_v2 = vld [vmem:[%s1005_s1 + $0x3c] sm:$0x1] }
  0x78   :  { %v260_v6 = vmax.bf16 %v153_v5, %v408_v7 }
  0x79   :  { %304 = vst.msk [vmem:[%s1005_s1 + $0x8] sm:$0xf] %vm296_vm0, %v262_v4 }
  0x7a   :  { %297 = vst.msk [vmem:[%s1005_s1] sm:$0xf] %vm296_vm0, %v260_v6  ;;  %v159_v13 = vpop.permute.xlu1 %158 }
  0x7b   :  { %v263_v7 = vmax.bf16 %v159_v13, %v418_v10  ;;  %v155_v15 = vpop.permute.xlu0 %154  ;;  %v309_v10 = vld [vmem:[%s1005_s1 + $0x14] sm:$0x1] }
  0x7c   :  { %v261_v20 = vmax.bf16 %v155_v15, %v422_v11 }
  0x7d   :  { %v306_v21 = vsel %vm758_vm3, %v263_v7, %v305_v3  ;;  %v337_v7 = vld [vmem:[%s1005_s1 + $0x4c] sm:$0x1] }
  0x7e   :  { %307 = vst [vmem:[%s1005_s1 + $0xc] sm:$0x1] %v306_v21  ;;  %v302_v24 = vsel %vm758_vm3, %v261_v20, %v301_v14  ;;  %v163_v25 = vpop.permute.xlu1 %162 }
  0x7f   :  { %303 = vst [vmem:[%s1005_s1 + $0x4] sm:$0x1] %v302_v24  ;;  %v265_v11 = vmax.bf16 %v163_v25, %v438_v16  ;;  %v161_v30 = vpop.permute.xlu0 %160 }
  0x80   :  { %v264_v31 = vmax.bf16 %v161_v30, %v442_v17  ;;  %v313_v17 = vld [vmem:[%s1005_s1 + $0x1c] sm:$0x1] }
  0x81   :  { %v310_v32 = vsel %vm758_vm3, %v265_v11, %v309_v10  ;;  %v345_v10 = vld [vmem:[%s1005_s1 + $0x5c] sm:$0x1] }
  0x82   :  { %311 = vst [vmem:[%s1005_s1 + $0x14] sm:$0x1] %v310_v32  ;;  %308 = vst.msk [vmem:[%s1005_s1 + $0x10] sm:$0xf] %vm296_vm0, %v264_v31  ;;  %v171_v16 = vpop.permute.xlu1 %170 }
  0x83   :  { %v269_v38 = vmax.bf16 %v171_v16, %v458_v22  ;;  %v167_v39 = vpop.permute.xlu0 %166  ;;  %v325_v22 = vld [vmem:[%s1005_s1 + $0x34] sm:$0x1] }
  0x84   :  { %v267_v42 = vmax.bf16 %v167_v39, %v462_v23 }
  0x85   :  { %v318_v43 = vsel %vm758_vm3, %v269_v38, %v317_v33  ;;  %v353_v33 = vld [vmem:[%s1005_s1 + $0x6c] sm:$0x1] }
  0x86   :  { %319 = vst [vmem:[%s1005_s1 + $0x24] sm:$0x1] %v318_v43  ;;  %v314_v48 = vsel %vm758_vm3, %v267_v42, %v313_v17  ;;  %v179_v49 = vpop.permute.xlu1 %178  ;;  %v361_v43 = vld [vmem:[%s1005_s1 + $0x7c] sm:$0x1] }
  0x87   :  { %315 = vst [vmem:[%s1005_s1 + $0x1c] sm:$0x1] %v314_v48  ;;  %v273_v23 = vmax.bf16 %v179_v49, %v478_v28  ;;  %v175_v51 = vpop.permute.xlu0 %174  ;;  %v333_v28 = vld [vmem:[%s1005_s1 + $0x44] sm:$0x1] }
  0x88   :  { %v271_v56 = vmax.bf16 %v175_v51, %v482_v29 }
  0x89   :  { %v326_v57 = vsel %vm758_vm3, %v273_v23, %v325_v22 }
  0x8a   :  { %327 = vst [vmem:[%s1005_s1 + $0x34] sm:$0x1] %v326_v57  ;;  %v322_v60 = vsel %vm758_vm3, %v271_v56, %v321_v50  ;;  %v187_v61 = vpop.permute.xlu1 %186 }
  0x8b   :  { %323 = vst [vmem:[%s1005_s1 + $0x2c] sm:$0x1] %v322_v60  ;;  %v277_v29 = vmax.bf16 %v187_v61, %v498_v34  ;;  %v183_v4 = vpop.permute.xlu0 %182  ;;  %v341_v34 = vld [vmem:[%s1005_s1 + $0x54] sm:$0x1] }
  0x8c   :  { %v275_v5 = vmax.bf16 %v183_v4, %v502_v35 }
  0x8d   :  { %v334_v6 = vsel %vm758_vm3, %v277_v29, %v333_v28 }
  0x8e   :  { %335 = vst [vmem:[%s1005_s1 + $0x44] sm:$0x1] %v334_v6  ;;  %v330_v3 = vsel %vm758_vm3, %v275_v5, %v329_v2  ;;  %v195_v13 = vpop.permute.xlu1 %194 }
  0x8f   :  { %331 = vst [vmem:[%s1005_s1 + $0x3c] sm:$0x1] %v330_v3  ;;  %v281_v35 = vmax.bf16 %v195_v13, %v518_v40  ;;  %v191_v14 = vpop.permute.xlu0 %190  ;;  %v349_v40 = vld [vmem:[%s1005_s1 + $0x64] sm:$0x1] }
  0x90   :  { %v279_v15 = vmax.bf16 %v191_v14, %v522_v41 }
  0x91   :  { %v342_v20 = vsel %vm758_vm3, %v281_v35, %v341_v34 }
  0x92   :  { %343 = vst [vmem:[%s1005_s1 + $0x54] sm:$0x1] %v342_v20  ;;  %v338_v21 = vsel %vm758_vm3, %v279_v15, %v337_v7  ;;  %v203_v24 = vpop.permute.xlu1 %202 }
  0x93   :  { %339 = vst [vmem:[%s1005_s1 + $0x4c] sm:$0x1] %v338_v21  ;;  %v285_v41 = vmax.bf16 %v203_v24, %v538_v46  ;;  %v199_v25 = vpop.permute.xlu0 %198  ;;  %v357_v46 = vld [vmem:[%s1005_s1 + $0x74] sm:$0x1] }
  0x94   :  { %v283_v11 = vmax.bf16 %v199_v25, %v542_v47 }
  0x95   :  { %v350_v30 = vsel %vm758_vm3, %v285_v41, %v349_v40 }
  0x96   :  { %351 = vst [vmem:[%s1005_s1 + $0x64] sm:$0x1] %v350_v30  ;;  %v346_v31 = vsel %vm758_vm3, %v283_v11, %v345_v10  ;;  %v211_v32 = vpop.permute.xlu1 %210 }
  0x97   :  { %347 = vst [vmem:[%s1005_s1 + $0x5c] sm:$0x1] %v346_v31  ;;  %v289_v47 = vmax.bf16 %v211_v32, %v558_v52  ;;  %v207_v16 = vpop.permute.xlu0 %206  ;;  %v365_v52 = vld [vmem:[%s1005_s1 + $0x84] sm:$0x1] }
  0x98   :  { %v287_v38 = vmax.bf16 %v207_v16, %v562_v53 }
  0x99   :  { %v358_v17 = vsel %vm758_vm3, %v289_v47, %v357_v46 }
  0x9a   :  { %359 = vst [vmem:[%s1005_s1 + $0x74] sm:$0x1] %v358_v17  ;;  %v354_v39 = vsel %vm758_vm3, %v287_v38, %v353_v33  ;;  %v219_v42 = vpop.permute.xlu1 %218 }
  0x9b   :  { %355 = vst [vmem:[%s1005_s1 + $0x6c] sm:$0x1] %v354_v39  ;;  %v293_v53 = vmax.bf16 %v219_v42, %v578_v58  ;;  %v215_v48 = vpop.permute.xlu0 %214 }
  0x9c   :  { %v291_v22 = vmax.bf16 %v215_v48, %v582_v59  ;;  %v369_v59 = vld [vmem:[%s1005_s1 + $0x8c] sm:$0x1] }
  0x9d   :  { %v366_v49 = vsel %vm758_vm3, %v293_v53, %v365_v52 }
  0x9e   :  { %367 = vst [vmem:[%s1005_s1 + $0x84] sm:$0x1] %v366_v49  ;;  %v362_v23 = vsel %vm758_vm3, %v291_v22, %v361_v43  ;;  %v165_v50 = vpop.permute.xlu1 %164 }
  0x9f   :  { %363 = vst [vmem:[%s1005_s1 + $0x7c] sm:$0x1] %v362_v23  ;;  %v266_v58 = vmax.bf16 %v165_v50, %v598_v0  ;;  %v223_v51 = vpop.permute.xlu0 %222 }
  0xa0   :  { %v295_v56 = vmax.bf16 %v223_v51, %v602_v1 }
  0xa1   :  { %312 = vst.msk [vmem:[%s1005_s1 + $0x18] sm:$0xf] %vm296_vm0, %v266_v58 }
  0xa2   :  { %v370_v57 = vsel %vm758_vm3, %v295_v56, %v369_v59  ;;  %v173_v60 = vpop.permute.xlu1 %172 }
  0xa3   :  { %371 = vst [vmem:[%s1005_s1 + $0x8c] sm:$0x1] %v370_v57  ;;  %v270_v0 = vmax.bf16 %v173_v60, %v618_v8  ;;  %v169_v28 = vpop.permute.xlu0 %168 }
  0xa4   :  { %v268_v61 = vmax.bf16 %v169_v28, %v622_v9 }
  0xa5   :  { %320 = vst.msk [vmem:[%s1005_s1 + $0x28] sm:$0xf] %vm296_vm0, %v270_v0 }
  0xa6   :  { %316 = vst.msk [vmem:[%s1005_s1 + $0x20] sm:$0xf] %vm296_vm0, %v268_v61  ;;  %v181_v1 = vpop.permute.xlu1 %180 }
  0xa7   :  { %v274_v12 = vmax.bf16 %v181_v1, %v638_v18  ;;  %v177_v29 = vpop.permute.xlu0 %176 }
  0xa8   :  { %v272_v2 = vmax.bf16 %v177_v29, %v642_v19 }
  0xa9   :  { %328 = vst.msk [vmem:[%s1005_s1 + $0x38] sm:$0xf] %vm296_vm0, %v274_v12 }
  0xaa   :  { %324 = vst.msk [vmem:[%s1005_s1 + $0x30] sm:$0xf] %vm296_vm0, %v272_v2  ;;  %v189_v8 = vpop.permute.xlu1 %188 }
  0xab   :  { %v278_v9 = vmax.bf16 %v189_v8, %v658_v26  ;;  %v185_v4 = vpop.permute.xlu0 %184 }
  0xac   :  { %v276_v5 = vmax.bf16 %v185_v4, %v662_v27 }
  0xad   :  { %336 = vst.msk [vmem:[%s1005_s1 + $0x48] sm:$0xf] %vm296_vm0, %v278_v9 }
  0xae   :  { %332 = vst.msk [vmem:[%s1005_s1 + $0x40] sm:$0xf] %vm296_vm0, %v276_v5  ;;  %v197_v18 = vpop.permute.xlu1 %196 }
  0xaf   :  { %v282_v19 = vmax.bf16 %v197_v18, %v678_v36  ;;  %v193_v6 = vpop.permute.xlu0 %192 }
  0xb0   :  { %v280_v3 = vmax.bf16 %v193_v6, %v682_v37 }
  0xb1   :  { %344 = vst.msk [vmem:[%s1005_s1 + $0x58] sm:$0xf] %vm296_vm0, %v282_v19 }
  0xb2   :  { %340 = vst.msk [vmem:[%s1005_s1 + $0x50] sm:$0xf] %vm296_vm0, %v280_v3  ;;  %v205_v26 = vpop.permute.xlu1 %204 }
  0xb3   :  { %v286_v27 = vmax.bf16 %v205_v26, %v698_v44  ;;  %v201_v34 = vpop.permute.xlu0 %200 }
  0xb4   :  { %v284_v13 = vmax.bf16 %v201_v34, %v702_v45 }
  0xb5   :  { %352 = vst.msk [vmem:[%s1005_s1 + $0x68] sm:$0xf] %vm296_vm0, %v286_v27 }
  0xb6   :  { %348 = vst.msk [vmem:[%s1005_s1 + $0x60] sm:$0xf] %vm296_vm0, %v284_v13  ;;  %v213_v36 = vpop.permute.xlu1 %212 }
  0xb7   :  { %v290_v37 = vmax.bf16 %v213_v36, %v718_v54  ;;  %v209_v35 = vpop.permute.xlu0 %208 }
  0xb8   :  { %v288_v7 = vmax.bf16 %v209_v35, %v722_v55 }
  0xb9   :  { %360 = vst.msk [vmem:[%s1005_s1 + $0x78] sm:$0xf] %vm296_vm0, %v290_v37 }
  0xba   :  { %356 = vst.msk [vmem:[%s1005_s1 + $0x70] sm:$0xf] %vm296_vm0, %v288_v7  ;;  %v221_v44 = vpop.permute.xlu1 %220 }
  0xbb   :  { %v294_v45 = vmax.bf16 %v221_v44, %v738_v62  ;;  %v217_v14 = vpop.permute.xlu0 %216 }
  0xbc   :  { %v292_v15 = vmax.bf16 %v217_v14, %v742_v63 }
  0xbd   :  { %368 = vst.msk [vmem:[%s1005_s1 + $0x88] sm:$0xf] %vm296_vm0, %v294_v45 }
  0xbe   :  { %364 = vst.msk [vmem:[%s1005_s1 + $0x80] sm:$0xf] %vm296_vm0, %v292_v15 }

// kernel: resnet_forward.15
= control target key start
LH: loop header
LB: loop body
LE: loop exit
PB: predicated region body
PF: predicated region fallthrough
CT: control target
= control target key end

     0   :  { %vm358_vm0 = vcmask 1044480   ;;  %vm359_vm1 = vcmask 1045504   ;;  %v1379_v1 = vmov 65535   ;;  %vm261_vm2 = vcmask 220160   ;;  %s1859_s1 = inlined_call_operand.vmem [shape: bf16[27,16], index: 1, kind: input, shape index: {}]   ;;  %s1860_s0 = inlined_call_operand.vmem [shape: bf16[512,27], index: 0, kind: input, shape index: {}]   ;;  %s1861_s2 = inlined_call_operand.vmem [shape: f32[1,16], index: 2, kind: input, shape index: {}]   ;;  %s1862_s3 = inlined_call_operand.vmem [shape: bf16[512,16], index: 3, kind: output, shape index: {}]  }
   0x1   :  { %v1345_v0 = vld [vmem:[%s1859_s1 + $0x8] sm:$0x3f]   ;;  %v360_v2 = vsel %vm358_vm0, 4294967295, %v1379_v1  ;;  %v1347_v4 = vld [vmem:[%s1860_s0] sm:$0xff]   ;;  %v1351_v10 = vld [vmem:[%s1860_s0 + $0x10] sm:$0xff]   ;;  %vm974_vm3 = vcmask 125952  }
   0x2   :  { %v361_v3 = vsel %vm359_vm1, %v360_v2, 0  ;;  %v1346_v6 = vld [vmem:[%s1859_s1] sm:$0xff]   ;;  %1276 = vmatprep.mubr.msk.bf16.mxu0 %vm261_vm2, %v1347_v4  ;;  %v1349_v8 = vld [vmem:[%s1860_s0 + $0x8] sm:$0xff]   ;;  %v1352_v11 = vld [vmem:[%s1860_s0 + $0x90] sm:$0xff]  }
   0x3   :  { %v363_v5 = vand.u32 %v1345_v0, %v361_v3  ;;  %v1348_v7 = vld [vmem:[%s1860_s0 + $0x80] sm:$0xff]   ;;  %v1350_v9 = vld [vmem:[%s1860_s0 + $0x88] sm:$0xff]   ;;  %v1353_v12 = vld [vmem:[%s1860_s0 + $0x18] sm:$0xff]  }
   0x4   :  { %1308 = vmatprep.mubr.msk.bf16.mxu1 %vm261_vm2, %v1348_v7  ;;  %v1354_v13 = vld [vmem:[%s1860_s0 + $0x98] sm:$0xff]   ;;  %v1355_v14 = vld [vmem:[%s1860_s0 + $0x20] sm:$0xff]   ;;  %v1357_v16 = vld [vmem:[%s1860_s0 + $0x28] sm:$0xff]  }
   0x5   :  { %1272 = vmatprep.subr.bf16.mxu0 %v363_v5  ;;  %1340 = vmatprep.subr.bf16.mxu1 %v363_v5  ;;  %v1356_v15 = vld [vmem:[%s1860_s0 + $0xa0] sm:$0xff]   ;;  %v1358_v17 = vld [vmem:[%s1860_s0 + $0xa8] sm:$0xff]   ;;  %v1359_v18 = vld [vmem:[%s1860_s0 + $0x30] sm:$0xff]  }
   0x6   :  { %1273 = vmatpush3.bf16.msra.mxu0 %v363_v5  ;;  %1342 = vmatpush3.bf16.msra.mxu1 %v363_v5  ;;  %v1360_v19 = vld [vmem:[%s1860_s0 + $0xb0] sm:$0xff]   ;;  %v1361_v20 = vld [vmem:[%s1860_s0 + $0x38] sm:$0xff]   ;;  %v1363_v22 = vld [vmem:[%s1860_s0 + $0x40] sm:$0xff]  }
   0x7   :  { %1274 = vmatprep.subr.bf16.mxu0 %v1346_v6  ;;  %1341 = vmatprep.subr.bf16.mxu1 %v1346_v6  ;;  %v1362_v21 = vld [vmem:[%s1860_s0 + $0xb8] sm:$0xff]   ;;  %v1364_v23 = vld [vmem:[%s1860_s0 + $0xc0] sm:$0xff]   ;;  %v1365_v24 = vld [vmem:[%s1860_s0 + $0x48] sm:$0xff]  }
   0x8   :  { %v1366_v25 = vld [vmem:[%s1860_s0 + $0xc8] sm:$0xff]   ;;  %v1367_v26 = vld [vmem:[%s1860_s0 + $0x50] sm:$0xff]   ;;  %v1369_v28 = vld [vmem:[%s1860_s0 + $0x58] sm:$0xff]  }
   0x9   :  { %v1368_v27 = vld [vmem:[%s1860_s0 + $0xd0] sm:$0xff]   ;;  %v1370_v29 = vld [vmem:[%s1860_s0 + $0xd8] sm:$0xff]   ;;  %v1371_v30 = vld [vmem:[%s1860_s0 + $0x60] sm:$0xff]  }
   0xa   :  { %1275 = vmatpush3.bf16.msra.mxu0 %v1346_v6  ;;  %1343 = vmatpush3.bf16.msra.mxu1 %v1346_v6  ;;  %v1372_v31 = vld [vmem:[%s1860_s0 + $0xe0] sm:$0xff]   ;;  %v1373_v32 = vld [vmem:[%s1860_s0 + $0x68] sm:$0xff]   ;;  %v1375_v34 = vld [vmem:[%s1860_s0 + $0x70] sm:$0xff]  }
   0xb   :  { %v1374_v33 = vld [vmem:[%s1860_s0 + $0xe8] sm:$0xff]   ;;  %v1376_v35 = vld [vmem:[%s1860_s0 + $0xf0] sm:$0xff]   ;;  %v1377_v36 = vld [vmem:[%s1860_s0 + $0x78] sm:$0xff]  }
   0xc   :  { %v1378_v37 = vld [vmem:[%s1860_s0 + $0xf8] sm:$0xff]   ;;  %v1537_v38 = vld [vmem:[%s1861_s2] ss:$0 sm:$0xff] }
   0xd   :  { %1277 = vmatmul.mubr.msk.bf16.vlgmr.msra.gmra.mxu0 %vm261_vm2, %v1349_v8  ;;  %1309 = vmatmul.mubr.msk.bf16.vlgmr.msra.gmra.mxu1 %vm261_vm2, %v1350_v9 }
   0xe   :  { %1280 = vmatprep.mubr.msk.bf16.mxu0 %vm261_vm2, %v1351_v10  ;;  %1312 = vmatprep.mubr.msk.bf16.mxu1 %vm261_vm2, %v1352_v11 }
  0x15   :  { %1281 = vmatmul.mubr.msk.bf16.gmra.mxu0 %vm261_vm2, %v1353_v12  ;;  %1313 = vmatmul.mubr.msk.bf16.gmra.mxu1 %vm261_vm2, %v1354_v13 }
  0x16   :  { %1284 = vmatprep.mubr.msk.bf16.mxu0 %vm261_vm2, %v1355_v14  ;;  %1316 = vmatprep.mubr.msk.bf16.mxu1 %vm261_vm2, %v1356_v15 }
  0x1d   :  { %1285 = vmatmul.mubr.msk.bf16.gmra.mxu0 %vm261_vm2, %v1357_v16  ;;  %1317 = vmatmul.mubr.msk.bf16.gmra.mxu1 %vm261_vm2, %v1358_v17 }
  0x1e   :  { %1288 = vmatprep.mubr.msk.bf16.mxu0 %vm261_vm2, %v1359_v18  ;;  %1320 = vmatprep.mubr.msk.bf16.mxu1 %vm261_vm2, %v1360_v19 }
  0x25   :  { %1289 = vmatmul.mubr.msk.bf16.gmra.mxu0 %vm261_vm2, %v1361_v20  ;;  %1321 = vmatmul.mubr.msk.bf16.gmra.mxu1 %vm261_vm2, %v1362_v21 }
  0x26   :  { %1292 = vmatprep.mubr.msk.bf16.mxu0 %vm261_vm2, %v1363_v22  ;;  %1324 = vmatprep.mubr.msk.bf16.mxu1 %vm261_vm2, %v1364_v23 }
  0x2d   :  { %1293 = vmatmul.mubr.msk.bf16.gmra.mxu0 %vm261_vm2, %v1365_v24  ;;  %1325 = vmatmul.mubr.msk.bf16.gmra.mxu1 %vm261_vm2, %v1366_v25 }
  0x2e   :  { %1296 = vmatprep.mubr.msk.bf16.mxu0 %vm261_vm2, %v1367_v26  ;;  %1328 = vmatprep.mubr.msk.bf16.mxu1 %vm261_vm2, %v1368_v27 }
  0x35   :  { %1297 = vmatmul.mubr.msk.bf16.gmra.mxu0 %vm261_vm2, %v1369_v28  ;;  %1329 = vmatmul.mubr.msk.bf16.gmra.mxu1 %vm261_vm2, %v1370_v29 }
  0x36   :  { %1300 = vmatprep.mubr.msk.bf16.mxu0 %vm261_vm2, %v1371_v30  ;;  %1332 = vmatprep.mubr.msk.bf16.mxu1 %vm261_vm2, %v1372_v31 }
  0x3d   :  { %1301 = vmatmul.mubr.msk.bf16.gmra.mxu0 %vm261_vm2, %v1373_v32  ;;  %1333 = vmatmul.mubr.msk.bf16.gmra.mxu1 %vm261_vm2, %v1374_v33 }
  0x3e   :  { %1304 = vmatprep.mubr.msk.bf16.mxu0 %vm261_vm2, %v1375_v34  ;;  %1336 = vmatprep.mubr.msk.bf16.mxu1 %vm261_vm2, %v1376_v35 }
  0x45   :  { %1305 = vmatmul.mubr.msk.bf16.gmra.mxu0 %vm261_vm2, %v1377_v36  ;;  %1337 = vmatmul.mubr.msk.bf16.gmra.mxu1 %vm261_vm2, %v1378_v37 }
  0xcd   :  { %v1278_v39 = vpop.f32.mrf.mxu0  ;;  %v1310_v40 = vpop.f32.mrf.mxu1 }
  0xce   :  { %v408_v41 = vadd.f32 %v1278_v39, %v1537_v38  ;;  %v536_v42 = vadd.f32 %v1310_v40, %v1537_v38 }
  0xcf   :  { %v399_v43 = vpop.f32.mrf.mxu0  ;;  %v527_v44 = vpop.f32.mrf.mxu1 }
  0xd0   :  { %v656_v45 = vmax.f32 %v408_v41, 0.0  ;;  %v688_v46 = vmax.f32 %v536_v42, 0.0  ;;  %v400_v47 = vadd.f32 %v1537_v38, %v399_v43  ;;  %v528_v48 = vadd.f32 %v1537_v38, %v527_v44 }
  0xd1   :  { %v1279_v49 = vpop.f32.mrf.mxu0  ;;  %v1311_v50 = vpop.f32.mrf.mxu1 }
  0xd2   :  { %v1176_v51 = vpack.c.bf16 %v656_v45, %v656_v45  ;;  %v1208_v52 = vpack.c.bf16 %v688_v46, %v688_v46  ;;  %v654_v53 = vmax.f32 %v400_v47, 0.0  ;;  %v686_v54 = vmax.f32 %v528_v48, 0.0 }
  0xd3   :  { %v411_v55 = vadd.f32 %v1279_v49, %v1537_v38  ;;  %v539_v56 = vadd.f32 %v1311_v50, %v1537_v38  ;;  %v402_v57 = vpop.f32.mrf.mxu0  ;;  %v530_v58 = vpop.f32.mrf.mxu1 }
  0xd4   :  { %977 = vst.msk [vmem:[%s1862_s3 + $0x8] sm:$0xf] %vm974_vm3, %v1176_v51  ;;  %1009 = vst.msk [vmem:[%s1862_s3 + $0x88] sm:$0xf] %vm974_vm3, %v1208_v52  ;;  %v1174_v59 = vpack.c.bf16 %v654_v53, %v654_v53  ;;  %v1206_v60 = vpack.c.bf16 %v686_v54, %v686_v54  ;;  %v403_v61 = vadd.f32 %v1537_v38, %v402_v57 }
  0xd5   :  { %v531_v62 = vadd.f32 %v1537_v38, %v530_v58  ;;  %v657_v63 = vmax.f32 %v411_v55, 0.0  ;;  %v689_v0 = vmax.f32 %v539_v56, 0.0  ;;  %v1282_v1 = vpop.f32.mrf.mxu0  ;;  %v1314_v2 = vpop.f32.mrf.mxu1 }
  0xd6   :  { %975 = vst.msk [vmem:[%s1862_s3] sm:$0xf] %vm974_vm3, %v1174_v59  ;;  %1007 = vst.msk [vmem:[%s1862_s3 + $0x80] sm:$0xf] %vm974_vm3, %v1206_v60  ;;  %v655_v3 = vmax.f32 %v403_v61, 0.0  ;;  %v424_v5 = vadd.f32 %v1282_v1, %v1537_v38  ;;  %v552_v6 = vadd.f32 %v1314_v2, %v1537_v38 }
  0xd7   :  { %v687_v4 = vmax.f32 %v531_v62, 0.0  ;;  %v1177_v7 = vpack.c.bf16 %v657_v63, %v657_v63  ;;  %v1209_v8 = vpack.c.bf16 %v689_v0, %v689_v0  ;;  %v415_v9 = vpop.f32.mrf.mxu0  ;;  %v543_v10 = vpop.f32.mrf.mxu1 }
  0xd8   :  { %v1175_v11 = vpack.c.bf16 %v655_v3, %v655_v3  ;;  %v660_v13 = vmax.f32 %v424_v5, 0.0  ;;  %v692_v14 = vmax.f32 %v552_v6, 0.0  ;;  %v416_v15 = vadd.f32 %v1537_v38, %v415_v9 }
  0xd9   :  { %v1207_v12 = vpack.c.bf16 %v687_v4, %v687_v4  ;;  %978 = vst.msk [vmem:[%s1862_s3 + $0xc] sm:$0xf] %vm974_vm3, %v1177_v7  ;;  %1010 = vst.msk [vmem:[%s1862_s3 + $0x8c] sm:$0xf] %vm974_vm3, %v1209_v8  ;;  %v544_v16 = vadd.f32 %v1537_v38, %v543_v10  ;;  %v1283_v17 = vpop.f32.mrf.mxu0  ;;  %v1315_v18 = vpop.f32.mrf.mxu1 }
  0xda   :  { %976 = vst.msk [vmem:[%s1862_s3 + $0x4] sm:$0xf] %vm974_vm3, %v1175_v11  ;;  %v1180_v19 = vpack.c.bf16 %v660_v13, %v660_v13  ;;  %v1212_v20 = vpack.c.bf16 %v692_v14, %v692_v14  ;;  %v427_v21 = vadd.f32 %v1283_v17, %v1537_v38  ;;  %v555_v22 = vadd.f32 %v1315_v18, %v1537_v38 }
  0xdb   :  { %1008 = vst.msk [vmem:[%s1862_s3 + $0x84] sm:$0xf] %vm974_vm3, %v1207_v12  ;;  %v658_v23 = vmax.f32 %v416_v15, 0.0  ;;  %v690_v24 = vmax.f32 %v544_v16, 0.0  ;;  %v418_v25 = vpop.f32.mrf.mxu0  ;;  %v546_v26 = vpop.f32.mrf.mxu1 }
  0xdc   :  { %981 = vst.msk [vmem:[%s1862_s3 + $0x18] sm:$0xf] %vm974_vm3, %v1180_v19  ;;  %1013 = vst.msk [vmem:[%s1862_s3 + $0x98] sm:$0xf] %vm974_vm3, %v1212_v20  ;;  %v661_v27 = vmax.f32 %v427_v21, 0.0  ;;  %v693_v28 = vmax.f32 %v555_v22, 0.0  ;;  %v419_v29 = vadd.f32 %v1537_v38, %v418_v25  ;;  %v547_v30 = vadd.f32 %v1537_v38, %v546_v26 }
  0xdd   :  { %v1178_v31 = vpack.c.bf16 %v658_v23, %v658_v23  ;;  %v1210_v32 = vpack.c.bf16 %v690_v24, %v690_v24  ;;  %v1286_v33 = vpop.f32.mrf.mxu0  ;;  %v1318_v34 = vpop.f32.mrf.mxu1 }
  0xde   :  { %v1181_v35 = vpack.c.bf16 %v661_v27, %v661_v27  ;;  %v1213_v36 = vpack.c.bf16 %v693_v28, %v693_v28  ;;  %v659_v37 = vmax.f32 %v419_v29, 0.0  ;;  %v691_v39 = vmax.f32 %v547_v30, 0.0 }
  0xdf   :  { %979 = vst.msk [vmem:[%s1862_s3 + $0x10] sm:$0xf] %vm974_vm3, %v1178_v31  ;;  %1011 = vst.msk [vmem:[%s1862_s3 + $0x90] sm:$0xf] %vm974_vm3, %v1210_v32  ;;  %v440_v40 = vadd.f32 %v1286_v33, %v1537_v38  ;;  %v568_v41 = vadd.f32 %v1318_v34, %v1537_v38  ;;  %v431_v42 = vpop.f32.mrf.mxu0  ;;  %v559_v43 = vpop.f32.mrf.mxu1 }
  0xe0   :  { %982 = vst.msk [vmem:[%s1862_s3 + $0x1c] sm:$0xf] %vm974_vm3, %v1181_v35  ;;  %1014 = vst.msk [vmem:[%s1862_s3 + $0x9c] sm:$0xf] %vm974_vm3, %v1213_v36  ;;  %v1179_v44 = vpack.c.bf16 %v659_v37, %v659_v37  ;;  %v1211_v45 = vpack.c.bf16 %v691_v39, %v691_v39  ;;  %v432_v46 = vadd.f32 %v1537_v38, %v431_v42 }
  0xe1   :  { %v560_v47 = vadd.f32 %v1537_v38, %v559_v43  ;;  %v664_v48 = vmax.f32 %v440_v40, 0.0  ;;  %v696_v49 = vmax.f32 %v568_v41, 0.0  ;;  %v1287_v50 = vpop.f32.mrf.mxu0  ;;  %v1319_v51 = vpop.f32.mrf.mxu1 }
  0xe2   :  { %980 = vst.msk [vmem:[%s1862_s3 + $0x14] sm:$0xf] %vm974_vm3, %v1179_v44  ;;  %1012 = vst.msk [vmem:[%s1862_s3 + $0x94] sm:$0xf] %vm974_vm3, %v1211_v45  ;;  %v662_v52 = vmax.f32 %v432_v46, 0.0  ;;  %v443_v54 = vadd.f32 %v1287_v50, %v1537_v38  ;;  %v571_v55 = vadd.f32 %v1319_v51, %v1537_v38 }
  0xe3   :  { %v694_v53 = vmax.f32 %v560_v47, 0.0  ;;  %v1184_v56 = vpack.c.bf16 %v664_v48, %v664_v48  ;;  %v1216_v57 = vpack.c.bf16 %v696_v49, %v696_v49  ;;  %v434_v58 = vpop.f32.mrf.mxu0  ;;  %v562_v59 = vpop.f32.mrf.mxu1 }
  0xe4   :  { %v1182_v60 = vpack.c.bf16 %v662_v52, %v662_v52  ;;  %v665_v62 = vmax.f32 %v443_v54, 0.0  ;;  %v697_v63 = vmax.f32 %v571_v55, 0.0  ;;  %v435_v0 = vadd.f32 %v1537_v38, %v434_v58 }
  0xe5   :  { %v1214_v61 = vpack.c.bf16 %v694_v53, %v694_v53  ;;  %985 = vst.msk [vmem:[%s1862_s3 + $0x28] sm:$0xf] %vm974_vm3, %v1184_v56  ;;  %1017 = vst.msk [vmem:[%s1862_s3 + $0xa8] sm:$0xf] %vm974_vm3, %v1216_v57  ;;  %v563_v1 = vadd.f32 %v1537_v38, %v562_v59  ;;  %v1290_v2 = vpop.f32.mrf.mxu0  ;;  %v1322_v3 = vpop.f32.mrf.mxu1 }
  0xe6   :  { %983 = vst.msk [vmem:[%s1862_s3 + $0x20] sm:$0xf] %vm974_vm3, %v1182_v60  ;;  %v1185_v4 = vpack.c.bf16 %v665_v62, %v665_v62  ;;  %v1217_v5 = vpack.c.bf16 %v697_v63, %v697_v63  ;;  %v456_v6 = vadd.f32 %v1290_v2, %v1537_v38  ;;  %v584_v7 = vadd.f32 %v1322_v3, %v1537_v38 }
  0xe7   :  { %1015 = vst.msk [vmem:[%s1862_s3 + $0xa0] sm:$0xf] %vm974_vm3, %v1214_v61  ;;  %v663_v8 = vmax.f32 %v435_v0, 0.0  ;;  %v695_v9 = vmax.f32 %v563_v1, 0.0  ;;  %v447_v10 = vpop.f32.mrf.mxu0  ;;  %v575_v11 = vpop.f32.mrf.mxu1 }
  0xe8   :  { %986 = vst.msk [vmem:[%s1862_s3 + $0x2c] sm:$0xf] %vm974_vm3, %v1185_v4  ;;  %1018 = vst.msk [vmem:[%s1862_s3 + $0xac] sm:$0xf] %vm974_vm3, %v1217_v5  ;;  %v668_v12 = vmax.f32 %v456_v6, 0.0  ;;  %v700_v13 = vmax.f32 %v584_v7, 0.0  ;;  %v448_v14 = vadd.f32 %v1537_v38, %v447_v10  ;;  %v576_v15 = vadd.f32 %v1537_v38, %v575_v11 }
  0xe9   :  { %v1183_v16 = vpack.c.bf16 %v663_v8, %v663_v8  ;;  %v1215_v17 = vpack.c.bf16 %v695_v9, %v695_v9  ;;  %v1291_v18 = vpop.f32.mrf.mxu0  ;;  %v1323_v19 = vpop.f32.mrf.mxu1 }
  0xea   :  { %v1188_v20 = vpack.c.bf16 %v668_v12, %v668_v12  ;;  %v1220_v21 = vpack.c.bf16 %v700_v13, %v700_v13  ;;  %v666_v22 = vmax.f32 %v448_v14, 0.0  ;;  %v698_v23 = vmax.f32 %v576_v15, 0.0 }
  0xeb   :  { %984 = vst.msk [vmem:[%s1862_s3 + $0x24] sm:$0xf] %vm974_vm3, %v1183_v16  ;;  %1016 = vst.msk [vmem:[%s1862_s3 + $0xa4] sm:$0xf] %vm974_vm3, %v1215_v17  ;;  %v459_v24 = vadd.f32 %v1291_v18, %v1537_v38  ;;  %v587_v25 = vadd.f32 %v1323_v19, %v1537_v38  ;;  %v450_v26 = vpop.f32.mrf.mxu0  ;;  %v578_v27 = vpop.f32.mrf.mxu1 }
  0xec   :  { %989 = vst.msk [vmem:[%s1862_s3 + $0x38] sm:$0xf] %vm974_vm3, %v1188_v20  ;;  %1021 = vst.msk [vmem:[%s1862_s3 + $0xb8] sm:$0xf] %vm974_vm3, %v1220_v21  ;;  %v1186_v28 = vpack.c.bf16 %v666_v22, %v666_v22  ;;  %v1218_v29 = vpack.c.bf16 %v698_v23, %v698_v23  ;;  %v451_v30 = vadd.f32 %v1537_v38, %v450_v26 }
  0xed   :  { %v579_v31 = vadd.f32 %v1537_v38, %v578_v27  ;;  %v669_v32 = vmax.f32 %v459_v24, 0.0  ;;  %v701_v33 = vmax.f32 %v587_v25, 0.0  ;;  %v1294_v34 = vpop.f32.mrf.mxu0  ;;  %v1326_v35 = vpop.f32.mrf.mxu1 }
  0xee   :  { %987 = vst.msk [vmem:[%s1862_s3 + $0x30] sm:$0xf] %vm974_vm3, %v1186_v28  ;;  %1019 = vst.msk [vmem:[%s1862_s3 + $0xb0] sm:$0xf] %vm974_vm3, %v1218_v29  ;;  %v667_v36 = vmax.f32 %v451_v30, 0.0  ;;  %v472_v39 = vadd.f32 %v1294_v34, %v1537_v38  ;;  %v600_v40 = vadd.f32 %v1326_v35, %v1537_v38 }
  0xef   :  { %v699_v37 = vmax.f32 %v579_v31, 0.0  ;;  %v1189_v41 = vpack.c.bf16 %v669_v32, %v669_v32  ;;  %v1221_v42 = vpack.c.bf16 %v701_v33, %v701_v33  ;;  %v463_v43 = vpop.f32.mrf.mxu0  ;;  %v591_v44 = vpop.f32.mrf.mxu1 }
  0xf0   :  { %v1187_v45 = vpack.c.bf16 %v667_v36, %v667_v36  ;;  %v672_v47 = vmax.f32 %v472_v39, 0.0  ;;  %v704_v48 = vmax.f32 %v600_v40, 0.0  ;;  %v464_v49 = vadd.f32 %v1537_v38, %v463_v43 }
  0xf1   :  { %v1219_v46 = vpack.c.bf16 %v699_v37, %v699_v37  ;;  %990 = vst.msk [vmem:[%s1862_s3 + $0x3c] sm:$0xf] %vm974_vm3, %v1189_v41  ;;  %1022 = vst.msk [vmem:[%s1862_s3 + $0xbc] sm:$0xf] %vm974_vm3, %v1221_v42  ;;  %v592_v50 = vadd.f32 %v1537_v38, %v591_v44  ;;  %v1295_v51 = vpop.f32.mrf.mxu0  ;;  %v1327_v52 = vpop.f32.mrf.mxu1 }
  0xf2   :  { %988 = vst.msk [vmem:[%s1862_s3 + $0x34] sm:$0xf] %vm974_vm3, %v1187_v45  ;;  %v1192_v53 = vpack.c.bf16 %v672_v47, %v672_v47  ;;  %v1224_v54 = vpack.c.bf16 %v704_v48, %v704_v48  ;;  %v475_v55 = vadd.f32 %v1295_v51, %v1537_v38  ;;  %v603_v56 = vadd.f32 %v1327_v52, %v1537_v38 }
  0xf3   :  { %1020 = vst.msk [vmem:[%s1862_s3 + $0xb4] sm:$0xf] %vm974_vm3, %v1219_v46  ;;  %v670_v57 = vmax.f32 %v464_v49, 0.0  ;;  %v702_v58 = vmax.f32 %v592_v50, 0.0  ;;  %v466_v59 = vpop.f32.mrf.mxu0  ;;  %v594_v60 = vpop.f32.mrf.mxu1 }
  0xf4   :  { %993 = vst.msk [vmem:[%s1862_s3 + $0x48] sm:$0xf] %vm974_vm3, %v1192_v53  ;;  %1025 = vst.msk [vmem:[%s1862_s3 + $0xc8] sm:$0xf] %vm974_vm3, %v1224_v54  ;;  %v673_v61 = vmax.f32 %v475_v55, 0.0  ;;  %v705_v62 = vmax.f32 %v603_v56, 0.0  ;;  %v467_v63 = vadd.f32 %v1537_v38, %v466_v59  ;;  %v595_v0 = vadd.f32 %v1537_v38, %v594_v60 }
  0xf5   :  { %v1190_v1 = vpack.c.bf16 %v670_v57, %v670_v57  ;;  %v1222_v2 = vpack.c.bf16 %v702_v58, %v702_v58  ;;  %v1298_v3 = vpop.f32.mrf.mxu0  ;;  %v1330_v4 = vpop.f32.mrf.mxu1 }
  0xf6   :  { %v1193_v5 = vpack.c.bf16 %v673_v61, %v673_v61  ;;  %v1225_v6 = vpack.c.bf16 %v705_v62, %v705_v62  ;;  %v671_v7 = vmax.f32 %v467_v63, 0.0  ;;  %v703_v8 = vmax.f32 %v595_v0, 0.0 }
  0xf7   :  { %991 = vst.msk [vmem:[%s1862_s3 + $0x40] sm:$0xf] %vm974_vm3, %v1190_v1  ;;  %1023 = vst.msk [vmem:[%s1862_s3 + $0xc0] sm:$0xf] %vm974_vm3, %v1222_v2  ;;  %v488_v9 = vadd.f32 %v1298_v3, %v1537_v38  ;;  %v616_v10 = vadd.f32 %v1330_v4, %v1537_v38  ;;  %v479_v11 = vpop.f32.mrf.mxu0  ;;  %v607_v12 = vpop.f32.mrf.mxu1 }
  0xf8   :  { %994 = vst.msk [vmem:[%s1862_s3 + $0x4c] sm:$0xf] %vm974_vm3, %v1193_v5  ;;  %1026 = vst.msk [vmem:[%s1862_s3 + $0xcc] sm:$0xf] %vm974_vm3, %v1225_v6  ;;  %v1191_v13 = vpack.c.bf16 %v671_v7, %v671_v7  ;;  %v1223_v14 = vpack.c.bf16 %v703_v8, %v703_v8  ;;  %v480_v15 = vadd.f32 %v1537_v38, %v479_v11 }
  0xf9   :  { %v608_v16 = vadd.f32 %v1537_v38, %v607_v12  ;;  %v676_v17 = vmax.f32 %v488_v9, 0.0  ;;  %v708_v18 = vmax.f32 %v616_v10, 0.0  ;;  %v1299_v19 = vpop.f32.mrf.mxu0  ;;  %v1331_v20 = vpop.f32.mrf.mxu1 }
  0xfa   :  { %992 = vst.msk [vmem:[%s1862_s3 + $0x44] sm:$0xf] %vm974_vm3, %v1191_v13  ;;  %1024 = vst.msk [vmem:[%s1862_s3 + $0xc4] sm:$0xf] %vm974_vm3, %v1223_v14  ;;  %v674_v21 = vmax.f32 %v480_v15, 0.0  ;;  %v491_v23 = vadd.f32 %v1299_v19, %v1537_v38  ;;  %v619_v24 = vadd.f32 %v1331_v20, %v1537_v38 }
  0xfb   :  { %v706_v22 = vmax.f32 %v608_v16, 0.0  ;;  %v1196_v25 = vpack.c.bf16 %v676_v17, %v676_v17  ;;  %v1228_v26 = vpack.c.bf16 %v708_v18, %v708_v18  ;;  %v482_v27 = vpop.f32.mrf.mxu0  ;;  %v610_v28 = vpop.f32.mrf.mxu1 }
  0xfc   :  { %v1194_v29 = vpack.c.bf16 %v674_v21, %v674_v21  ;;  %v677_v31 = vmax.f32 %v491_v23, 0.0  ;;  %v709_v32 = vmax.f32 %v619_v24, 0.0  ;;  %v483_v33 = vadd.f32 %v1537_v38, %v482_v27 }
  0xfd   :  { %v1226_v30 = vpack.c.bf16 %v706_v22, %v706_v22  ;;  %997 = vst.msk [vmem:[%s1862_s3 + $0x58] sm:$0xf] %vm974_vm3, %v1196_v25  ;;  %1029 = vst.msk [vmem:[%s1862_s3 + $0xd8] sm:$0xf] %vm974_vm3, %v1228_v26  ;;  %v611_v34 = vadd.f32 %v1537_v38, %v610_v28  ;;  %v1302_v35 = vpop.f32.mrf.mxu0  ;;  %v1334_v36 = vpop.f32.mrf.mxu1 }
  0xfe   :  { %995 = vst.msk [vmem:[%s1862_s3 + $0x50] sm:$0xf] %vm974_vm3, %v1194_v29  ;;  %v1197_v37 = vpack.c.bf16 %v677_v31, %v677_v31  ;;  %v1229_v39 = vpack.c.bf16 %v709_v32, %v709_v32  ;;  %v504_v40 = vadd.f32 %v1302_v35, %v1537_v38  ;;  %v632_v41 = vadd.f32 %v1334_v36, %v1537_v38 }
  0xff   :  { %1027 = vst.msk [vmem:[%s1862_s3 + $0xd0] sm:$0xf] %vm974_vm3, %v1226_v30  ;;  %v675_v42 = vmax.f32 %v483_v33, 0.0  ;;  %v707_v43 = vmax.f32 %v611_v34, 0.0  ;;  %v495_v44 = vpop.f32.mrf.mxu0  ;;  %v623_v45 = vpop.f32.mrf.mxu1 }
 0x100   :  { %998 = vst.msk [vmem:[%s1862_s3 + $0x5c] sm:$0xf] %vm974_vm3, %v1197_v37  ;;  %1030 = vst.msk [vmem:[%s1862_s3 + $0xdc] sm:$0xf] %vm974_vm3, %v1229_v39  ;;  %v680_v46 = vmax.f32 %v504_v40, 0.0  ;;  %v712_v47 = vmax.f32 %v632_v41, 0.0  ;;  %v496_v48 = vadd.f32 %v1537_v38, %v495_v44  ;;  %v624_v49 = vadd.f32 %v1537_v38, %v623_v45 }
 0x101   :  { %v1195_v50 = vpack.c.bf16 %v675_v42, %v675_v42  ;;  %v1227_v51 = vpack.c.bf16 %v707_v43, %v707_v43  ;;  %v1303_v52 = vpop.f32.mrf.mxu0  ;;  %v1335_v53 = vpop.f32.mrf.mxu1 }
 0x102   :  { %v1200_v54 = vpack.c.bf16 %v680_v46, %v680_v46  ;;  %v1232_v55 = vpack.c.bf16 %v712_v47, %v712_v47  ;;  %v678_v56 = vmax.f32 %v496_v48, 0.0  ;;  %v710_v57 = vmax.f32 %v624_v49, 0.0 }
 0x103   :  { %996 = vst.msk [vmem:[%s1862_s3 + $0x54] sm:$0xf] %vm974_vm3, %v1195_v50  ;;  %1028 = vst.msk [vmem:[%s1862_s3 + $0xd4] sm:$0xf] %vm974_vm3, %v1227_v51  ;;  %v507_v58 = vadd.f32 %v1303_v52, %v1537_v38  ;;  %v635_v59 = vadd.f32 %v1335_v53, %v1537_v38  ;;  %v498_v60 = vpop.f32.mrf.mxu0  ;;  %v626_v61 = vpop.f32.mrf.mxu1 }
 0x104   :  { %1001 = vst.msk [vmem:[%s1862_s3 + $0x68] sm:$0xf] %vm974_vm3, %v1200_v54  ;;  %1033 = vst.msk [vmem:[%s1862_s3 + $0xe8] sm:$0xf] %vm974_vm3, %v1232_v55  ;;  %v1198_v62 = vpack.c.bf16 %v678_v56, %v678_v56  ;;  %v1230_v63 = vpack.c.bf16 %v710_v57, %v710_v57  ;;  %v499_v0 = vadd.f32 %v1537_v38, %v498_v60 }
 0x105   :  { %v627_v1 = vadd.f32 %v1537_v38, %v626_v61  ;;  %v681_v2 = vmax.f32 %v507_v58, 0.0  ;;  %v713_v3 = vmax.f32 %v635_v59, 0.0  ;;  %v1306_v4 = vpop.f32.mrf.mxu0  ;;  %v1338_v5 = vpop.f32.mrf.mxu1 }
 0x106   :  { %999 = vst.msk [vmem:[%s1862_s3 + $0x60] sm:$0xf] %vm974_vm3, %v1198_v62  ;;  %1031 = vst.msk [vmem:[%s1862_s3 + $0xe0] sm:$0xf] %vm974_vm3, %v1230_v63  ;;  %v679_v6 = vmax.f32 %v499_v0, 0.0  ;;  %v520_v8 = vadd.f32 %v1306_v4, %v1537_v38  ;;  %v648_v9 = vadd.f32 %v1338_v5, %v1537_v38 }
 0x107   :  { %v711_v7 = vmax.f32 %v627_v1, 0.0  ;;  %v1201_v10 = vpack.c.bf16 %v681_v2, %v681_v2  ;;  %v1233_v11 = vpack.c.bf16 %v713_v3, %v713_v3  ;;  %v511_v12 = vpop.f32.mrf.mxu0  ;;  %v639_v13 = vpop.f32.mrf.mxu1 }
 0x108   :  { %v1199_v14 = vpack.c.bf16 %v679_v6, %v679_v6  ;;  %v684_v16 = vmax.f32 %v520_v8, 0.0  ;;  %v716_v17 = vmax.f32 %v648_v9, 0.0  ;;  %v512_v18 = vadd.f32 %v1537_v38, %v511_v12 }
 0x109   :  { %v1231_v15 = vpack.c.bf16 %v711_v7, %v711_v7  ;;  %1002 = vst.msk [vmem:[%s1862_s3 + $0x6c] sm:$0xf] %vm974_vm3, %v1201_v10  ;;  %1034 = vst.msk [vmem:[%s1862_s3 + $0xec] sm:$0xf] %vm974_vm3, %v1233_v11  ;;  %v640_v19 = vadd.f32 %v1537_v38, %v639_v13  ;;  %v1307_v20 = vpop.f32.mrf.mxu0  ;;  %v1339_v21 = vpop.f32.mrf.mxu1 }
 0x10a   :  { %1000 = vst.msk [vmem:[%s1862_s3 + $0x64] sm:$0xf] %vm974_vm3, %v1199_v14  ;;  %v1204_v22 = vpack.c.bf16 %v684_v16, %v684_v16  ;;  %v1236_v23 = vpack.c.bf16 %v716_v17, %v716_v17  ;;  %v523_v24 = vadd.f32 %v1307_v20, %v1537_v38  ;;  %v651_v25 = vadd.f32 %v1339_v21, %v1537_v38 }
 0x10b   :  { %1032 = vst.msk [vmem:[%s1862_s3 + $0xe4] sm:$0xf] %vm974_vm3, %v1231_v15  ;;  %v682_v26 = vmax.f32 %v512_v18, 0.0  ;;  %v714_v27 = vmax.f32 %v640_v19, 0.0  ;;  %v514_v28 = vpop.f32.mrf.mxu0  ;;  %v642_v29 = vpop.f32.mrf.mxu1 }
 0x10c   :  { %1005 = vst.msk [vmem:[%s1862_s3 + $0x78] sm:$0xf] %vm974_vm3, %v1204_v22  ;;  %1037 = vst.msk [vmem:[%s1862_s3 + $0xf8] sm:$0xf] %vm974_vm3, %v1236_v23  ;;  %v685_v30 = vmax.f32 %v523_v24, 0.0  ;;  %v717_v31 = vmax.f32 %v651_v25, 0.0  ;;  %v515_v32 = vadd.f32 %v1537_v38, %v514_v28  ;;  %v643_v33 = vadd.f32 %v1537_v38, %v642_v29 }
 0x10d   :  { %v1202_v34 = vpack.c.bf16 %v682_v26, %v682_v26  ;;  %v1234_v35 = vpack.c.bf16 %v714_v27, %v714_v27 }
 0x10e   :  { %v1205_v36 = vpack.c.bf16 %v685_v30, %v685_v30  ;;  %v1237_v37 = vpack.c.bf16 %v717_v31, %v717_v31  ;;  %v683_v39 = vmax.f32 %v515_v32, 0.0  ;;  %v715_v40 = vmax.f32 %v643_v33, 0.0 }
 0x10f   :  { %1003 = vst.msk [vmem:[%s1862_s3 + $0x70] sm:$0xf] %vm974_vm3, %v1202_v34  ;;  %1035 = vst.msk [vmem:[%s1862_s3 + $0xf0] sm:$0xf] %vm974_vm3, %v1234_v35 }
 0x110   :  { %1006 = vst.msk [vmem:[%s1862_s3 + $0x7c] sm:$0xf] %vm974_vm3, %v1205_v36  ;;  %1038 = vst.msk [vmem:[%s1862_s3 + $0xfc] sm:$0xf] %vm974_vm3, %v1237_v37  ;;  %v1203_v38 = vpack.c.bf16 %v683_v39, %v683_v39  ;;  %v1235_v41 = vpack.c.bf16 %v715_v40, %v715_v40 }
 0x112   :  { %1004 = vst.msk [vmem:[%s1862_s3 + $0x74] sm:$0xf] %vm974_vm3, %v1203_v38  ;;  %1036 = vst.msk [vmem:[%s1862_s3 + $0xf4] sm:$0xf] %vm974_vm3, %v1235_v41 }

// kernel: resnet_forward.17
= control target key start
LH: loop header
LB: loop body
LE: loop exit
PB: predicated region body
PF: predicated region fallthrough
CT: control target
= control target key end

     0   :  { %v643_v0 = vmov 0   ;;  %vm211_vm0 = vcmask 130048   ;;  %vm471_vm1 = vcmask 125952   ;;  %vm492_vm2 = vcmask 122880   ;;  %s874_s1 = inlined_call_operand.vmem [shape: bf16[144,16], index: 1, kind: input, shape index: {}]   ;;  %s875_s0 = inlined_call_operand.vmem [shape: bf16[162,144], index: 0, kind: input, shape index: {}]   ;;  %s876_s2 = inlined_call_operand.vmem [shape: f32[1,16], index: 2, kind: input, shape index: {}]   ;;  %s877_s3 = inlined_call_operand.vmem [shape: bf16[162,16], index: 3, kind: output, shape index: {}]  }
   0x1   :  { %245 = vmatprep.subr.bf16.mxu0 %v643_v0  ;;  %v602_v1 = vld [vmem:[%s874_s1 + $0x38] sm:$0xff]   ;;  %583 = vmatprep.subr.bf16.mxu1 %v643_v0  ;;  %v603_v2 = vld [vmem:[%s874_s1 + $0x30] sm:$0xff]   ;;  %v604_v3 = vld [vmem:[%s874_s1 + $0x28] sm:$0xff]  }
   0x2   :  { %246 = vmatpush1.bf16.msra.mxu0 %v602_v1  ;;  %592 = vmatpush1.bf16.msra.mxu1 %v602_v1  ;;  %v605_v4 = vld [vmem:[%s874_s1 + $0x20] sm:$0xff]   ;;  %v606_v7 = vld [vmem:[%s874_s1 + $0x18] sm:$0xff]   ;;  %v607_v8 = vld [vmem:[%s874_s1 + $0x10] sm:$0xff]  }
   0x3   :  { %247 = vmatprep.subr.bf16.mxu0 %v643_v0  ;;  %584 = vmatprep.subr.bf16.mxu1 %v643_v0  ;;  %v613_v5 = vld [vmem:[%s875_s0 + $0x4] ss:$8 sps:$4 sm:$0xff]   ;;  %v611_v12 = vld [vmem:[%s875_s0] ss:$8 sps:$4 sm:$0xff]   ;;  %v617_v14 = vld [vmem:[%s875_s0 + $0x14] ss:$8 sps:$4 sm:$0xff]  }
   0x4   :  { %v616_v6 = vld [vmem:[%s875_s0 + $0x64] ss:$8 sps:$4 sm:$0xff]   ;;  %530 = vmatprep.mubr.msk.bf16.mxu0 %vm211_vm0, %v613_v5  ;;  %v614_v13 = vld [vmem:[%s875_s0 + $0x60] ss:$8 sps:$4 sm:$0xff]   ;;  %v620_v15 = vld [vmem:[%s875_s0 + $0x74] ss:$8 sps:$4 sm:$0xff]  }
   0x5   :  { %536 = vmatprep.mubr.msk.bf16.mxu1 %vm211_vm0, %v616_v6  ;;  %v608_v9 = vld [vmem:[%s874_s1 + $0x8] sm:$0xff]   ;;  %v609_v10 = vld [vmem:[%s874_s1] sm:$0xff]   ;;  %v619_v16 = vld [vmem:[%s875_s0 + $0x10] ss:$8 sps:$4 sm:$0xff]  }
   0x6   :  { %248 = vmatpush1.bf16.msra.mxu0 %v603_v2  ;;  %593 = vmatpush1.bf16.msra.mxu1 %v603_v2  ;;  %v610_v11 = vld [vmem:[%s874_s1 + $0x40] sm:$0xff]   ;;  %v622_v17 = vld [vmem:[%s875_s0 + $0x70] ss:$8 sps:$4 sm:$0xff]   ;;  %v629_v22 = vld [vmem:[%s875_s0 + $0x34] ss:$8 sps:$4 sm:$0xff]  }
   0x7   :  { %249 = vmatprep.subr.bf16.mxu0 %v643_v0  ;;  %585 = vmatprep.subr.bf16.mxu1 %v643_v0  ;;  %v623_v18 = vld [vmem:[%s875_s0 + $0x24] ss:$8 sps:$4 sm:$0xff]   ;;  %v625_v20 = vld [vmem:[%s875_s0 + $0x20] ss:$8 sps:$4 sm:$0xff]   ;;  %v632_v23 = vld [vmem:[%s875_s0 + $0x94] ss:$8 sps:$4 sm:$0xff]  }
   0x8   :  { %v626_v19 = vld [vmem:[%s875_s0 + $0x84] ss:$8 sps:$4 sm:$0xff]   ;;  %v628_v21 = vld [vmem:[%s875_s0 + $0x80] ss:$8 sps:$4 sm:$0xff]   ;;  %v631_v25 = vld [vmem:[%s875_s0 + $0x30] ss:$8 sps:$4 sm:$0xff]  }
   0x9   :  { %v35_v24 = vld [vmem:[%s875_s0 + $0xa0] sm:$0x11]  ;;  %v634_v26 = vld [vmem:[%s875_s0 + $0x90] ss:$8 sps:$4 sm:$0xff]   ;;  %v640_v31 = vld [vmem:[%s875_s0 + $0x54] ss:$8 sps:$4 sm:$0xff]  }
   0xa   :  { %250 = vmatpush1.bf16.msra.mxu0 %v604_v3  ;;  %594 = vmatpush1.bf16.msra.mxu1 %v604_v3  ;;  %v635_v27 = vld [vmem:[%s875_s0 + $0x44] ss:$8 sps:$4 sm:$0xff]   ;;  %v520_v28 = vcombine.high %v35_v24, %v35_v24  ;;  %v637_v29 = vld [vmem:[%s875_s0 + $0x40] ss:$8 sps:$4 sm:$0xff]   ;;  %v519_v30 = vcombine.low %v35_v24, %v35_v24  ;;  %v642_v32 = vld [vmem:[%s875_s0 + $0x50] ss:$8 sps:$4 sm:$0xff]  }
   0xb   :  { %251 = vmatprep.subr.bf16.mxu0 %v643_v0  ;;  %586 = vmatprep.subr.bf16.mxu1 %v643_v0  ;;  %v768_v33 = vld [vmem:[%s876_s2] ss:$0 sm:$0xff] }
   0xe   :  { %252 = vmatpush1.bf16.msra.mxu0 %v605_v4  ;;  %595 = vmatpush1.bf16.msra.mxu1 %v605_v4 }
   0xf   :  { %253 = vmatprep.subr.bf16.mxu0 %v643_v0  ;;  %587 = vmatprep.subr.bf16.mxu1 %v643_v0 }
  0x12   :  { %254 = vmatpush1.bf16.msra.mxu0 %v606_v7  ;;  %596 = vmatpush1.bf16.msra.mxu1 %v606_v7 }
  0x13   :  { %255 = vmatprep.subr.bf16.mxu0 %v643_v0  ;;  %588 = vmatprep.subr.bf16.mxu1 %v643_v0 }
  0x16   :  { %256 = vmatpush1.bf16.msra.mxu0 %v607_v8  ;;  %597 = vmatpush1.bf16.msra.mxu1 %v607_v8 }
  0x17   :  { %257 = vmatprep.subr.bf16.mxu0 %v643_v0  ;;  %589 = vmatprep.subr.bf16.mxu1 %v643_v0 }
  0x1a   :  { %258 = vmatpush1.bf16.msra.mxu0 %v608_v9  ;;  %598 = vmatpush1.bf16.msra.mxu1 %v608_v9 }
  0x1b   :  { %259 = vmatprep.subr.bf16.mxu0 %v643_v0  ;;  %590 = vmatprep.subr.bf16.mxu1 %v643_v0 }
  0x1e   :  { %260 = vmatpush1.bf16.msra.mxu0 %v609_v10  ;;  %599 = vmatpush1.bf16.msra.mxu1 %v609_v10 }
  0x1f   :  { %275 = vmatprep.subr.bf16.mxu0 %v643_v0  ;;  %591 = vmatprep.subr.bf16.mxu1 %v643_v0 }
  0x22   :  { %276 = vmatpush2.bf16.msra.mxu0 %v610_v11  ;;  %600 = vmatpush2.bf16.msra.mxu1 %v610_v11 }
  0x25   :  { %278 = vmatmul.mubr.bf16.vlgmr.msra.gmra.mxu0 %v611_v12  ;;  %326 = vmatmul.mubr.bf16.vlgmr.msra.gmra.mxu1 %v614_v13 }
  0x26   :  { %531 = vmatprep.mubr.msk.bf16.mxu0 %vm211_vm0, %v617_v14  ;;  %537 = vmatprep.mubr.msk.bf16.mxu1 %vm211_vm0, %v620_v15 }
  0x2d   :  { %286 = vmatmul.mubr.bf16.gmra.mxu0 %v619_v16  ;;  %334 = vmatmul.mubr.bf16.gmra.mxu1 %v622_v17 }
  0x2e   :  { %532 = vmatprep.mubr.msk.bf16.mxu0 %vm211_vm0, %v623_v18  ;;  %538 = vmatprep.mubr.msk.bf16.mxu1 %vm211_vm0, %v626_v19 }
  0x35   :  { %294 = vmatmul.mubr.bf16.gmra.mxu0 %v625_v20  ;;  %342 = vmatmul.mubr.bf16.gmra.mxu1 %v628_v21 }
  0x36   :  { %533 = vmatprep.mubr.msk.bf16.mxu0 %vm211_vm0, %v629_v22  ;;  %539 = vmatprep.mubr.msk.bf16.mxu1 %vm211_vm0, %v632_v23 }
  0x3d   :  { %302 = vmatmul.mubr.bf16.gmra.mxu0 %v631_v25  ;;  %350 = vmatmul.mubr.bf16.gmra.mxu1 %v634_v26 }
  0x3e   :  { %534 = vmatprep.mubr.msk.bf16.mxu0 %vm211_vm0, %v635_v27  ;;  %540 = vmatprep.mubr.msk.bf16.mxu1 %vm211_vm0, %v520_v28 }
  0x45   :  { %310 = vmatmul.mubr.bf16.gmra.mxu0 %v637_v29  ;;  %358 = vmatmul.mubr.bf16.gmra.mxu1 %v519_v30 }
  0x46   :  { %535 = vmatprep.mubr.msk.bf16.mxu0 %vm211_vm0, %v640_v31 }
  0x4d   :  { %318 = vmatmul.mubr.bf16.gmra.mxu0 %v642_v32 }
  0xe5   :  { %v279_v34 = vpop.f32.mrf.mxu0  ;;  %v327_v35 = vpop.f32.mrf.mxu1 }
  0xe6   :  { %v280_v36 = vadd.f32 %v768_v33, %v279_v34  ;;  %v328_v37 = vadd.f32 %v768_v33, %v327_v35 }
  0xe7   :  { %v281_v38 = vpop.f32.mrf.mxu0  ;;  %v329_v39 = vpop.f32.mrf.mxu1 }
  0xe8   :  { %v365_v40 = vmax.f32 %v280_v36, 0.0  ;;  %v377_v41 = vmax.f32 %v328_v37, 0.0 }
  0xe9   :  { %v282_v42 = vpop.f32.mrf.mxu0  ;;  %v330_v43 = vpop.f32.mrf.mxu1 }
  0xea   :  { %v562_v44 = vpack.c.bf16 %v365_v40, %v365_v40  ;;  %v283_v45 = vadd.f32 %v768_v33, %v282_v42  ;;  %v574_v46 = vpack.c.bf16 %v377_v41, %v377_v41  ;;  %v331_v47 = vadd.f32 %v768_v33, %v330_v43 }
  0xeb   :  { %v284_v48 = vpop.f32.mrf.mxu0  ;;  %v332_v49 = vpop.f32.mrf.mxu1 }
  0xec   :  { %472 = vst.msk [vmem:[%s877_s3] sm:$0xf] %vm471_vm1, %v562_v44  ;;  %v366_v50 = vmax.f32 %v283_v45, 0.0  ;;  %484 = vst.msk [vmem:[%s877_s3 + $0x30] sm:$0xf] %vm471_vm1, %v574_v46  ;;  %v378_v51 = vmax.f32 %v331_v47, 0.0 }
  0xed   :  { %v287_v52 = vpop.f32.mrf.mxu0  ;;  %v335_v53 = vpop.f32.mrf.mxu1 }
  0xee   :  { %v563_v54 = vpack.c.bf16 %v366_v50, %v366_v50  ;;  %v288_v55 = vadd.f32 %v768_v33, %v287_v52  ;;  %v575_v56 = vpack.c.bf16 %v378_v51, %v378_v51  ;;  %v336_v57 = vadd.f32 %v768_v33, %v335_v53 }
  0xef   :  { %v289_v58 = vpop.f32.mrf.mxu0  ;;  %v337_v59 = vpop.f32.mrf.mxu1 }
  0xf0   :  { %473 = vst.msk [vmem:[%s877_s3 + $0x4] sm:$0xf] %vm471_vm1, %v563_v54  ;;  %v367_v60 = vmax.f32 %v288_v55, 0.0  ;;  %485 = vst.msk [vmem:[%s877_s3 + $0x34] sm:$0xf] %vm471_vm1, %v575_v56  ;;  %v379_v61 = vmax.f32 %v336_v57, 0.0 }
  0xf1   :  { %v290_v62 = vpop.f32.mrf.mxu0  ;;  %v338_v63 = vpop.f32.mrf.mxu1 }
  0xf2   :  { %v564_v0 = vpack.c.bf16 %v367_v60, %v367_v60  ;;  %v291_v1 = vadd.f32 %v768_v33, %v290_v62  ;;  %v576_v2 = vpack.c.bf16 %v379_v61, %v379_v61  ;;  %v339_v3 = vadd.f32 %v768_v33, %v338_v63 }
  0xf3   :  { %v292_v4 = vpop.f32.mrf.mxu0  ;;  %v340_v5 = vpop.f32.mrf.mxu1 }
  0xf4   :  { %474 = vst.msk [vmem:[%s877_s3 + $0x8] sm:$0xf] %vm471_vm1, %v564_v0  ;;  %v368_v6 = vmax.f32 %v291_v1, 0.0  ;;  %486 = vst.msk [vmem:[%s877_s3 + $0x38] sm:$0xf] %vm471_vm1, %v576_v2  ;;  %v380_v7 = vmax.f32 %v339_v3, 0.0 }
  0xf5   :  { %v295_v8 = vpop.f32.mrf.mxu0  ;;  %v343_v9 = vpop.f32.mrf.mxu1 }
  0xf6   :  { %v565_v10 = vpack.c.bf16 %v368_v6, %v368_v6  ;;  %v296_v11 = vadd.f32 %v768_v33, %v295_v8  ;;  %v577_v12 = vpack.c.bf16 %v380_v7, %v380_v7  ;;  %v344_v13 = vadd.f32 %v768_v33, %v343_v9 }
  0xf7   :  { %v297_v14 = vpop.f32.mrf.mxu0  ;;  %v345_v15 = vpop.f32.mrf.mxu1 }
  0xf8   :  { %475 = vst.msk [vmem:[%s877_s3 + $0xc] sm:$0xf] %vm471_vm1, %v565_v10  ;;  %v369_v16 = vmax.f32 %v296_v11, 0.0  ;;  %487 = vst.msk [vmem:[%s877_s3 + $0x3c] sm:$0xf] %vm471_vm1, %v577_v12  ;;  %v381_v17 = vmax.f32 %v344_v13, 0.0 }
  0xf9   :  { %v298_v18 = vpop.f32.mrf.mxu0  ;;  %v346_v19 = vpop.f32.mrf.mxu1 }
  0xfa   :  { %v566_v20 = vpack.c.bf16 %v369_v16, %v369_v16  ;;  %v299_v21 = vadd.f32 %v768_v33, %v298_v18  ;;  %v578_v22 = vpack.c.bf16 %v381_v17, %v381_v17  ;;  %v347_v23 = vadd.f32 %v768_v33, %v346_v19 }
  0xfb   :  { %v300_v24 = vpop.f32.mrf.mxu0  ;;  %v348_v25 = vpop.f32.mrf.mxu1 }
  0xfc   :  { %476 = vst.msk [vmem:[%s877_s3 + $0x10] sm:$0xf] %vm471_vm1, %v566_v20  ;;  %v370_v26 = vmax.f32 %v299_v21, 0.0  ;;  %488 = vst.msk [vmem:[%s877_s3 + $0x40] sm:$0xf] %vm471_vm1, %v578_v22  ;;  %v382_v27 = vmax.f32 %v347_v23, 0.0 }
  0xfd   :  { %v303_v28 = vpop.f32.mrf.mxu0  ;;  %v351_v29 = vpop.f32.mrf.mxu1 }
  0xfe   :  { %v567_v30 = vpack.c.bf16 %v370_v26, %v370_v26  ;;  %v304_v31 = vadd.f32 %v768_v33, %v303_v28  ;;  %v579_v32 = vpack.c.bf16 %v382_v27, %v382_v27  ;;  %v352_v34 = vadd.f32 %v768_v33, %v351_v29 }
  0xff   :  { %v305_v35 = vpop.f32.mrf.mxu0  ;;  %v353_v36 = vpop.f32.mrf.mxu1 }
 0x100   :  { %477 = vst.msk [vmem:[%s877_s3 + $0x14] sm:$0xf] %vm471_vm1, %v567_v30  ;;  %v371_v37 = vmax.f32 %v304_v31, 0.0  ;;  %489 = vst.msk [vmem:[%s877_s3 + $0x44] sm:$0xf] %vm471_vm1, %v579_v32  ;;  %v383_v38 = vmax.f32 %v352_v34, 0.0 }
 0x101   :  { %v306_v39 = vpop.f32.mrf.mxu0  ;;  %v354_v40 = vpop.f32.mrf.mxu1 }
 0x102   :  { %v568_v41 = vpack.c.bf16 %v371_v37, %v371_v37  ;;  %v307_v42 = vadd.f32 %v768_v33, %v306_v39  ;;  %v580_v43 = vpack.c.bf16 %v383_v38, %v383_v38  ;;  %v355_v44 = vadd.f32 %v768_v33, %v354_v40 }
 0x103   :  { %v308_v45 = vpop.f32.mrf.mxu0  ;;  %v356_v46 = vpop.f32.mrf.mxu1 }
 0x104   :  { %478 = vst.msk [vmem:[%s877_s3 + $0x18] sm:$0xf] %vm471_vm1, %v568_v41  ;;  %v372_v47 = vmax.f32 %v307_v42, 0.0  ;;  %490 = vst.msk [vmem:[%s877_s3 + $0x48] sm:$0xf] %vm471_vm1, %v580_v43  ;;  %v384_v48 = vmax.f32 %v355_v44, 0.0 }
 0x105   :  { %v311_v49 = vpop.f32.mrf.mxu0  ;;  %v359_v50 = vpop.f32.mrf.mxu1 }
 0x106   :  { %v569_v51 = vpack.c.bf16 %v372_v47, %v372_v47  ;;  %v312_v52 = vadd.f32 %v768_v33, %v311_v49  ;;  %v581_v53 = vpack.c.bf16 %v384_v48, %v384_v48  ;;  %v360_v54 = vadd.f32 %v768_v33, %v359_v50 }
 0x107   :  { %v313_v55 = vpop.f32.mrf.mxu0  ;;  %v361_v56 = vpop.f32.mrf.mxu1 }
 0x108   :  { %479 = vst.msk [vmem:[%s877_s3 + $0x1c] sm:$0xf] %vm471_vm1, %v569_v51  ;;  %v373_v57 = vmax.f32 %v312_v52, 0.0  ;;  %491 = vst.msk [vmem:[%s877_s3 + $0x4c] sm:$0xf] %vm471_vm1, %v581_v53  ;;  %v385_v58 = vmax.f32 %v360_v54, 0.0 }
 0x109   :  { %v314_v59 = vpop.f32.mrf.mxu0  ;;  %v362_v60 = vpop.f32.mrf.mxu1 }
 0x10a   :  { %v570_v61 = vpack.c.bf16 %v373_v57, %v373_v57  ;;  %v315_v62 = vadd.f32 %v768_v33, %v314_v59  ;;  %v582_v63 = vpack.c.bf16 %v385_v58, %v385_v58 }
 0x10b   :  { %v316_v0 = vpop.f32.mrf.mxu0  ;;  %v363_v1 = vpop.f32.mrf.mxu1 }
 0x10c   :  { %480 = vst.msk [vmem:[%s877_s3 + $0x20] sm:$0xf] %vm471_vm1, %v570_v61  ;;  %v374_v2 = vmax.f32 %v315_v62, 0.0 }
 0x10d   :  { %493 = vst.msk [vmem:[%s877_s3 + $0x50] sm:$0x1] %vm492_vm2, %v582_v63  ;;  %v319_v3 = vpop.f32.mrf.mxu0 }
 0x10e   :  { %v571_v4 = vpack.c.bf16 %v374_v2, %v374_v2  ;;  %v320_v5 = vadd.f32 %v768_v33, %v319_v3 }
 0x10f   :  { %v321_v6 = vpop.f32.mrf.mxu0 }
 0x110   :  { %481 = vst.msk [vmem:[%s877_s3 + $0x24] sm:$0xf] %vm471_vm1, %v571_v4  ;;  %v375_v7 = vmax.f32 %v320_v5, 0.0 }
 0x111   :  { %v322_v8 = vpop.f32.mrf.mxu0 }
 0x112   :  { %v572_v9 = vpack.c.bf16 %v375_v7, %v375_v7  ;;  %v323_v10 = vadd.f32 %v768_v33, %v322_v8 }
 0x113   :  { %v324_v11 = vpop.f32.mrf.mxu0 }
 0x114   :  { %482 = vst.msk [vmem:[%s877_s3 + $0x28] sm:$0xf] %vm471_vm1, %v572_v9  ;;  %v376_v12 = vmax.f32 %v323_v10, 0.0 }
 0x116   :  { %v573_v13 = vpack.c.bf16 %v376_v12, %v376_v12 }
 0x118   :  { %483 = vst.msk [vmem:[%s877_s3 + $0x2c] sm:$0xf] %vm471_vm1, %v573_v13 }

// kernel: resnet_forward.18
= control target key start
LH: loop header
LB: loop body
LE: loop exit
PB: predicated region body
PF: predicated region fallthrough
CT: control target
= control target key end

     0   :  { %v758_v0 = vmov 0   ;;  %vm214_vm0 = vcmask 130048   ;;  %vm537_vm1 = vcmask 125952   ;;  %vm558_vm2 = vcmask 122880   ;;  %s1027_s1 = inlined_call_operand.vmem [shape: bf16[144,16], index: 1, kind: input, shape index: {}]   ;;  %s1028_s0 = inlined_call_operand.vmem [shape: bf16[162,144], index: 0, kind: input, shape index: {}]   ;;  %s1029_s3 = inlined_call_operand.vmem [shape: bf16[162,16], index: 3, kind: input, shape index: {}]   ;;  %s1030_s2 = inlined_call_operand.vmem [shape: f32[1,16], index: 2, kind: input, shape index: {}]   ;;  %s1031_s4 = inlined_call_operand.vmem [shape: bf16[162,16], index: 4, kind: output, shape index: {}]  }
   0x1   :  { %248 = vmatprep.subr.bf16.mxu0 %v758_v0  ;;  %v717_v1 = vld [vmem:[%s1027_s1 + $0x38] sm:$0xff]   ;;  %698 = vmatprep.subr.bf16.mxu1 %v758_v0  ;;  %v718_v2 = vld [vmem:[%s1027_s1 + $0x30] sm:$0xff]   ;;  %v719_v3 = vld [vmem:[%s1027_s1 + $0x28] sm:$0xff]  }
   0x2   :  { %249 = vmatpush1.bf16.msra.mxu0 %v717_v1  ;;  %707 = vmatpush1.bf16.msra.mxu1 %v717_v1  ;;  %v720_v4 = vld [vmem:[%s1027_s1 + $0x20] sm:$0xff]   ;;  %v721_v7 = vld [vmem:[%s1027_s1 + $0x18] sm:$0xff]   ;;  %v722_v8 = vld [vmem:[%s1027_s1 + $0x10] sm:$0xff]  }
   0x3   :  { %250 = vmatprep.subr.bf16.mxu0 %v758_v0  ;;  %699 = vmatprep.subr.bf16.mxu1 %v758_v0  ;;  %v728_v5 = vld [vmem:[%s1028_s0 + $0x4] ss:$8 sps:$4 sm:$0xff]   ;;  %v726_v12 = vld [vmem:[%s1028_s0] ss:$8 sps:$4 sm:$0xff]   ;;  %v732_v14 = vld [vmem:[%s1028_s0 + $0x14] ss:$8 sps:$4 sm:$0xff]  }
   0x4   :  { %v731_v6 = vld [vmem:[%s1028_s0 + $0x64] ss:$8 sps:$4 sm:$0xff]   ;;  %596 = vmatprep.mubr.msk.bf16.mxu0 %vm214_vm0, %v728_v5  ;;  %v729_v13 = vld [vmem:[%s1028_s0 + $0x60] ss:$8 sps:$4 sm:$0xff]   ;;  %v735_v15 = vld [vmem:[%s1028_s0 + $0x74] ss:$8 sps:$4 sm:$0xff]  }
   0x5   :  { %602 = vmatprep.mubr.msk.bf16.mxu1 %vm214_vm0, %v731_v6  ;;  %v723_v9 = vld [vmem:[%s1027_s1 + $0x8] sm:$0xff]   ;;  %v724_v10 = vld [vmem:[%s1027_s1] sm:$0xff]   ;;  %v734_v16 = vld [vmem:[%s1028_s0 + $0x10] ss:$8 sps:$4 sm:$0xff]  }
   0x6   :  { %251 = vmatpush1.bf16.msra.mxu0 %v718_v2  ;;  %708 = vmatpush1.bf16.msra.mxu1 %v718_v2  ;;  %v725_v11 = vld [vmem:[%s1027_s1 + $0x40] sm:$0xff]   ;;  %v737_v17 = vld [vmem:[%s1028_s0 + $0x70] ss:$8 sps:$4 sm:$0xff]   ;;  %v744_v22 = vld [vmem:[%s1028_s0 + $0x34] ss:$8 sps:$4 sm:$0xff]  }
   0x7   :  { %252 = vmatprep.subr.bf16.mxu0 %v758_v0  ;;  %700 = vmatprep.subr.bf16.mxu1 %v758_v0  ;;  %v738_v18 = vld [vmem:[%s1028_s0 + $0x24] ss:$8 sps:$4 sm:$0xff]   ;;  %v740_v20 = vld [vmem:[%s1028_s0 + $0x20] ss:$8 sps:$4 sm:$0xff]   ;;  %v747_v23 = vld [vmem:[%s1028_s0 + $0x94] ss:$8 sps:$4 sm:$0xff]  }
   0x8   :  { %v741_v19 = vld [vmem:[%s1028_s0 + $0x84] ss:$8 sps:$4 sm:$0xff]   ;;  %v743_v21 = vld [vmem:[%s1028_s0 + $0x80] ss:$8 sps:$4 sm:$0xff]   ;;  %v746_v25 = vld [vmem:[%s1028_s0 + $0x30] ss:$8 sps:$4 sm:$0xff]  }
   0x9   :  { %v38_v24 = vld [vmem:[%s1028_s0 + $0xa0] sm:$0x11]  ;;  %v749_v26 = vld [vmem:[%s1028_s0 + $0x90] ss:$8 sps:$4 sm:$0xff]   ;;  %v755_v31 = vld [vmem:[%s1028_s0 + $0x54] ss:$8 sps:$4 sm:$0xff]  }
   0xa   :  { %253 = vmatpush1.bf16.msra.mxu0 %v719_v3  ;;  %709 = vmatpush1.bf16.msra.mxu1 %v719_v3  ;;  %v750_v27 = vld [vmem:[%s1028_s0 + $0x44] ss:$8 sps:$4 sm:$0xff]   ;;  %v586_v28 = vcombine.high %v38_v24, %v38_v24  ;;  %v752_v29 = vld [vmem:[%s1028_s0 + $0x40] ss:$8 sps:$4 sm:$0xff]   ;;  %v585_v30 = vcombine.low %v38_v24, %v38_v24  ;;  %v757_v32 = vld [vmem:[%s1028_s0 + $0x50] ss:$8 sps:$4 sm:$0xff]  }
   0xb   :  { %254 = vmatprep.subr.bf16.mxu0 %v758_v0  ;;  %701 = vmatprep.subr.bf16.mxu1 %v758_v0  ;;  %v650_v33 = vld [vmem:[%s1029_s3] sm:$0xff]   ;;  %v694_v34 = vld [vmem:[%s1029_s3 + $0x30] sm:$0xff]   ;;  %v689_v47 = vld [vmem:[%s1029_s3 + $0x8] sm:$0xff]  }
   0xc   :  { %v894_v35 = vld [vmem:[%s1030_s2] ss:$0 sm:$0xff]  ;;  %v651_v36 = vunpack.c.l.bf16 %v650_v33  ;;  %v675_v37 = vunpack.c.l.bf16 %v694_v34  ;;  %v652_v45 = vunpack.c.h.bf16 %v650_v33  ;;  %v676_v48 = vunpack.c.h.bf16 %v694_v34  ;;  %v695_v49 = vld [vmem:[%s1029_s3 + $0x38] sm:$0xff]  }
   0xd   :  { %v655_v57 = vunpack.c.l.bf16 %v689_v47  ;;  %v679_v59 = vunpack.c.l.bf16 %v695_v49 }
   0xe   :  { %255 = vmatpush1.bf16.msra.mxu0 %v720_v4  ;;  %710 = vmatpush1.bf16.msra.mxu1 %v720_v4 }
   0xf   :  { %256 = vmatprep.subr.bf16.mxu0 %v758_v0  ;;  %702 = vmatprep.subr.bf16.mxu1 %v758_v0 }
  0x12   :  { %257 = vmatpush1.bf16.msra.mxu0 %v721_v7  ;;  %711 = vmatpush1.bf16.msra.mxu1 %v721_v7  ;;  %v656_v7 = vunpack.c.h.bf16 %v689_v47 }
  0x13   :  { %258 = vmatprep.subr.bf16.mxu0 %v758_v0  ;;  %703 = vmatprep.subr.bf16.mxu1 %v758_v0 }
  0x16   :  { %259 = vmatpush1.bf16.msra.mxu0 %v722_v8  ;;  %712 = vmatpush1.bf16.msra.mxu1 %v722_v8 }
  0x17   :  { %260 = vmatprep.subr.bf16.mxu0 %v758_v0  ;;  %704 = vmatprep.subr.bf16.mxu1 %v758_v0 }
  0x1a   :  { %261 = vmatpush1.bf16.msra.mxu0 %v723_v9  ;;  %713 = vmatpush1.bf16.msra.mxu1 %v723_v9  ;;  %v680_v9 = vunpack.c.h.bf16 %v695_v49 }
  0x1b   :  { %262 = vmatprep.subr.bf16.mxu0 %v758_v0  ;;  %705 = vmatprep.subr.bf16.mxu1 %v758_v0 }
  0x1e   :  { %263 = vmatpush1.bf16.msra.mxu0 %v724_v10  ;;  %714 = vmatpush1.bf16.msra.mxu1 %v724_v10 }
  0x1f   :  { %278 = vmatprep.subr.bf16.mxu0 %v758_v0  ;;  %706 = vmatprep.subr.bf16.mxu1 %v758_v0 }
  0x22   :  { %279 = vmatpush2.bf16.msra.mxu0 %v725_v11  ;;  %715 = vmatpush2.bf16.msra.mxu1 %v725_v11 }
  0x25   :  { %281 = vmatmul.mubr.bf16.vlgmr.msra.gmra.mxu0 %v726_v12  ;;  %329 = vmatmul.mubr.bf16.vlgmr.msra.gmra.mxu1 %v729_v13 }
  0x26   :  { %597 = vmatprep.mubr.msk.bf16.mxu0 %vm214_vm0, %v732_v14  ;;  %603 = vmatprep.mubr.msk.bf16.mxu1 %vm214_vm0, %v735_v15  ;;  %v690_v14 = vld [vmem:[%s1029_s3 + $0x10] sm:$0xff]   ;;  %v696_v15 = vld [vmem:[%s1029_s3 + $0x40] sm:$0xff]  }
  0x2d   :  { %289 = vmatmul.mubr.bf16.gmra.mxu0 %v734_v16  ;;  %337 = vmatmul.mubr.bf16.gmra.mxu1 %v737_v17 }
  0x2e   :  { %598 = vmatprep.mubr.msk.bf16.mxu0 %vm214_vm0, %v738_v18  ;;  %604 = vmatprep.mubr.msk.bf16.mxu1 %vm214_vm0, %v741_v19 }
  0x35   :  { %297 = vmatmul.mubr.bf16.gmra.mxu0 %v740_v20  ;;  %345 = vmatmul.mubr.bf16.gmra.mxu1 %v743_v21 }
  0x36   :  { %599 = vmatprep.mubr.msk.bf16.mxu0 %vm214_vm0, %v744_v22  ;;  %605 = vmatprep.mubr.msk.bf16.mxu1 %vm214_vm0, %v747_v23  ;;  %v659_v23 = vunpack.c.l.bf16 %v690_v14 }
  0x3d   :  { %305 = vmatmul.mubr.bf16.gmra.mxu0 %v746_v25  ;;  %353 = vmatmul.mubr.bf16.gmra.mxu1 %v749_v26  ;;  %v683_v25 = vunpack.c.l.bf16 %v696_v15 }
  0x3e   :  { %600 = vmatprep.mubr.msk.bf16.mxu0 %vm214_vm0, %v750_v27  ;;  %606 = vmatprep.mubr.msk.bf16.mxu1 %vm214_vm0, %v586_v28 }
  0x45   :  { %313 = vmatmul.mubr.bf16.gmra.mxu0 %v752_v29  ;;  %361 = vmatmul.mubr.bf16.gmra.mxu1 %v585_v30 }
  0x46   :  { %601 = vmatprep.mubr.msk.bf16.mxu0 %vm214_vm0, %v755_v31 }
  0x4d   :  { %321 = vmatmul.mubr.bf16.gmra.mxu0 %v757_v32 }
  0xe5   :  { %v282_v38 = vpop.f32.mrf.mxu0  ;;  %v330_v39 = vpop.f32.mrf.mxu1 }
  0xe6   :  { %v283_v40 = vadd.f32 %v894_v35, %v282_v38  ;;  %v331_v41 = vadd.f32 %v894_v35, %v330_v39  ;;  %v660_v38 = vunpack.c.h.bf16 %v690_v14 }
  0xe7   :  { %v284_v42 = vpop.f32.mrf.mxu0  ;;  %v332_v43 = vpop.f32.mrf.mxu1 }
  0xe8   :  { %v410_v44 = vadd.f32 %v651_v36, %v283_v40  ;;  %v422_v46 = vadd.f32 %v675_v37, %v331_v41  ;;  %v684_v40 = vunpack.c.h.bf16 %v696_v15 }
  0xe9   :  { %v285_v50 = vpop.f32.mrf.mxu0  ;;  %v333_v51 = vpop.f32.mrf.mxu1 }
  0xea   :  { %v431_v52 = vmax.f32 %v410_v44, 0.0  ;;  %v286_v53 = vadd.f32 %v894_v35, %v285_v50  ;;  %v443_v54 = vmax.f32 %v422_v46, 0.0  ;;  %v334_v55 = vadd.f32 %v894_v35, %v333_v51  ;;  %v697_v46 = vld [vmem:[%s1029_s3 + $0x48] sm:$0xff]  }
  0xeb   :  { %v287_v56 = vpop.f32.mrf.mxu0  ;;  %v335_v58 = vpop.f32.mrf.mxu1 }
  0xec   :  { %v628_v60 = vpack.c.bf16 %v431_v52, %v431_v52  ;;  %v411_v61 = vadd.f32 %v652_v45, %v286_v53  ;;  %v640_v62 = vpack.c.bf16 %v443_v54, %v443_v54  ;;  %v423_v63 = vadd.f32 %v676_v48, %v334_v55  ;;  %v691_v45 = vld [vmem:[%s1029_s3 + $0x18] sm:$0xff]  }
  0xed   :  { %v290_v0 = vpop.f32.mrf.mxu0  ;;  %v338_v1 = vpop.f32.mrf.mxu1  ;;  %v663_v54 = vunpack.c.l.bf16 %v691_v45  ;;  %v687_v56 = vunpack.c.l.bf16 %v697_v46 }
  0xee   :  { %538 = vst.msk [vmem:[%s1031_s4] sm:$0xf] %vm537_vm1, %v628_v60  ;;  %v432_v2 = vmax.f32 %v411_v61, 0.0  ;;  %550 = vst.msk [vmem:[%s1031_s4 + $0x30] sm:$0xf] %vm537_vm1, %v640_v62  ;;  %v291_v3 = vadd.f32 %v894_v35, %v290_v0  ;;  %v444_v4 = vmax.f32 %v423_v63, 0.0  ;;  %v339_v5 = vadd.f32 %v894_v35, %v338_v1 }
  0xef   :  { %v292_v6 = vpop.f32.mrf.mxu0  ;;  %v340_v8 = vpop.f32.mrf.mxu1 }
  0xf0   :  { %v629_v10 = vpack.c.bf16 %v432_v2, %v432_v2  ;;  %v412_v11 = vadd.f32 %v655_v57, %v291_v3  ;;  %v641_v12 = vpack.c.bf16 %v444_v4, %v444_v4  ;;  %v424_v13 = vadd.f32 %v679_v59, %v339_v5 }
  0xf1   :  { %v293_v16 = vpop.f32.mrf.mxu0  ;;  %v341_v17 = vpop.f32.mrf.mxu1  ;;  %v664_v4 = vunpack.c.h.bf16 %v691_v45  ;;  %v688_v6 = vunpack.c.h.bf16 %v697_v46 }
  0xf2   :  { %539 = vst.msk [vmem:[%s1031_s4 + $0x4] sm:$0xf] %vm537_vm1, %v629_v10  ;;  %v433_v18 = vmax.f32 %v412_v11, 0.0  ;;  %551 = vst.msk [vmem:[%s1031_s4 + $0x34] sm:$0xf] %vm537_vm1, %v641_v12  ;;  %v294_v19 = vadd.f32 %v894_v35, %v293_v16  ;;  %v445_v20 = vmax.f32 %v424_v13, 0.0  ;;  %v342_v21 = vadd.f32 %v894_v35, %v341_v17 }
  0xf3   :  { %v295_v22 = vpop.f32.mrf.mxu0  ;;  %v343_v24 = vpop.f32.mrf.mxu1  ;;  %v692_v11 = vld [vmem:[%s1029_s3 + $0x20] sm:$0xff]   ;;  %v388_v12 = vld [vmem:[%s1029_s3 + $0x50] sm:$0x1] }
  0xf4   :  { %v630_v26 = vpack.c.bf16 %v433_v18, %v433_v18  ;;  %v413_v27 = vadd.f32 %v656_v7, %v294_v19  ;;  %v642_v28 = vpack.c.bf16 %v445_v20, %v445_v20  ;;  %v425_v29 = vadd.f32 %v680_v9, %v342_v21 }
  0xf5   :  { %v298_v30 = vpop.f32.mrf.mxu0  ;;  %v346_v31 = vpop.f32.mrf.mxu1  ;;  %v667_v20 = vunpack.c.l.bf16 %v692_v11  ;;  %v409_v22 = vunpack.c.l.bf16 %v388_v12 }
  0xf6   :  { %540 = vst.msk [vmem:[%s1031_s4 + $0x8] sm:$0xf] %vm537_vm1, %v630_v26  ;;  %v434_v32 = vmax.f32 %v413_v27, 0.0  ;;  %552 = vst.msk [vmem:[%s1031_s4 + $0x38] sm:$0xf] %vm537_vm1, %v642_v28  ;;  %v299_v33 = vadd.f32 %v894_v35, %v298_v30  ;;  %v446_v34 = vmax.f32 %v425_v29, 0.0  ;;  %v347_v36 = vadd.f32 %v894_v35, %v346_v31 }
  0xf7   :  { %v300_v37 = vpop.f32.mrf.mxu0  ;;  %v348_v39 = vpop.f32.mrf.mxu1 }
  0xf8   :  { %v631_v41 = vpack.c.bf16 %v434_v32, %v434_v32  ;;  %v414_v42 = vadd.f32 %v659_v23, %v299_v33  ;;  %v643_v43 = vpack.c.bf16 %v446_v34, %v446_v34  ;;  %v426_v44 = vadd.f32 %v683_v25, %v347_v36 }
  0xf9   :  { %v301_v47 = vpop.f32.mrf.mxu0  ;;  %v349_v48 = vpop.f32.mrf.mxu1  ;;  %v668_v34 = vunpack.c.h.bf16 %v692_v11 }
  0xfa   :  { %541 = vst.msk [vmem:[%s1031_s4 + $0xc] sm:$0xf] %vm537_vm1, %v631_v41  ;;  %v435_v49 = vmax.f32 %v414_v42, 0.0  ;;  %553 = vst.msk [vmem:[%s1031_s4 + $0x3c] sm:$0xf] %vm537_vm1, %v643_v43  ;;  %v302_v50 = vadd.f32 %v894_v35, %v301_v47  ;;  %v447_v51 = vmax.f32 %v426_v44, 0.0  ;;  %v350_v52 = vadd.f32 %v894_v35, %v349_v48 }
  0xfb   :  { %v303_v53 = vpop.f32.mrf.mxu0  ;;  %v351_v55 = vpop.f32.mrf.mxu1  ;;  %v693_v42 = vld [vmem:[%s1029_s3 + $0x28] sm:$0xff]  }
  0xfc   :  { %v632_v57 = vpack.c.bf16 %v435_v49, %v435_v49  ;;  %v415_v58 = vadd.f32 %v660_v38, %v302_v50  ;;  %v644_v59 = vpack.c.bf16 %v447_v51, %v447_v51  ;;  %v427_v60 = vadd.f32 %v684_v40, %v350_v52 }
  0xfd   :  { %v306_v61 = vpop.f32.mrf.mxu0  ;;  %v354_v62 = vpop.f32.mrf.mxu1  ;;  %v671_v52 = vunpack.c.l.bf16 %v693_v42 }
  0xfe   :  { %542 = vst.msk [vmem:[%s1031_s4 + $0x10] sm:$0xf] %vm537_vm1, %v632_v57  ;;  %v436_v63 = vmax.f32 %v415_v58, 0.0  ;;  %554 = vst.msk [vmem:[%s1031_s4 + $0x40] sm:$0xf] %vm537_vm1, %v644_v59  ;;  %v307_v0 = vadd.f32 %v894_v35, %v306_v61  ;;  %v448_v1 = vmax.f32 %v427_v60, 0.0  ;;  %v355_v2 = vadd.f32 %v894_v35, %v354_v62 }
  0xff   :  { %v308_v3 = vpop.f32.mrf.mxu0  ;;  %v356_v5 = vpop.f32.mrf.mxu1  ;;  %v672_v59 = vunpack.c.h.bf16 %v693_v42 }
 0x100   :  { %v633_v7 = vpack.c.bf16 %v436_v63, %v436_v63  ;;  %v416_v8 = vadd.f32 %v663_v54, %v307_v0  ;;  %v645_v9 = vpack.c.bf16 %v448_v1, %v448_v1  ;;  %v428_v10 = vadd.f32 %v687_v56, %v355_v2 }
 0x101   :  { %v309_v13 = vpop.f32.mrf.mxu0  ;;  %v357_v14 = vpop.f32.mrf.mxu1 }
 0x102   :  { %543 = vst.msk [vmem:[%s1031_s4 + $0x14] sm:$0xf] %vm537_vm1, %v633_v7  ;;  %v437_v15 = vmax.f32 %v416_v8, 0.0  ;;  %555 = vst.msk [vmem:[%s1031_s4 + $0x44] sm:$0xf] %vm537_vm1, %v645_v9  ;;  %v310_v16 = vadd.f32 %v894_v35, %v309_v13  ;;  %v449_v17 = vmax.f32 %v428_v10, 0.0  ;;  %v358_v18 = vadd.f32 %v894_v35, %v357_v14 }
 0x103   :  { %v311_v19 = vpop.f32.mrf.mxu0  ;;  %v359_v21 = vpop.f32.mrf.mxu1 }
 0x104   :  { %v634_v23 = vpack.c.bf16 %v437_v15, %v437_v15  ;;  %v417_v24 = vadd.f32 %v664_v4, %v310_v16  ;;  %v646_v25 = vpack.c.bf16 %v449_v17, %v449_v17  ;;  %v429_v26 = vadd.f32 %v688_v6, %v358_v18 }
 0x105   :  { %v314_v27 = vpop.f32.mrf.mxu0  ;;  %v362_v28 = vpop.f32.mrf.mxu1 }
 0x106   :  { %544 = vst.msk [vmem:[%s1031_s4 + $0x18] sm:$0xf] %vm537_vm1, %v634_v23  ;;  %v438_v29 = vmax.f32 %v417_v24, 0.0  ;;  %556 = vst.msk [vmem:[%s1031_s4 + $0x48] sm:$0xf] %vm537_vm1, %v646_v25  ;;  %v315_v30 = vadd.f32 %v894_v35, %v314_v27  ;;  %v450_v31 = vmax.f32 %v429_v26, 0.0  ;;  %v363_v32 = vadd.f32 %v894_v35, %v362_v28 }
 0x107   :  { %v316_v33 = vpop.f32.mrf.mxu0  ;;  %v364_v36 = vpop.f32.mrf.mxu1 }
 0x108   :  { %v635_v37 = vpack.c.bf16 %v438_v29, %v438_v29  ;;  %v418_v38 = vadd.f32 %v667_v20, %v315_v30  ;;  %v647_v39 = vpack.c.bf16 %v450_v31, %v450_v31  ;;  %v430_v40 = vadd.f32 %v409_v22, %v363_v32 }
 0x109   :  { %v317_v41 = vpop.f32.mrf.mxu0  ;;  %v365_v43 = vpop.f32.mrf.mxu1 }
 0x10a   :  { %545 = vst.msk [vmem:[%s1031_s4 + $0x1c] sm:$0xf] %vm537_vm1, %v635_v37  ;;  %v439_v44 = vmax.f32 %v418_v38, 0.0  ;;  %557 = vst.msk [vmem:[%s1031_s4 + $0x4c] sm:$0xf] %vm537_vm1, %v647_v39  ;;  %v318_v45 = vadd.f32 %v894_v35, %v317_v41  ;;  %v451_v46 = vmax.f32 %v430_v40, 0.0 }
 0x10b   :  { %v319_v47 = vpop.f32.mrf.mxu0  ;;  %v366_v48 = vpop.f32.mrf.mxu1 }
 0x10c   :  { %v636_v49 = vpack.c.bf16 %v439_v44, %v439_v44  ;;  %v419_v50 = vadd.f32 %v668_v34, %v318_v45  ;;  %v648_v51 = vpack.c.bf16 %v451_v46, %v451_v46 }
 0x10d   :  { %v322_v53 = vpop.f32.mrf.mxu0 }
 0x10e   :  { %546 = vst.msk [vmem:[%s1031_s4 + $0x20] sm:$0xf] %vm537_vm1, %v636_v49  ;;  %v440_v54 = vmax.f32 %v419_v50, 0.0  ;;  %v323_v55 = vadd.f32 %v894_v35, %v322_v53 }
 0x10f   :  { %559 = vst.msk [vmem:[%s1031_s4 + $0x50] sm:$0x1] %vm558_vm2, %v648_v51  ;;  %v324_v56 = vpop.f32.mrf.mxu0 }
 0x110   :  { %v637_v57 = vpack.c.bf16 %v440_v54, %v440_v54  ;;  %v420_v58 = vadd.f32 %v671_v52, %v323_v55 }
 0x111   :  { %v325_v60 = vpop.f32.mrf.mxu0 }
 0x112   :  { %547 = vst.msk [vmem:[%s1031_s4 + $0x24] sm:$0xf] %vm537_vm1, %v637_v57  ;;  %v441_v61 = vmax.f32 %v420_v58, 0.0  ;;  %v326_v62 = vadd.f32 %v894_v35, %v325_v60 }
 0x113   :  { %v327_v63 = vpop.f32.mrf.mxu0 }
 0x114   :  { %v638_v0 = vpack.c.bf16 %v441_v61, %v441_v61  ;;  %v421_v1 = vadd.f32 %v672_v59, %v326_v62 }
 0x116   :  { %548 = vst.msk [vmem:[%s1031_s4 + $0x28] sm:$0xf] %vm537_vm1, %v638_v0  ;;  %v442_v2 = vmax.f32 %v421_v1, 0.0 }
 0x118   :  { %v639_v3 = vpack.c.bf16 %v442_v2, %v442_v2 }
 0x11a   :  { %549 = vst.msk [vmem:[%s1031_s4 + $0x2c] sm:$0xf] %vm537_vm1, %v639_v3 }

// kernel: resnet_forward.21
= control target key start
LH: loop header
LB: loop body
LE: loop exit
PB: predicated region body
PF: predicated region fallthrough
CT: control target
= control target key end

     0   :  { %v335_v0 = vmov 0   ;;  %vm134_vm0 = vcmask 130048   ;;  %vm247_vm1 = vcmask 257024   ;;  %vm254_vm2 = vcmask 253952   ;;  %s438_s1 = inlined_call_operand.vmem [shape: bf16[144,32], index: 1, kind: input, shape index: {}]   ;;  %s439_s0 = inlined_call_operand.vmem [shape: bf16[50,144], index: 0, kind: input, shape index: {}]   ;;  %s440_s2 = inlined_call_operand.vmem [shape: f32[1,32], index: 2, kind: input, shape index: {}]   ;;  %s441_s3 = inlined_call_operand.vmem [shape: bf16[50,32], index: 3, kind: output, shape index: {}]  }
   0x1   :  { %147 = vmatprep.subr.bf16.mxu0 %v335_v0  ;;  %296 = vmatprep.subr.bf16.mxu1 %v335_v0  ;;  %v315_v1 = vld [vmem:[%s438_s1 + $0x38] sm:$0xff]   ;;  %v316_v2 = vld [vmem:[%s438_s1 + $0x30] sm:$0xff]   ;;  %v317_v3 = vld [vmem:[%s438_s1 + $0x28] sm:$0xff]  }
   0x2   :  { %148 = vmatpush1.bf16.msra.mxu0 %v315_v1  ;;  %305 = vmatpush1.bf16.msra.mxu1 %v315_v1  ;;  %v318_v4 = vld [vmem:[%s438_s1 + $0x20] sm:$0xff]   ;;  %v319_v7 = vld [vmem:[%s438_s1 + $0x18] sm:$0xff]   ;;  %v320_v8 = vld [vmem:[%s438_s1 + $0x10] sm:$0xff]  }
   0x3   :  { %149 = vmatprep.subr.bf16.mxu0 %v335_v0  ;;  %297 = vmatprep.subr.bf16.mxu1 %v335_v0  ;;  %v326_v5 = vld [vmem:[%s439_s0 + $0x4] ss:$8 sps:$4 sm:$0xff]   ;;  %v21_v12 = vld [vmem:[%s439_s0 + $0x30] sm:$0x11]  ;;  %v324_v13 = vld [vmem:[%s439_s0] ss:$8 sps:$4 sm:$0xff]  }
   0x4   :  { %v329_v6 = vld [vmem:[%s439_s0 + $0x24] ss:$8 sps:$4 sm:$0xff]   ;;  %278 = vmatprep.mubr.msk.bf16.mxu0 %vm134_vm0, %v326_v5  ;;  %v327_v14 = vld [vmem:[%s439_s0 + $0x20] ss:$8 sps:$4 sm:$0xff]   ;;  %v330_v15 = vld [vmem:[%s439_s0 + $0x14] ss:$8 sps:$4 sm:$0xff]   ;;  %v268_v16 = vcombine.high %v21_v12, %v21_v12  ;;  %v267_v18 = vcombine.low %v21_v12, %v21_v12 }
   0x5   :  { %280 = vmatprep.mubr.msk.bf16.mxu1 %vm134_vm0, %v329_v6  ;;  %v321_v9 = vld [vmem:[%s438_s1 + $0x8] sm:$0xff]   ;;  %v322_v10 = vld [vmem:[%s438_s1] sm:$0xff]   ;;  %v333_v17 = vld [vmem:[%s439_s0 + $0x10] ss:$8 sps:$4 sm:$0xff]  }
   0x6   :  { %150 = vmatpush1.bf16.msra.mxu0 %v316_v2  ;;  %306 = vmatpush1.bf16.msra.mxu1 %v316_v2  ;;  %v323_v11 = vld [vmem:[%s438_s1 + $0x40] sm:$0xff]  }
   0x7   :  { %151 = vmatprep.subr.bf16.mxu0 %v335_v0  ;;  %298 = vmatprep.subr.bf16.mxu1 %v335_v0  ;;  %v260_v19 = vld [vmem:[%s440_s2] ss:$0 sm:$0xff] }
   0xa   :  { %152 = vmatpush1.bf16.msra.mxu0 %v317_v3  ;;  %307 = vmatpush1.bf16.msra.mxu1 %v317_v3 }
   0xb   :  { %153 = vmatprep.subr.bf16.mxu0 %v335_v0  ;;  %299 = vmatprep.subr.bf16.mxu1 %v335_v0 }
   0xe   :  { %154 = vmatpush1.bf16.msra.mxu0 %v318_v4  ;;  %308 = vmatpush1.bf16.msra.mxu1 %v318_v4 }
   0xf   :  { %155 = vmatprep.subr.bf16.mxu0 %v335_v0  ;;  %300 = vmatprep.subr.bf16.mxu1 %v335_v0 }
  0x12   :  { %156 = vmatpush1.bf16.msra.mxu0 %v319_v7  ;;  %309 = vmatpush1.bf16.msra.mxu1 %v319_v7 }
  0x13   :  { %157 = vmatprep.subr.bf16.mxu0 %v335_v0  ;;  %301 = vmatprep.subr.bf16.mxu1 %v335_v0 }
  0x16   :  { %158 = vmatpush1.bf16.msra.mxu0 %v320_v8  ;;  %310 = vmatpush1.bf16.msra.mxu1 %v320_v8 }
  0x17   :  { %159 = vmatprep.subr.bf16.mxu0 %v335_v0  ;;  %302 = vmatprep.subr.bf16.mxu1 %v335_v0 }
  0x1a   :  { %160 = vmatpush1.bf16.msra.mxu0 %v321_v9  ;;  %311 = vmatpush1.bf16.msra.mxu1 %v321_v9 }
  0x1b   :  { %161 = vmatprep.subr.bf16.mxu0 %v335_v0  ;;  %303 = vmatprep.subr.bf16.mxu1 %v335_v0 }
  0x1e   :  { %162 = vmatpush1.bf16.msra.mxu0 %v322_v10  ;;  %312 = vmatpush1.bf16.msra.mxu1 %v322_v10 }
  0x1f   :  { %177 = vmatprep.subr.bf16.mxu0 %v335_v0  ;;  %304 = vmatprep.subr.bf16.mxu1 %v335_v0 }
  0x22   :  { %178 = vmatpush2.bf16.msra.mxu0 %v323_v11  ;;  %313 = vmatpush2.bf16.msra.mxu1 %v323_v11 }
  0x25   :  { %180 = vmatmul.mubr.bf16.vlgmr.msra.gmra.mxu0 %v324_v13  ;;  %196 = vmatmul.mubr.bf16.vlgmr.msra.gmra.mxu1 %v327_v14 }
  0x26   :  { %279 = vmatprep.mubr.msk.bf16.mxu0 %vm134_vm0, %v330_v15  ;;  %281 = vmatprep.mubr.msk.bf16.mxu1 %vm134_vm0, %v268_v16 }
  0x2d   :  { %188 = vmatmul.mubr.bf16.gmra.mxu0 %v333_v17  ;;  %204 = vmatmul.mubr.bf16.gmra.mxu1 %v267_v18 }
  0xe5   :  { %v181_v20 = vpop.f32.mrf.mxu0  ;;  %v197_v21 = vpop.f32.mrf.mxu1 }
  0xe6   :  { %v182_v22 = vadd.f32 %v260_v19, %v181_v20  ;;  %v198_v23 = vadd.f32 %v260_v19, %v197_v21 }
  0xe7   :  { %v183_v24 = vpop.f32.mrf.mxu0  ;;  %v199_v25 = vpop.f32.mrf.mxu1 }
  0xe8   :  { %v211_v26 = vmax.f32 %v182_v22, 0.0  ;;  %v215_v27 = vmax.f32 %v198_v23, 0.0 }
  0xe9   :  { %v184_v28 = vpop.f32.mrf.mxu0  ;;  %v200_v29 = vpop.f32.mrf.mxu1 }
  0xea   :  { %v289_v30 = vpack.c.bf16 %v211_v26, %v211_v26  ;;  %v293_v31 = vpack.c.bf16 %v215_v27, %v215_v27  ;;  %v185_v32 = vadd.f32 %v260_v19, %v184_v28  ;;  %v201_v33 = vadd.f32 %v260_v19, %v200_v29 }
  0xeb   :  { %v186_v34 = vpop.f32.mrf.mxu0  ;;  %v202_v35 = vpop.f32.mrf.mxu1 }
  0xec   :  { %248 = vst.msk [vmem:[%s441_s3] sm:$0xf] %vm247_vm1, %v289_v30  ;;  %252 = vst.msk [vmem:[%s441_s3 + $0x10] sm:$0xf] %vm247_vm1, %v293_v31  ;;  %v212_v36 = vmax.f32 %v185_v32, 0.0  ;;  %v216_v37 = vmax.f32 %v201_v33, 0.0 }
  0xed   :  { %v189_v38 = vpop.f32.mrf.mxu0  ;;  %v205_v39 = vpop.f32.mrf.mxu1 }
  0xee   :  { %v290_v40 = vpack.c.bf16 %v212_v36, %v212_v36  ;;  %v294_v41 = vpack.c.bf16 %v216_v37, %v216_v37  ;;  %v190_v42 = vadd.f32 %v260_v19, %v189_v38  ;;  %v206_v43 = vadd.f32 %v260_v19, %v205_v39 }
  0xef   :  { %v191_v44 = vpop.f32.mrf.mxu0  ;;  %v207_v45 = vpop.f32.mrf.mxu1 }
  0xf0   :  { %249 = vst.msk [vmem:[%s441_s3 + $0x4] sm:$0xf] %vm247_vm1, %v290_v40  ;;  %253 = vst.msk [vmem:[%s441_s3 + $0x14] sm:$0xf] %vm247_vm1, %v294_v41  ;;  %v213_v46 = vmax.f32 %v190_v42, 0.0  ;;  %v217_v47 = vmax.f32 %v206_v43, 0.0 }
  0xf1   :  { %v192_v48 = vpop.f32.mrf.mxu0  ;;  %v208_v49 = vpop.f32.mrf.mxu1 }
  0xf2   :  { %v291_v50 = vpack.c.bf16 %v213_v46, %v213_v46  ;;  %v295_v51 = vpack.c.bf16 %v217_v47, %v217_v47  ;;  %v193_v52 = vadd.f32 %v260_v19, %v192_v48 }
  0xf3   :  { %v194_v53 = vpop.f32.mrf.mxu0  ;;  %v209_v54 = vpop.f32.mrf.mxu1 }
  0xf4   :  { %250 = vst.msk [vmem:[%s441_s3 + $0x8] sm:$0xf] %vm247_vm1, %v291_v50  ;;  %v214_v55 = vmax.f32 %v193_v52, 0.0 }
  0xf5   :  { %255 = vst.msk [vmem:[%s441_s3 + $0x18] sm:$0x1] %vm254_vm2, %v295_v51 }
  0xf6   :  { %v292_v56 = vpack.c.bf16 %v214_v55, %v214_v55 }
  0xf8   :  { %251 = vst.msk [vmem:[%s441_s3 + $0xc] sm:$0xf] %vm247_vm1, %v292_v56 }

// kernel: resnet_forward.22
= control target key start
LH: loop header
LB: loop body
LE: loop exit
PB: predicated region body
PF: predicated region fallthrough
CT: control target
= control target key end

     0   :  { %vm238_vm0 = vcmask 261120   ;;  %vm436_vm1 = vcmask 257024   ;;  %vm443_vm2 = vcmask 253952   ;;  %s786_s1 = inlined_call_operand.vmem [shape: bf16[288,32], index: 1, kind: input, shape index: {}]   ;;  %s787_s0 = inlined_call_operand.vmem [shape: bf16[50,288], index: 0, kind: input, shape index: {}]   ;;  %s788_s2 = inlined_call_operand.vmem [shape: f32[1,32], index: 2, kind: input, shape index: {}]   ;;  %s789_s3 = inlined_call_operand.vmem [shape: bf16[50,32], index: 3, kind: input, shape index: {}]   ;;  %s790_s4 = inlined_call_operand.vmem [shape: bf16[50,32], index: 4, kind: output, shape index: {}]  }
   0x1   :  { %v586_v0 = vld [vmem:[%s786_s1 + $0x78] sm:$0xff]   ;;  %v588_v2 = vld [vmem:[%s786_s1 + $0x70] sm:$0xff]   ;;  %v590_v4 = vld [vmem:[%s786_s1 + $0x68] sm:$0xff]  }
   0x2   :  { %v587_v1 = vld [vmem:[%s786_s1 + $0x38] sm:$0xff]   ;;  %512 = vmatprep.subr.bf16.mxu0 %v586_v0  ;;  %570 = vmatprep.subr.bf16.mxu1 %v586_v0  ;;  %v589_v3 = vld [vmem:[%s786_s1 + $0x30] sm:$0xff]   ;;  %v591_v5 = vld [vmem:[%s786_s1 + $0x28] sm:$0xff]  }
   0x3   :  { %513 = vmatpush3.bf16.msra.mxu0 %v587_v1  ;;  %578 = vmatpush3.bf16.msra.mxu1 %v587_v1  ;;  %v592_v6 = vld [vmem:[%s786_s1 + $0x60] sm:$0xff]   ;;  %v594_v8 = vld [vmem:[%s786_s1 + $0x58] sm:$0xff]   ;;  %v596_v10 = vld [vmem:[%s786_s1 + $0x50] sm:$0xff]  }
   0x4   :  { %514 = vmatprep.subr.bf16.mxu0 %v588_v2  ;;  %571 = vmatprep.subr.bf16.mxu1 %v588_v2  ;;  %v593_v7 = vld [vmem:[%s786_s1 + $0x20] sm:$0xff]   ;;  %v595_v9 = vld [vmem:[%s786_s1 + $0x18] sm:$0xff]   ;;  %v30_v12 = vld [vmem:[%s787_s0 + $0x48] sm:$0x11] }
   0x5   :  { %v604_v11 = vld [vmem:[%s787_s0 + $0x4] ss:$12 sps:$4 sm:$0xff]   ;;  %v460_v13 = vcombine.high %v30_v12, %v30_v12  ;;  %v598_v15 = vld [vmem:[%s786_s1 + $0x48] sm:$0xff]   ;;  %v459_v21 = vcombine.low %v30_v12, %v30_v12  ;;  %v614_v27 = vld [vmem:[%s787_s0 + $0x34] ss:$12 sps:$4 sm:$0xff]  }
   0x6   :  { %v597_v14 = vld [vmem:[%s786_s1 + $0x10] sm:$0xff]   ;;  %283 = vmatprep.mubr.bf16.mxu0 %v604_v11  ;;  %v599_v16 = vld [vmem:[%s786_s1 + $0x8] sm:$0xff]   ;;  %v600_v17 = vld [vmem:[%s786_s1 + $0x40] sm:$0xff]  }
   0x7   :  { %515 = vmatpush3.bf16.msra.mxu0 %v589_v3  ;;  %579 = vmatpush3.bf16.msra.mxu1 %v589_v3  ;;  %v601_v18 = vld [vmem:[%s786_s1] sm:$0xff]   ;;  %v607_v19 = vld [vmem:[%s786_s1 + $0x88] sm:$0xff]   ;;  %v617_v29 = vld [vmem:[%s787_s0 + $0x30] ss:$12 sps:$4 sm:$0xff]  }
   0x8   :  { %516 = vmatprep.subr.bf16.mxu0 %v590_v4  ;;  %572 = vmatprep.subr.bf16.mxu1 %v590_v4  ;;  %v602_v20 = vld [vmem:[%s787_s0] ss:$12 sps:$4 sm:$0xff]   ;;  %v609_v22 = vld [vmem:[%s787_s0 + $0x1c] ss:$12 sps:$4 sm:$0xff]   ;;  %v612_v25 = vld [vmem:[%s787_s0 + $0x18] ss:$12 sps:$4 sm:$0xff]  }
   0x9   :  { %307 = vmatprep.mubr.bf16.mxu1 %v460_v13  ;;  %v608_v23 = vld [vmem:[%s786_s1 + $0x80] sm:$0xff]   ;;  %v611_v24 = vld [vmem:[%s787_s0 + $0x8] ss:$12 sps:$4 sm:$0xff]   ;;  %v618_v30 = vld [vmem:[%s787_s0 + $0x50] ss:$0 sps:$4 sm:$0x11]  }
   0xa   :  { %v613_v26 = vld [vmem:[%s787_s0 + $0x20] ss:$12 sps:$4 sm:$0xff]   ;;  %v616_v28 = vld [vmem:[%s787_s0 + $0x38] ss:$12 sps:$4 sm:$0xff]   ;;  %v511_v12 = vld [vmem:[%s789_s3 + $0x10] sm:$0xff]  }
   0xb   :  { %517 = vmatpush3.bf16.msra.mxu0 %v591_v5  ;;  %580 = vmatpush3.bf16.msra.mxu1 %v591_v5  ;;  %v738_v40 = vld [vmem:[%s788_s2] ss:$0 sm:$0xff]  ;;  %v510_v45 = vld [vmem:[%s789_s3 + $0x8] sm:$0xff]   ;;  %v385_v60 = vld [vmem:[%s789_s3 + $0x18] sm:$0x1] }
   0xc   :  { %518 = vmatprep.subr.bf16.mxu0 %v592_v6  ;;  %573 = vmatprep.subr.bf16.mxu1 %v592_v6  ;;  %v499_v41 = vld [vmem:[%s789_s3] sm:$0xff]   ;;  %v504_v53 = vunpack.c.l.bf16 %v510_v45  ;;  %v505_v3 = vunpack.c.h.bf16 %v510_v45 }
   0xd   :  { %v500_v47 = vunpack.c.l.bf16 %v499_v41  ;;  %v501_v59 = vunpack.c.h.bf16 %v499_v41 }
   0xf   :  { %519 = vmatpush3.bf16.msra.mxu0 %v593_v7  ;;  %581 = vmatpush3.bf16.msra.mxu1 %v593_v7  ;;  %v392_v7 = vunpack.c.l.bf16 %v385_v60 }
  0x10   :  { %520 = vmatprep.subr.bf16.mxu0 %v594_v8  ;;  %574 = vmatprep.subr.bf16.mxu1 %v594_v8 }
  0x13   :  { %521 = vmatpush3.bf16.msra.mxu0 %v595_v9  ;;  %582 = vmatpush3.bf16.msra.mxu1 %v595_v9 }
  0x14   :  { %522 = vmatprep.subr.bf16.mxu0 %v596_v10  ;;  %575 = vmatprep.subr.bf16.mxu1 %v596_v10 }
  0x17   :  { %523 = vmatpush3.bf16.msra.mxu0 %v597_v14  ;;  %583 = vmatpush3.bf16.msra.mxu1 %v597_v14 }
  0x18   :  { %524 = vmatprep.subr.bf16.mxu0 %v598_v15  ;;  %576 = vmatprep.subr.bf16.mxu1 %v598_v15 }
  0x1b   :  { %525 = vmatpush3.bf16.msra.mxu0 %v599_v16  ;;  %584 = vmatpush3.bf16.msra.mxu1 %v599_v16 }
  0x1c   :  { %526 = vmatprep.subr.bf16.mxu0 %v600_v17  ;;  %577 = vmatprep.subr.bf16.mxu1 %v600_v17 }
  0x1f   :  { %527 = vmatpush3.bf16.msra.mxu0 %v601_v18  ;;  %585 = vmatpush3.bf16.msra.mxu1 %v601_v18 }
  0x20   :  { %558 = vmatprep.subr.bf16.mxu1 %v607_v19 }
  0x22   :  { %284 = vmatmul.mubr.bf16.vlgmr.msra.gmra.mxu0 %v602_v20  ;;  %308 = vmatmul.mubr.bf16.vlgmr.msra.gmra.mxu1 %v459_v21  ;;  %v508_v21 = vunpack.c.l.bf16 %v511_v12 }
  0x23   :  { %559 = vmatpush3.bf16.msra.mxu1 %v607_v19  ;;  %291 = vmatprep.mubr.bf16.mxu0 %v609_v22 }
  0x24   :  { %560 = vmatprep.subr.bf16.mxu1 %v608_v23  ;;  %562 = vmatprep.mubr.msk.bf16.mxu1 %vm238_vm0, %v611_v24 }
  0x27   :  { %561 = vmatpush3.bf16.msra.mxu1 %v608_v23 }
  0x2a   :  { %292 = vmatmul.mubr.bf16.gmra.mxu0 %v612_v25  ;;  %563 = vmatmul.mubr.msk.bf16.vlgmr.msra.gmra.mxu1 %vm238_vm0, %v613_v26 }
  0x2b   :  { %299 = vmatprep.mubr.bf16.mxu0 %v614_v27  ;;  %566 = vmatprep.mubr.msk.bf16.mxu1 %vm238_vm0, %v616_v28 }
  0x32   :  { %300 = vmatmul.mubr.bf16.gmra.mxu0 %v617_v29  ;;  %567 = vmatmul.mubr.msk.bf16.gmra.mxu1 %vm238_vm0, %v618_v30 }
  0xe2   :  { %v528_v31 = vpop.f32.mrf.mxu0  ;;  %v546_v32 = vpop.f32.mrf.mxu1 }
  0xe4   :  { %v529_v33 = vpop.f32.mrf.mxu0  ;;  %v547_v34 = vpop.f32.mrf.mxu1 }
  0xe5   :  { %v530_v37 = vadd.f32 %v529_v33, %v528_v31  ;;  %v548_v52 = vadd.f32 %v547_v34, %v546_v32 }
  0xe6   :  { %v531_v35 = vpop.f32.mrf.mxu0  ;;  %v549_v36 = vpop.f32.mrf.mxu1 }
  0xe7   :  { %v286_v46 = vadd.f32 %v530_v37, %v738_v40  ;;  %v310_v5 = vadd.f32 %v548_v52, %v738_v40  ;;  %v509_v37 = vunpack.c.h.bf16 %v511_v12 }
  0xe8   :  { %v532_v38 = vpop.f32.mrf.mxu0  ;;  %v550_v39 = vpop.f32.mrf.mxu1 }
  0xe9   :  { %v533_v44 = vadd.f32 %v532_v38, %v531_v35 }
  0xea   :  { %v534_v42 = vpop.f32.mrf.mxu0  ;;  %v564_v43 = vpop.f32.mrf.mxu1 }
  0xeb   :  { %v289_v58 = vadd.f32 %v533_v44, %v738_v40 }
  0xec   :  { %v535_v48 = vpop.f32.mrf.mxu0  ;;  %v349_v49 = vpop.f32.mrf.mxu1 }
  0xed   :  { %v536_v50 = vadd.f32 %v535_v48, %v534_v42  ;;  %v350_v51 = vadd.f32 %v349_v49, %v286_v46 }
  0xee   :  { %v537_v54 = vpop.f32.mrf.mxu0  ;;  %v565_v55 = vpop.f32.mrf.mxu1 }
  0xef   :  { %v294_v56 = vadd.f32 %v536_v50, %v738_v40  ;;  %v393_v57 = vadd.f32 %v500_v47, %v350_v51 }
  0xf0   :  { %v538_v61 = vpop.f32.mrf.mxu0  ;;  %v352_v62 = vpop.f32.mrf.mxu1 }
  0xf1   :  { %v358_v63 = vadd.f32 %v564_v43, %v294_v56  ;;  %v400_v0 = vmax.f32 %v393_v57, 0.0  ;;  %v539_v1 = vadd.f32 %v538_v61, %v537_v54  ;;  %v353_v2 = vadd.f32 %v352_v62, %v289_v58 }
  0xf2   :  { %v540_v4 = vpop.f32.mrf.mxu0  ;;  %v568_v6 = vpop.f32.mrf.mxu1 }
  0xf3   :  { %v395_v8 = vadd.f32 %v504_v53, %v358_v63  ;;  %v491_v9 = vpack.c.bf16 %v400_v0, %v400_v0  ;;  %v297_v10 = vadd.f32 %v539_v1, %v738_v40  ;;  %v394_v11 = vadd.f32 %v501_v59, %v353_v2 }
  0xf4   :  { %v374_v13 = vadd.f32 %v568_v6, %v310_v5  ;;  %v541_v14 = vpop.f32.mrf.mxu0  ;;  %v365_v15 = vpop.f32.mrf.mxu1 }
  0xf5   :  { %v402_v16 = vmax.f32 %v395_v8, 0.0  ;;  %437 = vst.msk [vmem:[%s790_s4] sm:$0xf] %vm436_vm1, %v491_v9  ;;  %v361_v17 = vadd.f32 %v565_v55, %v297_v10  ;;  %v401_v18 = vmax.f32 %v394_v11, 0.0  ;;  %v542_v19 = vadd.f32 %v541_v14, %v540_v4 }
  0xf6   :  { %v399_v20 = vadd.f32 %v392_v7, %v374_v13  ;;  %v543_v22 = vpop.f32.mrf.mxu0  ;;  %v569_v23 = vpop.f32.mrf.mxu1 }
  0xf7   :  { %v493_v24 = vpack.c.bf16 %v402_v16, %v402_v16  ;;  %v396_v25 = vadd.f32 %v505_v3, %v361_v17  ;;  %v492_v26 = vpack.c.bf16 %v401_v18, %v401_v18  ;;  %v302_v27 = vadd.f32 %v542_v19, %v738_v40 }
  0xf8   :  { %v406_v28 = vmax.f32 %v399_v20, 0.0  ;;  %v544_v29 = vpop.f32.mrf.mxu0  ;;  %v368_v38 = vpop.f32.mrf.mxu1 }
  0xf9   :  { %439 = vst.msk [vmem:[%s790_s4 + $0x8] sm:$0xf] %vm436_vm1, %v493_v24  ;;  %v403_v30 = vmax.f32 %v396_v25, 0.0  ;;  %438 = vst.msk [vmem:[%s790_s4 + $0x4] sm:$0xf] %vm436_vm1, %v492_v26  ;;  %v366_v31 = vadd.f32 %v365_v15, %v302_v27  ;;  %v545_v32 = vadd.f32 %v544_v29, %v543_v22 }
  0xfa   :  { %v497_v33 = vpack.c.bf16 %v406_v28, %v406_v28 }
  0xfb   :  { %v494_v34 = vpack.c.bf16 %v403_v30, %v403_v30  ;;  %v397_v35 = vadd.f32 %v508_v21, %v366_v31  ;;  %v305_v36 = vadd.f32 %v545_v32, %v738_v40 }
  0xfc   :  { %444 = vst.msk [vmem:[%s790_s4 + $0x18] sm:$0x1] %vm443_vm2, %v497_v33 }
  0xfd   :  { %440 = vst.msk [vmem:[%s790_s4 + $0xc] sm:$0xf] %vm436_vm1, %v494_v34  ;;  %v404_v39 = vmax.f32 %v397_v35, 0.0  ;;  %v369_v41 = vadd.f32 %v368_v38, %v305_v36 }
  0xff   :  { %v495_v42 = vpack.c.bf16 %v404_v39, %v404_v39  ;;  %v398_v43 = vadd.f32 %v509_v37, %v369_v41 }
 0x101   :  { %441 = vst.msk [vmem:[%s790_s4 + $0x10] sm:$0xf] %vm436_vm1, %v495_v42  ;;  %v405_v40 = vmax.f32 %v398_v43, 0.0 }
 0x103   :  { %v496_v44 = vpack.c.bf16 %v405_v40, %v405_v40 }
 0x105   :  { %442 = vst.msk [vmem:[%s790_s4 + $0x14] sm:$0xf] %vm436_vm1, %v496_v44 }

// kernel: resnet_forward.23
= control target key start
LH: loop header
LB: loop body
LE: loop exit
PB: predicated region body
PF: predicated region fallthrough
CT: control target
= control target key end

     0   :  { %vm235_vm0 = vcmask 261120   ;;  %vm412_vm1 = vcmask 257024   ;;  %vm419_vm2 = vcmask 253952   ;;  %s722_s1 = inlined_call_operand.vmem [shape: bf16[288,32], index: 1, kind: input, shape index: {}]   ;;  %s723_s0 = inlined_call_operand.vmem [shape: bf16[50,288], index: 0, kind: input, shape index: {}]   ;;  %s724_s2 = inlined_call_operand.vmem [shape: f32[1,32], index: 2, kind: input, shape index: {}]   ;;  %s725_s3 = inlined_call_operand.vmem [shape: bf16[50,32], index: 3, kind: output, shape index: {}]  }
   0x1   :  { %v548_v0 = vld [vmem:[%s722_s1 + $0x78] sm:$0xff]   ;;  %v550_v2 = vld [vmem:[%s722_s1 + $0x70] sm:$0xff]   ;;  %v552_v4 = vld [vmem:[%s722_s1 + $0x68] sm:$0xff]  }
   0x2   :  { %v549_v1 = vld [vmem:[%s722_s1 + $0x38] sm:$0xff]   ;;  %474 = vmatprep.subr.bf16.mxu0 %v548_v0  ;;  %532 = vmatprep.subr.bf16.mxu1 %v548_v0  ;;  %v551_v3 = vld [vmem:[%s722_s1 + $0x30] sm:$0xff]   ;;  %v553_v5 = vld [vmem:[%s722_s1 + $0x28] sm:$0xff]  }
   0x3   :  { %475 = vmatpush3.bf16.msra.mxu0 %v549_v1  ;;  %540 = vmatpush3.bf16.msra.mxu1 %v549_v1  ;;  %v554_v6 = vld [vmem:[%s722_s1 + $0x60] sm:$0xff]   ;;  %v556_v8 = vld [vmem:[%s722_s1 + $0x58] sm:$0xff]   ;;  %v558_v10 = vld [vmem:[%s722_s1 + $0x50] sm:$0xff]  }
   0x4   :  { %476 = vmatprep.subr.bf16.mxu0 %v550_v2  ;;  %533 = vmatprep.subr.bf16.mxu1 %v550_v2  ;;  %v555_v7 = vld [vmem:[%s722_s1 + $0x20] sm:$0xff]   ;;  %v557_v9 = vld [vmem:[%s722_s1 + $0x18] sm:$0xff]   ;;  %v27_v12 = vld [vmem:[%s723_s0 + $0x48] sm:$0x11] }
   0x5   :  { %v566_v11 = vld [vmem:[%s723_s0 + $0x4] ss:$12 sps:$4 sm:$0xff]   ;;  %v436_v13 = vcombine.high %v27_v12, %v27_v12  ;;  %v560_v15 = vld [vmem:[%s722_s1 + $0x48] sm:$0xff]   ;;  %v435_v21 = vcombine.low %v27_v12, %v27_v12  ;;  %v576_v27 = vld [vmem:[%s723_s0 + $0x34] ss:$12 sps:$4 sm:$0xff]  }
   0x6   :  { %v559_v14 = vld [vmem:[%s722_s1 + $0x10] sm:$0xff]   ;;  %280 = vmatprep.mubr.bf16.mxu0 %v566_v11  ;;  %v561_v16 = vld [vmem:[%s722_s1 + $0x8] sm:$0xff]   ;;  %v562_v17 = vld [vmem:[%s722_s1 + $0x40] sm:$0xff]  }
   0x7   :  { %477 = vmatpush3.bf16.msra.mxu0 %v551_v3  ;;  %541 = vmatpush3.bf16.msra.mxu1 %v551_v3  ;;  %v563_v18 = vld [vmem:[%s722_s1] sm:$0xff]   ;;  %v569_v19 = vld [vmem:[%s722_s1 + $0x88] sm:$0xff]   ;;  %v579_v29 = vld [vmem:[%s723_s0 + $0x30] ss:$12 sps:$4 sm:$0xff]  }
   0x8   :  { %478 = vmatprep.subr.bf16.mxu0 %v552_v4  ;;  %534 = vmatprep.subr.bf16.mxu1 %v552_v4  ;;  %v564_v20 = vld [vmem:[%s723_s0] ss:$12 sps:$4 sm:$0xff]   ;;  %v571_v22 = vld [vmem:[%s723_s0 + $0x1c] ss:$12 sps:$4 sm:$0xff]   ;;  %v574_v25 = vld [vmem:[%s723_s0 + $0x18] ss:$12 sps:$4 sm:$0xff]  }
   0x9   :  { %304 = vmatprep.mubr.bf16.mxu1 %v436_v13  ;;  %v570_v23 = vld [vmem:[%s722_s1 + $0x80] sm:$0xff]   ;;  %v573_v24 = vld [vmem:[%s723_s0 + $0x8] ss:$12 sps:$4 sm:$0xff]   ;;  %v580_v30 = vld [vmem:[%s723_s0 + $0x50] ss:$0 sps:$4 sm:$0x11]  }
   0xa   :  { %v575_v26 = vld [vmem:[%s723_s0 + $0x20] ss:$12 sps:$4 sm:$0xff]   ;;  %v578_v28 = vld [vmem:[%s723_s0 + $0x38] ss:$12 sps:$4 sm:$0xff]  }
   0xb   :  { %479 = vmatpush3.bf16.msra.mxu0 %v553_v5  ;;  %542 = vmatpush3.bf16.msra.mxu1 %v553_v5  ;;  %v425_v40 = vld [vmem:[%s724_s2] ss:$0 sm:$0xff] }
   0xc   :  { %480 = vmatprep.subr.bf16.mxu0 %v554_v6  ;;  %535 = vmatprep.subr.bf16.mxu1 %v554_v6 }
   0xf   :  { %481 = vmatpush3.bf16.msra.mxu0 %v555_v7  ;;  %543 = vmatpush3.bf16.msra.mxu1 %v555_v7 }
  0x10   :  { %482 = vmatprep.subr.bf16.mxu0 %v556_v8  ;;  %536 = vmatprep.subr.bf16.mxu1 %v556_v8 }
  0x13   :  { %483 = vmatpush3.bf16.msra.mxu0 %v557_v9  ;;  %544 = vmatpush3.bf16.msra.mxu1 %v557_v9 }
  0x14   :  { %484 = vmatprep.subr.bf16.mxu0 %v558_v10  ;;  %537 = vmatprep.subr.bf16.mxu1 %v558_v10 }
  0x17   :  { %485 = vmatpush3.bf16.msra.mxu0 %v559_v14  ;;  %545 = vmatpush3.bf16.msra.mxu1 %v559_v14 }
  0x18   :  { %486 = vmatprep.subr.bf16.mxu0 %v560_v15  ;;  %538 = vmatprep.subr.bf16.mxu1 %v560_v15 }
  0x1b   :  { %487 = vmatpush3.bf16.msra.mxu0 %v561_v16  ;;  %546 = vmatpush3.bf16.msra.mxu1 %v561_v16 }
  0x1c   :  { %488 = vmatprep.subr.bf16.mxu0 %v562_v17  ;;  %539 = vmatprep.subr.bf16.mxu1 %v562_v17 }
  0x1f   :  { %489 = vmatpush3.bf16.msra.mxu0 %v563_v18  ;;  %547 = vmatpush3.bf16.msra.mxu1 %v563_v18 }
  0x20   :  { %520 = vmatprep.subr.bf16.mxu1 %v569_v19 }
  0x22   :  { %281 = vmatmul.mubr.bf16.vlgmr.msra.gmra.mxu0 %v564_v20  ;;  %305 = vmatmul.mubr.bf16.vlgmr.msra.gmra.mxu1 %v435_v21 }
  0x23   :  { %521 = vmatpush3.bf16.msra.mxu1 %v569_v19  ;;  %288 = vmatprep.mubr.bf16.mxu0 %v571_v22 }
  0x24   :  { %522 = vmatprep.subr.bf16.mxu1 %v570_v23  ;;  %524 = vmatprep.mubr.msk.bf16.mxu1 %vm235_vm0, %v573_v24 }
  0x27   :  { %523 = vmatpush3.bf16.msra.mxu1 %v570_v23 }
  0x2a   :  { %289 = vmatmul.mubr.bf16.gmra.mxu0 %v574_v25  ;;  %525 = vmatmul.mubr.msk.bf16.vlgmr.msra.gmra.mxu1 %vm235_vm0, %v575_v26 }
  0x2b   :  { %296 = vmatprep.mubr.bf16.mxu0 %v576_v27  ;;  %528 = vmatprep.mubr.msk.bf16.mxu1 %vm235_vm0, %v578_v28 }
  0x32   :  { %297 = vmatmul.mubr.bf16.gmra.mxu0 %v579_v29  ;;  %529 = vmatmul.mubr.msk.bf16.gmra.mxu1 %vm235_vm0, %v580_v30 }
  0xe2   :  { %v490_v31 = vpop.f32.mrf.mxu0  ;;  %v508_v32 = vpop.f32.mrf.mxu1 }
  0xe4   :  { %v491_v33 = vpop.f32.mrf.mxu0  ;;  %v509_v34 = vpop.f32.mrf.mxu1 }
  0xe5   :  { %v492_v37 = vadd.f32 %v491_v33, %v490_v31  ;;  %v510_v45 = vadd.f32 %v509_v34, %v508_v32 }
  0xe6   :  { %v493_v35 = vpop.f32.mrf.mxu0  ;;  %v511_v36 = vpop.f32.mrf.mxu1 }
  0xe7   :  { %v283_v44 = vadd.f32 %v492_v37, %v425_v40  ;;  %v307_v57 = vadd.f32 %v510_v45, %v425_v40 }
  0xe8   :  { %v494_v38 = vpop.f32.mrf.mxu0  ;;  %v512_v39 = vpop.f32.mrf.mxu1 }
  0xe9   :  { %v495_v43 = vadd.f32 %v494_v38, %v493_v35 }
  0xea   :  { %v496_v41 = vpop.f32.mrf.mxu0  ;;  %v526_v42 = vpop.f32.mrf.mxu1 }
  0xeb   :  { %v286_v54 = vadd.f32 %v495_v43, %v425_v40 }
  0xec   :  { %v497_v46 = vpop.f32.mrf.mxu0  ;;  %v346_v47 = vpop.f32.mrf.mxu1 }
  0xed   :  { %v498_v48 = vadd.f32 %v497_v46, %v496_v41  ;;  %v347_v49 = vadd.f32 %v346_v47, %v283_v44 }
  0xee   :  { %v499_v50 = vpop.f32.mrf.mxu0  ;;  %v527_v51 = vpop.f32.mrf.mxu1 }
  0xef   :  { %v291_v52 = vadd.f32 %v498_v48, %v425_v40  ;;  %v376_v53 = vmax.f32 %v347_v49, 0.0 }
  0xf0   :  { %v500_v55 = vpop.f32.mrf.mxu0  ;;  %v349_v56 = vpop.f32.mrf.mxu1 }
  0xf1   :  { %v355_v58 = vadd.f32 %v526_v42, %v291_v52  ;;  %v467_v59 = vpack.c.bf16 %v376_v53, %v376_v53  ;;  %v501_v60 = vadd.f32 %v500_v55, %v499_v50  ;;  %v350_v61 = vadd.f32 %v349_v56, %v286_v54 }
  0xf2   :  { %v502_v62 = vpop.f32.mrf.mxu0  ;;  %v530_v63 = vpop.f32.mrf.mxu1 }
  0xf3   :  { %v378_v0 = vmax.f32 %v355_v58, 0.0  ;;  %413 = vst.msk [vmem:[%s725_s3] sm:$0xf] %vm412_vm1, %v467_v59  ;;  %v294_v1 = vadd.f32 %v501_v60, %v425_v40  ;;  %v377_v2 = vmax.f32 %v350_v61, 0.0  ;;  %v371_v3 = vadd.f32 %v530_v63, %v307_v57 }
  0xf4   :  { %v503_v4 = vpop.f32.mrf.mxu0  ;;  %v362_v5 = vpop.f32.mrf.mxu1 }
  0xf5   :  { %v469_v6 = vpack.c.bf16 %v378_v0, %v378_v0  ;;  %v358_v7 = vadd.f32 %v527_v51, %v294_v1  ;;  %v468_v8 = vpack.c.bf16 %v377_v2, %v377_v2  ;;  %v382_v9 = vmax.f32 %v371_v3, 0.0 }
  0xf6   :  { %v504_v10 = vadd.f32 %v503_v4, %v502_v62  ;;  %v505_v11 = vpop.f32.mrf.mxu0  ;;  %v531_v12 = vpop.f32.mrf.mxu1 }
  0xf7   :  { %415 = vst.msk [vmem:[%s725_s3 + $0x8] sm:$0xf] %vm412_vm1, %v469_v6  ;;  %v379_v13 = vmax.f32 %v358_v7, 0.0  ;;  %414 = vst.msk [vmem:[%s725_s3 + $0x4] sm:$0xf] %vm412_vm1, %v468_v8  ;;  %v473_v14 = vpack.c.bf16 %v382_v9, %v382_v9 }
  0xf8   :  { %v299_v15 = vadd.f32 %v504_v10, %v425_v40  ;;  %v506_v16 = vpop.f32.mrf.mxu0  ;;  %v365_v22 = vpop.f32.mrf.mxu1 }
  0xf9   :  { %v470_v17 = vpack.c.bf16 %v379_v13, %v379_v13  ;;  %420 = vst.msk [vmem:[%s725_s3 + $0x18] sm:$0x1] %vm419_vm2, %v473_v14  ;;  %v507_v18 = vadd.f32 %v506_v16, %v505_v11 }
  0xfa   :  { %v363_v19 = vadd.f32 %v362_v5, %v299_v15 }
  0xfb   :  { %416 = vst.msk [vmem:[%s725_s3 + $0xc] sm:$0xf] %vm412_vm1, %v470_v17  ;;  %v302_v20 = vadd.f32 %v507_v18, %v425_v40 }
  0xfc   :  { %v380_v21 = vmax.f32 %v363_v19, 0.0 }
  0xfd   :  { %v366_v23 = vadd.f32 %v365_v22, %v302_v20 }
  0xfe   :  { %v471_v24 = vpack.c.bf16 %v380_v21, %v380_v21 }
  0xff   :  { %v381_v25 = vmax.f32 %v366_v23, 0.0 }
 0x100   :  { %417 = vst.msk [vmem:[%s725_s3 + $0x10] sm:$0xf] %vm412_vm1, %v471_v24 }
 0x101   :  { %v472_v26 = vpack.c.bf16 %v381_v25, %v381_v25 }
 0x103   :  { %418 = vst.msk [vmem:[%s725_s3 + $0x14] sm:$0xf] %vm412_vm1, %v472_v26 }

// kernel: resnet_forward.25
= control target key start
LH: loop header
LB: loop body
LE: loop exit
PB: predicated region body
PF: predicated region fallthrough
CT: control target
= control target key end

     0   :  { %vm197_vm0 = vcmask 261120   ;;  %vm316_vm1 = vcmask 519168   ;;  %vm319_vm2 = vcmask 516096   ;;  %s524_s1 = inlined_call_operand.vmem [shape: bf16[288,64], index: 1, kind: input, shape index: {}]   ;;  %s525_s0 = inlined_call_operand.vmem [shape: bf16[18,288], index: 0, kind: input, shape index: {}]   ;;  %s526_s2 = inlined_call_operand.vmem [shape: f32[1,64], index: 2, kind: input, shape index: {}]   ;;  %s527_s3 = inlined_call_operand.vmem [shape: bf16[18,64], index: 3, kind: output, shape index: {}]  }
   0x1   :  { %v398_v0 = vld [vmem:[%s524_s1 + $0x78] sm:$0xff]   ;;  %v400_v2 = vld [vmem:[%s524_s1 + $0x70] sm:$0xff]   ;;  %v402_v4 = vld [vmem:[%s524_s1 + $0x68] sm:$0xff]  }
   0x2   :  { %v399_v1 = vld [vmem:[%s524_s1 + $0x38] sm:$0xff]   ;;  %358 = vmatprep.subr.bf16.mxu0 %v398_v0  ;;  %v401_v3 = vld [vmem:[%s524_s1 + $0x30] sm:$0xff]   ;;  %v403_v5 = vld [vmem:[%s524_s1 + $0x28] sm:$0xff]  }
   0x3   :  { %359 = vmatpush3.bf16.msra.mxu0 %v399_v1  ;;  %v404_v6 = vld [vmem:[%s524_s1 + $0x60] sm:$0xff]   ;;  %v406_v8 = vld [vmem:[%s524_s1 + $0x58] sm:$0xff]   ;;  %v412_v9 = vld [vmem:[%s524_s1 + $0x88] sm:$0xff]  }
   0x4   :  { %360 = vmatprep.subr.bf16.mxu0 %v400_v2  ;;  %v405_v7 = vld [vmem:[%s524_s1 + $0x20] sm:$0xff]   ;;  %v407_v10 = vld [vmem:[%s524_s1 + $0x18] sm:$0xff]   ;;  %v408_v11 = vld [vmem:[%s524_s1 + $0x50] sm:$0xff]   ;;  %390 = vmatprep.subr.bf16.mxu1 %v412_v9 }
   0x5   :  { %391 = vmatpush3.bf16.msra.mxu1 %v412_v9  ;;  %v415_v12 = vld [vmem:[%s524_s1 + $0x80] sm:$0xff]   ;;  %v409_v13 = vld [vmem:[%s524_s1 + $0x10] sm:$0xff]   ;;  %v410_v15 = vld [vmem:[%s524_s1 + $0x48] sm:$0xff]  }
   0x6   :  { %392 = vmatprep.subr.bf16.mxu1 %v415_v12  ;;  %v418_v14 = vld [vmem:[%s525_s0 + $0x4] ss:$12 sps:$4 sm:$0xff]   ;;  %v419_v16 = vld [vmem:[%s525_s0 + $0x8] ss:$12 sps:$4 sm:$0xff]   ;;  %v19_v21 = vld [vmem:[%s525_s0 + $0x18] sm:$0x11] }
   0x7   :  { %361 = vmatpush3.bf16.msra.mxu0 %v401_v3  ;;  %236 = vmatprep.mubr.bf16.mxu0 %v418_v14  ;;  %v420_v17 = vld [vmem:[%s525_s0 + $0x20] ss:$0 sps:$4 sm:$0x11]   ;;  %v411_v18 = vld [vmem:[%s524_s1 + $0x8] sm:$0xff]   ;;  %v330_v23 = vcombine.high %v19_v21, %v19_v21  ;;  %v329_v24 = vcombine.low %v19_v21, %v19_v21 }
   0x8   :  { %362 = vmatprep.subr.bf16.mxu0 %v402_v4  ;;  %394 = vmatprep.mubr.msk.bf16.mxu1 %vm197_vm0, %v419_v16  ;;  %v413_v19 = vld [vmem:[%s524_s1 + $0x40] sm:$0xff]  }
   0x9   :  { %393 = vmatpush3.bf16.msra.mxu1 %v415_v12  ;;  %v414_v20 = vld [vmem:[%s524_s1] sm:$0xff]  }
   0xa   :  { %v416_v22 = vld [vmem:[%s525_s0] ss:$12 sps:$4 sm:$0xff]  }
   0xb   :  { %363 = vmatpush3.bf16.msra.mxu0 %v403_v5  ;;  %v325_v30 = vld [vmem:[%s526_s2] ss:$0 sm:$0xff] }
   0xc   :  { %364 = vmatprep.subr.bf16.mxu0 %v404_v6  ;;  %395 = vmatmul.mubr.msk.bf16.vlgmr.msra.gmra.mxu1 %vm197_vm0, %v420_v17 }
   0xf   :  { %365 = vmatpush3.bf16.msra.mxu0 %v405_v7 }
  0x10   :  { %366 = vmatprep.subr.bf16.mxu0 %v406_v8 }
  0x13   :  { %367 = vmatpush3.bf16.msra.mxu0 %v407_v10 }
  0x14   :  { %368 = vmatprep.subr.bf16.mxu0 %v408_v11 }
  0x17   :  { %369 = vmatpush3.bf16.msra.mxu0 %v409_v13 }
  0x18   :  { %370 = vmatprep.subr.bf16.mxu0 %v410_v15 }
  0x1b   :  { %371 = vmatpush3.bf16.msra.mxu0 %v411_v18 }
  0x1c   :  { %372 = vmatprep.subr.bf16.mxu0 %v413_v19 }
  0x1f   :  { %373 = vmatpush3.bf16.msra.mxu0 %v414_v20 }
  0x22   :  { %237 = vmatmul.mubr.bf16.vlgmr.msra.gmra.mxu0 %v416_v22 }
  0x23   :  { %244 = vmatprep.mubr.bf16.mxu0 %v330_v23 }
  0x2a   :  { %245 = vmatmul.mubr.bf16.gmra.mxu0 %v329_v24 }
  0xcc   :  { %v396_v25 = vpop.f32.mrf.mxu1 }
  0xce   :  { %v286_v26 = vpop.f32.mrf.mxu1 }
  0xd0   :  { %v397_v27 = vpop.f32.mrf.mxu1 }
  0xd2   :  { %v289_v40 = vpop.f32.mrf.mxu1 }
  0xe2   :  { %v374_v28 = vpop.f32.mrf.mxu0 }
  0xe4   :  { %v375_v29 = vpop.f32.mrf.mxu0 }
  0xe5   :  { %v376_v31 = vadd.f32 %v375_v29, %v374_v28 }
  0xe6   :  { %v377_v32 = vpop.f32.mrf.mxu0 }
  0xe7   :  { %v239_v33 = vadd.f32 %v376_v31, %v325_v30 }
  0xe8   :  { %v378_v34 = vpop.f32.mrf.mxu0 }
  0xe9   :  { %v287_v35 = vadd.f32 %v286_v26, %v239_v33  ;;  %v379_v36 = vadd.f32 %v378_v34, %v377_v32 }
  0xea   :  { %v380_v37 = vpop.f32.mrf.mxu0 }
  0xeb   :  { %v300_v38 = vmax.f32 %v287_v35, 0.0  ;;  %v242_v39 = vadd.f32 %v379_v36, %v325_v30 }
  0xec   :  { %v381_v41 = vpop.f32.mrf.mxu0 }
  0xed   :  { %v355_v42 = vpack.c.bf16 %v300_v38, %v300_v38  ;;  %v290_v43 = vadd.f32 %v289_v40, %v242_v39  ;;  %v382_v44 = vadd.f32 %v381_v41, %v380_v37 }
  0xee   :  { %v383_v45 = vpop.f32.mrf.mxu0 }
  0xef   :  { %317 = vst.msk [vmem:[%s527_s3] sm:$0xf] %vm316_vm1, %v355_v42  ;;  %v301_v46 = vmax.f32 %v290_v43, 0.0  ;;  %v247_v47 = vadd.f32 %v382_v44, %v325_v30 }
  0xf0   :  { %v384_v48 = vpop.f32.mrf.mxu0 }
  0xf1   :  { %v356_v49 = vpack.c.bf16 %v301_v46, %v301_v46  ;;  %v295_v50 = vadd.f32 %v396_v25, %v247_v47 }
  0xf3   :  { %318 = vst.msk [vmem:[%s527_s3 + $0x4] sm:$0xf] %vm316_vm1, %v356_v49  ;;  %v302_v51 = vmax.f32 %v295_v50, 0.0 }
  0xf5   :  { %v357_v52 = vpack.c.bf16 %v302_v51, %v302_v51 }
  0xf7   :  { %320 = vst.msk [vmem:[%s527_s3 + $0x8] sm:$0x1] %vm319_vm2, %v357_v52 }

// kernel: resnet_forward.26
= control target key start
LH: loop header
LB: loop body
LE: loop exit
PB: predicated region body
PF: predicated region fallthrough
CT: control target
= control target key end

     0   :  { %vm364_vm0 = vcmask 523264   ;;  %vm543_vm1 = vcmask 516096   ;;  %vm540_vm2 = vcmask 519168   ;;  %s905_s1 = inlined_call_operand.vmem [shape: bf16[576,64], index: 1, kind: input, shape index: {}]   ;;  %s906_s0 = inlined_call_operand.vmem [shape: bf16[18,576], index: 0, kind: input, shape index: {}]   ;;  %s907_s2 = inlined_call_operand.vmem [shape: f32[1,64], index: 2, kind: input, shape index: {}]   ;;  %s908_s3 = inlined_call_operand.vmem [shape: bf16[18,64], index: 3, kind: input, shape index: {}]   ;;  %s909_s4 = inlined_call_operand.vmem [shape: bf16[18,64], index: 4, kind: output, shape index: {}]  }
   0x1   :  { %v682_v0 = vld [vmem:[%s905_s1 + $0x78] sm:$0xff]   ;;  %v686_v4 = vld [vmem:[%s905_s1 + $0x70] sm:$0xff]   ;;  %v690_v8 = vld [vmem:[%s905_s1 + $0x68] sm:$0xff]  }
   0x2   :  { %v683_v1 = vld [vmem:[%s905_s1 + $0x38] sm:$0xff]   ;;  %608 = vmatprep.subr.bf16.mxu0 %v682_v0  ;;  %v687_v5 = vld [vmem:[%s905_s1 + $0x30] sm:$0xff]   ;;  %v691_v9 = vld [vmem:[%s905_s1 + $0x28] sm:$0xff]  }
   0x3   :  { %v684_v2 = vld [vmem:[%s905_s1 + $0xf8] sm:$0xff]   ;;  %609 = vmatpush3.bf16.msra.mxu0 %v683_v1  ;;  %v688_v6 = vld [vmem:[%s905_s1 + $0xf0] sm:$0xff]   ;;  %v692_v10 = vld [vmem:[%s905_s1 + $0xe8] sm:$0xff]  }
   0x4   :  { %v685_v3 = vld [vmem:[%s905_s1 + $0xb8] sm:$0xff]   ;;  %636 = vmatprep.subr.bf16.mxu1 %v684_v2  ;;  %610 = vmatprep.subr.bf16.mxu0 %v686_v4  ;;  %v689_v7 = vld [vmem:[%s905_s1 + $0xb0] sm:$0xff]   ;;  %v693_v11 = vld [vmem:[%s905_s1 + $0xa8] sm:$0xff]  }
   0x5   :  { %637 = vmatpush3.bf16.msra.mxu1 %v685_v3  ;;  %v694_v12 = vld [vmem:[%s905_s1 + $0x60] sm:$0xff]   ;;  %v698_v16 = vld [vmem:[%s905_s1 + $0x58] sm:$0xff]   ;;  %v702_v20 = vld [vmem:[%s905_s1 + $0x50] sm:$0xff]  }
   0x6   :  { %638 = vmatprep.subr.bf16.mxu1 %v688_v6  ;;  %v695_v13 = vld [vmem:[%s905_s1 + $0x20] sm:$0xff]   ;;  %v699_v17 = vld [vmem:[%s905_s1 + $0x18] sm:$0xff]   ;;  %v703_v21 = vld [vmem:[%s905_s1 + $0x10] sm:$0xff]  }
   0x7   :  { %611 = vmatpush3.bf16.msra.mxu0 %v687_v5  ;;  %v696_v14 = vld [vmem:[%s905_s1 + $0xe0] sm:$0xff]   ;;  %v700_v18 = vld [vmem:[%s905_s1 + $0xd8] sm:$0xff]   ;;  %v704_v22 = vld [vmem:[%s905_s1 + $0xd0] sm:$0xff]  }
   0x8   :  { %612 = vmatprep.subr.bf16.mxu0 %v690_v8  ;;  %v697_v15 = vld [vmem:[%s905_s1 + $0xa0] sm:$0xff]   ;;  %v701_v19 = vld [vmem:[%s905_s1 + $0x98] sm:$0xff]   ;;  %v705_v23 = vld [vmem:[%s905_s1 + $0x90] sm:$0xff]  }
   0x9   :  { %639 = vmatpush3.bf16.msra.mxu1 %v689_v7  ;;  %v706_v24 = vld [vmem:[%s905_s1 + $0x48] sm:$0xff]   ;;  %v710_v28 = vld [vmem:[%s905_s1 + $0x40] sm:$0xff]   ;;  %v717_v34 = vld [vmem:[%s905_s1 + $0x118] sm:$0xff]  }
   0xa   :  { %640 = vmatprep.subr.bf16.mxu1 %v692_v10  ;;  %v707_v25 = vld [vmem:[%s905_s1 + $0x8] sm:$0xff]   ;;  %v711_v29 = vld [vmem:[%s905_s1] sm:$0xff]   ;;  %v721_v37 = vld [vmem:[%s905_s1 + $0x110] sm:$0xff]  }
   0xb   :  { %613 = vmatpush3.bf16.msra.mxu0 %v691_v9  ;;  %v708_v26 = vld [vmem:[%s905_s1 + $0xc8] sm:$0xff]   ;;  %v712_v30 = vld [vmem:[%s905_s1 + $0xc0] sm:$0xff]   ;;  %v25_v41 = vld [vmem:[%s906_s0 + $0x30] sm:$0x11] }
   0xc   :  { %614 = vmatprep.subr.bf16.mxu0 %v694_v12  ;;  %v709_v27 = vld [vmem:[%s905_s1 + $0x88] sm:$0xff]   ;;  %v713_v31 = vld [vmem:[%s906_s0] ss:$20 sps:$4 sm:$0xff]   ;;  %v715_v32 = vld [vmem:[%s906_s0 + $0x4] ss:$20 sps:$4 sm:$0xff]   ;;  %v558_v43 = vcombine.high %v25_v41, %v25_v41  ;;  %v557_v45 = vcombine.low %v25_v41, %v25_v41 }
   0xd   :  { %641 = vmatpush3.bf16.msra.mxu1 %v693_v11  ;;  %v716_v33 = vld [vmem:[%s905_s1 + $0x80] sm:$0xff]   ;;  %403 = vmatprep.mubr.bf16.mxu0 %v715_v32  ;;  %v718_v35 = vld [vmem:[%s906_s0 + $0x8] ss:$20 sps:$4 sm:$0xff]   ;;  %v729_v47 = vld [vmem:[%s906_s0 + $0x38] ss:$0 sps:$4 sm:$0x11]  }
   0xe   :  { %642 = vmatprep.subr.bf16.mxu1 %v696_v14  ;;  %v720_v36 = vld [vmem:[%s906_s0 + $0xc] ss:$20 sps:$4 sm:$0xff]   ;;  %v728_v44 = vld [vmem:[%s906_s0 + $0x10] ss:$20 sps:$4 sm:$0xff]   ;;  %v517_v1 = vld [vmem:[%s908_s3 + $0x8] sm:$0x1] }
   0xf   :  { %615 = vmatpush3.bf16.msra.mxu0 %v695_v13  ;;  %v24_v38 = vld [vmem:[%s906_s0 + $0x28] sm:$0x11]  ;;  %451 = vmatprep.mubr.bf16.mxu1 %v720_v36  ;;  %v727_v46 = vld [vmem:[%s905_s1 + $0x100] sm:$0xff]   ;;  %v520_v10 = vunpack.c.l.bf16 %v517_v1 }
  0x10   :  { %616 = vmatprep.subr.bf16.mxu0 %v698_v16  ;;  %v556_v39 = vcombine.high %v24_v38, %v24_v38  ;;  %v724_v40 = vld [vmem:[%s905_s1 + $0x108] sm:$0xff]   ;;  %v555_v42 = vcombine.low %v24_v38, %v24_v38  ;;  %v549_v59 = vld [vmem:[%s907_s2] ss:$0 sm:$0xff] }
  0x11   :  { %643 = vmatpush3.bf16.msra.mxu1 %v697_v15  ;;  %v605_v7 = vld [vmem:[%s908_s3] sm:$0xff]  }
  0x12   :  { %644 = vmatprep.subr.bf16.mxu1 %v700_v18  ;;  %v606_v13 = vunpack.c.l.bf16 %v605_v7 }
  0x13   :  { %617 = vmatpush3.bf16.msra.mxu0 %v699_v17 }
  0x14   :  { %618 = vmatprep.subr.bf16.mxu0 %v702_v20 }
  0x15   :  { %645 = vmatpush3.bf16.msra.mxu1 %v701_v19 }
  0x16   :  { %646 = vmatprep.subr.bf16.mxu1 %v704_v22 }
  0x17   :  { %619 = vmatpush3.bf16.msra.mxu0 %v703_v21 }
  0x18   :  { %620 = vmatprep.subr.bf16.mxu0 %v706_v24 }
  0x19   :  { %647 = vmatpush3.bf16.msra.mxu1 %v705_v23 }
  0x1a   :  { %648 = vmatprep.subr.bf16.mxu1 %v708_v26 }
  0x1b   :  { %621 = vmatpush3.bf16.msra.mxu0 %v707_v25  ;;  %v607_v25 = vunpack.c.h.bf16 %v605_v7 }
  0x1c   :  { %622 = vmatprep.subr.bf16.mxu0 %v710_v28 }
  0x1d   :  { %649 = vmatpush3.bf16.msra.mxu1 %v709_v27 }
  0x1e   :  { %650 = vmatprep.subr.bf16.mxu1 %v712_v30 }
  0x1f   :  { %623 = vmatpush3.bf16.msra.mxu0 %v711_v29 }
  0x20   :  { %670 = vmatprep.subr.bf16.mxu0 %v717_v34 }
  0x21   :  { %651 = vmatpush3.bf16.msra.mxu1 %v716_v33 }
  0x22   :  { %404 = vmatmul.mubr.bf16.vlgmr.msra.gmra.mxu0 %v713_v31 }
  0x23   :  { %671 = vmatpush3.bf16.msra.mxu0 %v717_v34  ;;  %411 = vmatprep.mubr.bf16.mxu0 %v556_v39 }
  0x24   :  { %452 = vmatmul.mubr.bf16.vlgmr.msra.gmra.mxu1 %v718_v35  ;;  %672 = vmatprep.subr.bf16.mxu0 %v721_v37 }
  0x25   :  { %459 = vmatprep.mubr.bf16.mxu1 %v558_v43 }
  0x27   :  { %673 = vmatpush3.bf16.msra.mxu0 %v721_v37 }
  0x28   :  { %674 = vmatprep.subr.bf16.mxu0 %v724_v40 }
  0x2a   :  { %412 = vmatmul.mubr.bf16.gmra.mxu0 %v555_v42 }
  0x2b   :  { %678 = vmatprep.mubr.msk.bf16.mxu0 %vm364_vm0, %v728_v44  ;;  %675 = vmatpush3.bf16.msra.mxu0 %v724_v40 }
  0x2c   :  { %460 = vmatmul.mubr.bf16.gmra.mxu1 %v557_v45  ;;  %676 = vmatprep.subr.bf16.mxu0 %v727_v46 }
  0x2f   :  { %677 = vmatpush3.bf16.msra.mxu0 %v727_v46 }
  0x32   :  { %679 = vmatmul.mubr.msk.bf16.vlgmr.msra.gmra.mxu0 %vm364_vm0, %v729_v47 }
  0xe2   :  { %v624_v48 = vpop.f32.mrf.mxu0 }
  0xe4   :  { %v625_v49 = vpop.f32.mrf.mxu0  ;;  %v652_v50 = vpop.f32.mrf.mxu1 }
  0xe5   :  { %v626_v57 = vadd.f32 %v625_v49, %v624_v48 }
  0xe6   :  { %v627_v51 = vpop.f32.mrf.mxu0  ;;  %v653_v52 = vpop.f32.mrf.mxu1 }
  0xe7   :  { %v406_v2 = vadd.f32 %v626_v57, %v549_v59  ;;  %v654_v3 = vadd.f32 %v653_v52, %v652_v50 }
  0xe8   :  { %v628_v53 = vpop.f32.mrf.mxu0  ;;  %v655_v54 = vpop.f32.mrf.mxu1 }
  0xe9   :  { %v629_v4 = vadd.f32 %v628_v53, %v627_v51  ;;  %v454_v17 = vadd.f32 %v654_v3, %v406_v2 }
  0xea   :  { %v630_v55 = vpop.f32.mrf.mxu0  ;;  %v656_v56 = vpop.f32.mrf.mxu1 }
  0xeb   :  { %v409_v14 = vadd.f32 %v629_v4, %v549_v59  ;;  %v657_v15 = vadd.f32 %v656_v56, %v655_v54 }
  0xec   :  { %v631_v58 = vpop.f32.mrf.mxu0  ;;  %v658_v61 = vpop.f32.mrf.mxu1 }
  0xed   :  { %v632_v60 = vadd.f32 %v631_v58, %v630_v55  ;;  %v457_v24 = vadd.f32 %v657_v15, %v409_v14 }
  0xee   :  { %v633_v62 = vpop.f32.mrf.mxu0  ;;  %v659_v0 = vpop.f32.mrf.mxu1 }
  0xef   :  { %v414_v63 = vadd.f32 %v632_v60, %v549_v59  ;;  %v660_v5 = vadd.f32 %v659_v0, %v658_v61 }
  0xf0   :  { %v634_v6 = vpop.f32.mrf.mxu0  ;;  %v661_v8 = vpop.f32.mrf.mxu1 }
  0xf1   :  { %v462_v9 = vadd.f32 %v660_v5, %v414_v63 }
  0xf2   :  { %v680_v11 = vpop.f32.mrf.mxu0  ;;  %v662_v12 = vpop.f32.mrf.mxu1 }
  0xf3   :  { %v510_v16 = vadd.f32 %v680_v11, %v462_v9 }
  0xf4   :  { %v501_v18 = vpop.f32.mrf.mxu0 }
  0xf5   :  { %v523_v19 = vadd.f32 %v520_v10, %v510_v16  ;;  %v502_v20 = vadd.f32 %v501_v18, %v454_v17 }
  0xf6   :  { %v681_v21 = vpop.f32.mrf.mxu0 }
  0xf7   :  { %v526_v22 = vmax.f32 %v523_v19, 0.0  ;;  %v521_v23 = vadd.f32 %v606_v13, %v502_v20 }
  0xf8   :  { %v504_v26 = vpop.f32.mrf.mxu0 }
  0xf9   :  { %v603_v27 = vpack.c.bf16 %v526_v22, %v526_v22  ;;  %v524_v28 = vmax.f32 %v521_v23, 0.0  ;;  %v505_v29 = vadd.f32 %v504_v26, %v457_v24 }
  0xfb   :  { %544 = vst.msk [vmem:[%s909_s4 + $0x8] sm:$0x1] %vm543_vm1, %v603_v27  ;;  %v601_v30 = vpack.c.bf16 %v524_v28, %v524_v28  ;;  %v522_v31 = vadd.f32 %v607_v25, %v505_v29 }
  0xfd   :  { %541 = vst.msk [vmem:[%s909_s4] sm:$0xf] %vm540_vm2, %v601_v30  ;;  %v525_v32 = vmax.f32 %v522_v31, 0.0 }
  0xff   :  { %v602_v33 = vpack.c.bf16 %v525_v32, %v525_v32 }
 0x101   :  { %542 = vst.msk [vmem:[%s909_s4 + $0x4] sm:$0xf] %vm540_vm2, %v602_v33 }

// kernel: resnet_forward.27
= control target key start
LH: loop header
LB: loop body
LE: loop exit
PB: predicated region body
PF: predicated region fallthrough
CT: control target
= control target key end

     0   :  { %vm361_vm0 = vcmask 523264   ;;  %vm531_vm1 = vcmask 516096   ;;  %vm528_vm2 = vcmask 519168   ;;  %s878_s1 = inlined_call_operand.vmem [shape: bf16[576,64], index: 1, kind: input, shape index: {}]   ;;  %s879_s0 = inlined_call_operand.vmem [shape: bf16[18,576], index: 0, kind: input, shape index: {}]   ;;  %s880_s2 = inlined_call_operand.vmem [shape: f32[1,64], index: 2, kind: input, shape index: {}]   ;;  %s881_s3 = inlined_call_operand.vmem [shape: bf16[18,64], index: 3, kind: output, shape index: {}]  }
   0x1   :  { %v666_v0 = vld [vmem:[%s878_s1 + $0x78] sm:$0xff]   ;;  %v670_v4 = vld [vmem:[%s878_s1 + $0x70] sm:$0xff]   ;;  %v674_v8 = vld [vmem:[%s878_s1 + $0x68] sm:$0xff]  }
   0x2   :  { %v667_v1 = vld [vmem:[%s878_s1 + $0x38] sm:$0xff]   ;;  %592 = vmatprep.subr.bf16.mxu0 %v666_v0  ;;  %v671_v5 = vld [vmem:[%s878_s1 + $0x30] sm:$0xff]   ;;  %v675_v9 = vld [vmem:[%s878_s1 + $0x28] sm:$0xff]  }
   0x3   :  { %v668_v2 = vld [vmem:[%s878_s1 + $0xf8] sm:$0xff]   ;;  %593 = vmatpush3.bf16.msra.mxu0 %v667_v1  ;;  %v672_v6 = vld [vmem:[%s878_s1 + $0xf0] sm:$0xff]   ;;  %v676_v10 = vld [vmem:[%s878_s1 + $0xe8] sm:$0xff]  }
   0x4   :  { %v669_v3 = vld [vmem:[%s878_s1 + $0xb8] sm:$0xff]   ;;  %620 = vmatprep.subr.bf16.mxu1 %v668_v2  ;;  %594 = vmatprep.subr.bf16.mxu0 %v670_v4  ;;  %v673_v7 = vld [vmem:[%s878_s1 + $0xb0] sm:$0xff]   ;;  %v677_v11 = vld [vmem:[%s878_s1 + $0xa8] sm:$0xff]  }
   0x5   :  { %621 = vmatpush3.bf16.msra.mxu1 %v669_v3  ;;  %v678_v12 = vld [vmem:[%s878_s1 + $0x60] sm:$0xff]   ;;  %v682_v16 = vld [vmem:[%s878_s1 + $0x58] sm:$0xff]   ;;  %v686_v20 = vld [vmem:[%s878_s1 + $0x50] sm:$0xff]  }
   0x6   :  { %622 = vmatprep.subr.bf16.mxu1 %v672_v6  ;;  %v679_v13 = vld [vmem:[%s878_s1 + $0x20] sm:$0xff]   ;;  %v683_v17 = vld [vmem:[%s878_s1 + $0x18] sm:$0xff]   ;;  %v687_v21 = vld [vmem:[%s878_s1 + $0x10] sm:$0xff]  }
   0x7   :  { %595 = vmatpush3.bf16.msra.mxu0 %v671_v5  ;;  %v680_v14 = vld [vmem:[%s878_s1 + $0xe0] sm:$0xff]   ;;  %v684_v18 = vld [vmem:[%s878_s1 + $0xd8] sm:$0xff]   ;;  %v688_v22 = vld [vmem:[%s878_s1 + $0xd0] sm:$0xff]  }
   0x8   :  { %596 = vmatprep.subr.bf16.mxu0 %v674_v8  ;;  %v681_v15 = vld [vmem:[%s878_s1 + $0xa0] sm:$0xff]   ;;  %v685_v19 = vld [vmem:[%s878_s1 + $0x98] sm:$0xff]   ;;  %v689_v23 = vld [vmem:[%s878_s1 + $0x90] sm:$0xff]  }
   0x9   :  { %623 = vmatpush3.bf16.msra.mxu1 %v673_v7  ;;  %v690_v24 = vld [vmem:[%s878_s1 + $0x48] sm:$0xff]   ;;  %v694_v28 = vld [vmem:[%s878_s1 + $0x40] sm:$0xff]   ;;  %v701_v34 = vld [vmem:[%s878_s1 + $0x118] sm:$0xff]  }
   0xa   :  { %624 = vmatprep.subr.bf16.mxu1 %v676_v10  ;;  %v691_v25 = vld [vmem:[%s878_s1 + $0x8] sm:$0xff]   ;;  %v695_v29 = vld [vmem:[%s878_s1] sm:$0xff]   ;;  %v705_v37 = vld [vmem:[%s878_s1 + $0x110] sm:$0xff]  }
   0xb   :  { %597 = vmatpush3.bf16.msra.mxu0 %v675_v9  ;;  %v692_v26 = vld [vmem:[%s878_s1 + $0xc8] sm:$0xff]   ;;  %v696_v30 = vld [vmem:[%s878_s1 + $0xc0] sm:$0xff]   ;;  %v22_v41 = vld [vmem:[%s879_s0 + $0x30] sm:$0x11] }
   0xc   :  { %598 = vmatprep.subr.bf16.mxu0 %v678_v12  ;;  %v693_v27 = vld [vmem:[%s878_s1 + $0x88] sm:$0xff]   ;;  %v697_v31 = vld [vmem:[%s879_s0] ss:$20 sps:$4 sm:$0xff]   ;;  %v699_v32 = vld [vmem:[%s879_s0 + $0x4] ss:$20 sps:$4 sm:$0xff]   ;;  %v546_v43 = vcombine.high %v22_v41, %v22_v41  ;;  %v545_v45 = vcombine.low %v22_v41, %v22_v41 }
   0xd   :  { %625 = vmatpush3.bf16.msra.mxu1 %v677_v11  ;;  %v700_v33 = vld [vmem:[%s878_s1 + $0x80] sm:$0xff]   ;;  %400 = vmatprep.mubr.bf16.mxu0 %v699_v32  ;;  %v702_v35 = vld [vmem:[%s879_s0 + $0x8] ss:$20 sps:$4 sm:$0xff]   ;;  %v713_v47 = vld [vmem:[%s879_s0 + $0x38] ss:$0 sps:$4 sm:$0x11]  }
   0xe   :  { %626 = vmatprep.subr.bf16.mxu1 %v680_v14  ;;  %v704_v36 = vld [vmem:[%s879_s0 + $0xc] ss:$20 sps:$4 sm:$0xff]   ;;  %v712_v44 = vld [vmem:[%s879_s0 + $0x10] ss:$20 sps:$4 sm:$0xff]  }
   0xf   :  { %599 = vmatpush3.bf16.msra.mxu0 %v679_v13  ;;  %v21_v38 = vld [vmem:[%s879_s0 + $0x28] sm:$0x11]  ;;  %448 = vmatprep.mubr.bf16.mxu1 %v704_v36  ;;  %v711_v46 = vld [vmem:[%s878_s1 + $0x100] sm:$0xff]  }
  0x10   :  { %600 = vmatprep.subr.bf16.mxu0 %v682_v16  ;;  %v544_v39 = vcombine.high %v21_v38, %v21_v38  ;;  %v708_v40 = vld [vmem:[%s878_s1 + $0x108] sm:$0xff]   ;;  %v543_v42 = vcombine.low %v21_v38, %v21_v38  ;;  %v537_v59 = vld [vmem:[%s880_s2] ss:$0 sm:$0xff] }
  0x11   :  { %627 = vmatpush3.bf16.msra.mxu1 %v681_v15 }
  0x12   :  { %628 = vmatprep.subr.bf16.mxu1 %v684_v18 }
  0x13   :  { %601 = vmatpush3.bf16.msra.mxu0 %v683_v17 }
  0x14   :  { %602 = vmatprep.subr.bf16.mxu0 %v686_v20 }
  0x15   :  { %629 = vmatpush3.bf16.msra.mxu1 %v685_v19 }
  0x16   :  { %630 = vmatprep.subr.bf16.mxu1 %v688_v22 }
  0x17   :  { %603 = vmatpush3.bf16.msra.mxu0 %v687_v21 }
  0x18   :  { %604 = vmatprep.subr.bf16.mxu0 %v690_v24 }
  0x19   :  { %631 = vmatpush3.bf16.msra.mxu1 %v689_v23 }
  0x1a   :  { %632 = vmatprep.subr.bf16.mxu1 %v692_v26 }
  0x1b   :  { %605 = vmatpush3.bf16.msra.mxu0 %v691_v25 }
  0x1c   :  { %606 = vmatprep.subr.bf16.mxu0 %v694_v28 }
  0x1d   :  { %633 = vmatpush3.bf16.msra.mxu1 %v693_v27 }
  0x1e   :  { %634 = vmatprep.subr.bf16.mxu1 %v696_v30 }
  0x1f   :  { %607 = vmatpush3.bf16.msra.mxu0 %v695_v29 }
  0x20   :  { %654 = vmatprep.subr.bf16.mxu0 %v701_v34 }
  0x21   :  { %635 = vmatpush3.bf16.msra.mxu1 %v700_v33 }
  0x22   :  { %401 = vmatmul.mubr.bf16.vlgmr.msra.gmra.mxu0 %v697_v31 }
  0x23   :  { %655 = vmatpush3.bf16.msra.mxu0 %v701_v34  ;;  %408 = vmatprep.mubr.bf16.mxu0 %v544_v39 }
  0x24   :  { %449 = vmatmul.mubr.bf16.vlgmr.msra.gmra.mxu1 %v702_v35  ;;  %656 = vmatprep.subr.bf16.mxu0 %v705_v37 }
  0x25   :  { %456 = vmatprep.mubr.bf16.mxu1 %v546_v43 }
  0x27   :  { %657 = vmatpush3.bf16.msra.mxu0 %v705_v37 }
  0x28   :  { %658 = vmatprep.subr.bf16.mxu0 %v708_v40 }
  0x2a   :  { %409 = vmatmul.mubr.bf16.gmra.mxu0 %v543_v42 }
  0x2b   :  { %662 = vmatprep.mubr.msk.bf16.mxu0 %vm361_vm0, %v712_v44  ;;  %659 = vmatpush3.bf16.msra.mxu0 %v708_v40 }
  0x2c   :  { %457 = vmatmul.mubr.bf16.gmra.mxu1 %v545_v45  ;;  %660 = vmatprep.subr.bf16.mxu0 %v711_v46 }
  0x2f   :  { %661 = vmatpush3.bf16.msra.mxu0 %v711_v46 }
  0x32   :  { %663 = vmatmul.mubr.msk.bf16.vlgmr.msra.gmra.mxu0 %vm361_vm0, %v713_v47 }
  0xe2   :  { %v608_v48 = vpop.f32.mrf.mxu0 }
  0xe4   :  { %v609_v49 = vpop.f32.mrf.mxu0  ;;  %v636_v50 = vpop.f32.mrf.mxu1 }
  0xe5   :  { %v610_v57 = vadd.f32 %v609_v49, %v608_v48 }
  0xe6   :  { %v611_v51 = vpop.f32.mrf.mxu0  ;;  %v637_v52 = vpop.f32.mrf.mxu1 }
  0xe7   :  { %v403_v1 = vadd.f32 %v610_v57, %v537_v59  ;;  %v638_v2 = vadd.f32 %v637_v52, %v636_v50 }
  0xe8   :  { %v612_v53 = vpop.f32.mrf.mxu0  ;;  %v639_v54 = vpop.f32.mrf.mxu1 }
  0xe9   :  { %v613_v3 = vadd.f32 %v612_v53, %v611_v51  ;;  %v451_v13 = vadd.f32 %v638_v2, %v403_v1 }
  0xea   :  { %v614_v55 = vpop.f32.mrf.mxu0  ;;  %v640_v56 = vpop.f32.mrf.mxu1 }
  0xeb   :  { %v406_v10 = vadd.f32 %v613_v3, %v537_v59  ;;  %v641_v11 = vadd.f32 %v640_v56, %v639_v54 }
  0xec   :  { %v615_v58 = vpop.f32.mrf.mxu0  ;;  %v642_v61 = vpop.f32.mrf.mxu1 }
  0xed   :  { %v616_v60 = vadd.f32 %v615_v58, %v614_v55  ;;  %v454_v20 = vadd.f32 %v641_v11, %v406_v10 }
  0xee   :  { %v617_v62 = vpop.f32.mrf.mxu0  ;;  %v643_v0 = vpop.f32.mrf.mxu1 }
  0xef   :  { %v411_v63 = vadd.f32 %v616_v60, %v537_v59  ;;  %v644_v4 = vadd.f32 %v643_v0, %v642_v61 }
  0xf0   :  { %v618_v5 = vpop.f32.mrf.mxu0  ;;  %v645_v6 = vpop.f32.mrf.mxu1 }
  0xf1   :  { %v459_v7 = vadd.f32 %v644_v4, %v411_v63 }
  0xf2   :  { %v664_v8 = vpop.f32.mrf.mxu0  ;;  %v646_v9 = vpop.f32.mrf.mxu1 }
  0xf3   :  { %v507_v12 = vadd.f32 %v664_v8, %v459_v7 }
  0xf4   :  { %v498_v14 = vpop.f32.mrf.mxu0 }
  0xf5   :  { %v514_v15 = vmax.f32 %v507_v12, 0.0  ;;  %v499_v16 = vadd.f32 %v498_v14, %v451_v13 }
  0xf6   :  { %v665_v17 = vpop.f32.mrf.mxu0 }
  0xf7   :  { %v591_v18 = vpack.c.bf16 %v514_v15, %v514_v15  ;;  %v512_v19 = vmax.f32 %v499_v16, 0.0 }
  0xf8   :  { %v501_v21 = vpop.f32.mrf.mxu0 }
  0xf9   :  { %532 = vst.msk [vmem:[%s881_s3 + $0x8] sm:$0x1] %vm531_vm1, %v591_v18  ;;  %v589_v22 = vpack.c.bf16 %v512_v19, %v512_v19  ;;  %v502_v23 = vadd.f32 %v501_v21, %v454_v20 }
  0xfb   :  { %529 = vst.msk [vmem:[%s881_s3] sm:$0xf] %vm528_vm2, %v589_v22  ;;  %v513_v24 = vmax.f32 %v502_v23, 0.0 }
  0xfd   :  { %v590_v25 = vpack.c.bf16 %v513_v24, %v513_v24 }
  0xff   :  { %530 = vst.msk [vmem:[%s881_s3 + $0x4] sm:$0xf] %vm528_vm2, %v590_v25 }

// kernel: resnet_forward.29
= control target key start
LH: loop header
LB: loop body
LE: loop exit
PB: predicated region body
PF: predicated region fallthrough
CT: control target
= control target key end

     0   :  { %v224_v1 = vmov 0.0   ;;  %vm225_vm0 = vmmov 0   ;;  %vm23_vm1 = vcmask 523264   ;;  %vm25_vm2 = vcmask 516096   ;;  %s292_s0 = inlined_call_operand.vmem [shape: bf16[2,9,64], index: 0, kind: input, shape index: {}]   ;;  %s293_s1 = inlined_call_operand.vmem [shape: f32[64,10], index: 1, kind: input, shape index: {}]   ;;  %s294_s2 = inlined_call_operand.vmem [shape: f32[1,10], index: 2, kind: input, shape index: {}]   ;;  %s295_s3 = inlined_call_operand.hbm [shape: f32[2,10], index: 3, kind: output, shape index: {}]  }
   0x1   :  { %v53_v0 = vld [vmem:[%s293_s1 + $0x38] sm:$0xff]  ;;  %176 = vmatprep.subr.mxu0 %v224_v1  ;;  %v52_v2 = vld [vmem:[%s293_s1 + $0x30] sm:$0xff]  ;;  %192 = vmatprep.mubr.msk.f32.mxu0 %vm225_vm0, %v224_v1  ;;  %v15_v3 = vld [vmem:[%s292_s0] ss:$8 sps:$4 sm:$0xff]  }
   0x2   :  { %177 = vmatpush3.msra.mxu0 %v53_v0  ;;  %v51_v4 = vld [vmem:[%s293_s1 + $0x28] sm:$0xff]  ;;  %v16_v5 = vld [vmem:[%s292_s0 + $0x4] sm:$0x1]  ;;  %v19_v7 = vunpack.c.l.bf16 %v15_v3  ;;  %v21_v8 = vunpack.c.h.bf16 %v15_v3 }
   0x3   :  { %178 = vmatprep.subr.mxu0 %v224_v1  ;;  %v18_v6 = vld [vmem:[%s292_s0 + $0xc] sm:$0x1]  ;;  %v20_v9 = vunpack.c.l.bf16 %v16_v5 }
   0x4   :  { %179 = vmatpush3.msra.mxu0 %v52_v2  ;;  %v22_v10 = vunpack.c.l.bf16 %v18_v6 }
   0x5   :  { %8 = vsyncpa [#allocation3], 0  ;;  %180 = vmatprep.subr.mxu0 %v224_v1  ;;  %v50_v11 = vld [vmem:[%s293_s1 + $0x20] sm:$0xff]  ;;  %v24_v12 = vsel %vm23_vm1, %v19_v7, 0.0  ;;  %v34_v13 = vsel %vm23_vm1, %v21_v8, 0.0  ;;  %v26_v14 = vsel %vm25_vm2, %v20_v9, 0.0 }
   0x6   :  { %181 = vmatpush3.msra.mxu0 %v51_v4  ;;  %v35_v15 = vsel %vm25_vm2, %v22_v10, 0.0  ;;  %v49_v16 = vld [vmem:[%s293_s1 + $0x18] sm:$0xff]  ;;  %v27_v17 = vadd.f32 %v26_v14, %v24_v12  ;;  %v48_v19 = vld [vmem:[%s293_s1 + $0x10] sm:$0xff]  ;;  %v47_v22 = vld [vmem:[%s293_s1 + $0x8] sm:$0xff]  ;;  %vm63_vm3 = vcmask 1041409   ;;  %vm137_vm4 = vcmask 74752  }
   0x7   :  { %182 = vmatprep.subr.mxu0 %v224_v1  ;;  %v36_v18 = vadd.f32 %v35_v15, %v34_v13  ;;  %v46_v25 = vld [vmem:[%s293_s1] sm:$0xff]  ;;  %s226_s1 = smov [#allocation2]  }
   0x8   :  { %183 = vmatpush3.msra.mxu0 %v50_v11  ;;  %v28_v20 = vrot.slane %v27_v17, 4  ;;  %v165_v37 = vld [vmem:[%s294_s2] ss:$0 sm:$0xff]  ;;  %s157_s2 = sshll.u32 %s226_s1, 4  ;;  %s158_s2 = int_to_ptr.vmem [resolvable:$true] %s157_s2 }
   0x9   :  { %184 = vmatprep.subr.mxu0 %v224_v1  ;;  %v37_v21 = vrot.slane %v36_v18, 4  ;;  %s202_s8 = scalar_lea.vmem %s158_s2, 32  ;;  %p207_p1 = scmp.lt.s32.totalorder %s158_s2, %s158_s2 }
   0xa   :  { %185 = vmatpush3.msra.mxu0 %v49_v16  ;;  %v29_v23 = vadd.f32 %v28_v20, %v27_v17  ;;  %p203_p0 = scmp.ne.s32.totalorder %s158_s2, %s202_s8  ;;  %p208_p2 = scmp.lt.s32.totalorder %s202_s8, %s202_s8 }
   0xb   :  { %186 = vmatprep.subr.mxu0 %v224_v1  ;;  %v38_v24 = vadd.f32 %v37_v21, %v36_v18 }
   0xc   :  { %187 = vmatpush3.msra.mxu0 %v48_v19  ;;  %v30_v26 = vrot.slane %v29_v23, 2  ;;  %p209_p3 = por %p208_p2, %p207_p1 }
   0xd   :  { %188 = vmatprep.subr.mxu0 %v224_v1  ;;  %v39_v27 = vrot.slane %v38_v24, 2 }
   0xe   :  { %189 = vmatpush3.msra.mxu0 %v47_v22  ;;  %v31_v28 = vadd.f32 %v30_v26, %v29_v23  ;;  %p210_p4 = pnand %p209_p3, %p203_p0 }
   0xf   :  { %190 = vmatprep.subr.mxu0 %v224_v1  ;;  %v40_v29 = vadd.f32 %v39_v27, %v38_v24 }
  0x10   :  { %191 = vmatpush3.msra.mxu0 %v46_v25  ;;  %v32_v30 = vrot.slane %v31_v28, 1 }
  0x11   :  { %v41_v31 = vrot.slane %v40_v29, 1 }
  0x12   :  { %v33_v32 = vadd.f32 %v32_v30, %v31_v28 }
  0x13   :  { %v42_v33 = vadd.f32 %v41_v31, %v40_v29 }
  0x14   :  { %v44_v34 = vmul.f32 0.11111111, %v33_v32 }
  0x15   :  { %v45_v35 = vmul.f32 0.11111111, %v42_v33 }
  0x17   :  { %v64_v36 = vsel %vm63_vm3, %v45_v35, %v44_v34 }
  0x18   :  { %193 = vmatmul.mubr.msk.f32.vlgmr.msra.gmra.mxu0 %vm23_vm1, %v64_v36 }
  0xd8   :  { %v133_v38 = vpop.f32.mrf.mxu0 }
  0xd9   :  { %v134_v39 = vadd.f32 %v165_v37, %v133_v38 }
  0xda   :  { %v194_v40 = vpop.f32.mrf.mxu0 }
  0xdb   :  { %v138_v41 = vsel %vm137_vm4, %v134_v39, -inf }
  0xdc   :  { %139 = vmax.xlane.f32.xlu0 %v138_v41 }
 0x165   :  { %v140_v42 = vpop.xlane.xlu0 %139 }
 0x166   :  { %v141_v43 = vsub.f32 %v134_v39, %v140_v42 }
 0x168   :  { %v142_v44 = vmul.f32 1.442695, %v141_v43 }
 0x16a   :  { %198 = vpow2.f32 %v142_v44 }
 0x177   :  { %v199_v45 = vpop.eup %198 }
 0x178   :  { %v144_v46 = vsel %vm137_vm4, %v199_v45, 0.0 }
 0x179   :  { %145 = vadd.xlane.f32.xlu0 %v144_v46 }
 0x202   :  { %v146_v47 = vpop.xlane.xlu0 %145 }
 0x203   :  { %200 = vlog2.f32 %v146_v47 }
 0x210   :  { %v201_v48 = vpop.eup %200 }
 0x211   :  { %v148_v49 = vmul.f32 0.6931472, %v201_v48 }
 0x213   :  { %v149_v50 = vsub.f32 %v141_v43, %v148_v49 }
 0x215   :  { %150 = vst.msk [vmem:[#allocation2] sm:$0x3] %vm137_vm4, %v149_v50 }
 0x216   :  { %213 = shalt.err (!%p210_p4)
}
 0x217   :  { %160 = dma.vmem_to_hbm [thread:$0]  %s158_s2, 32, %s295_s3, [#allocation3]  }
 0x218   :  { %222 = dma.done.wait [#allocation3], 32  }
 0x219   :  { %223 = vsyncadd [#allocation3], 4294967264 }
 0x21a   :  { %164 = vsyncpa [#allocation3], 1 }

</bundles_post_ra>
